<compile_context>
chip_gen: v6e
topology: v6e:2x2x1
jax: 0.10.0
libtpu: 0.0.40
codegen_flags: <defaults>
</compile_context>

<pallas_src>
import functools

import jax
import jax.numpy as jnp
from jax.experimental import pallas as pl
from jax.experimental.pallas import tpu as pltpu


def _alpha_block_kernel(x_ref, mask_ref,
                        w1_ref, g1_ref, be1_ref,
                        w2_ref, g2_ref, be2_ref,
                        o_ref, img, col,
                        *, margin, wp, n_valid, eps):
    R, C = o_ref.shape
    M = margin
    mask = mask_ref[...]                    # (R, 1): 1.0 on real pixels, 0.0 on pad ring
    inv_cnt = 1.0 / float(n_valid)

    def batchnorm(y, g_ref, be_ref):
        # Training-mode BN folded to one per-channel affine.  Single masked reduction
        # pass: mean and E[y^2] together, var = E[y^2] - mean^2 (fine at 3e-2 tol).
        ym = y * mask
        mean = jnp.sum(ym, axis=0, keepdims=True) * inv_cnt
        ex2 = jnp.sum(ym * ym, axis=0, keepdims=True) * inv_cnt
        var = ex2 - mean * mean
        a = g_ref[...] * jax.lax.rsqrt(var + eps)
        c = be_ref[...] - mean * a
        return y * a + c

    offsets = [(kh - 1) * wp + (kw - 1) for kh in range(3) for kw in range(3)]

    def im2col():
        # Lane-concatenate the 9 row-shifted windows of the (zero-ringed, zero-margined)
        # image scratch into the (R, 9C) bf16 staging buffer -> one K=9C MXU dot.
        for i, d in enumerate(offsets):
            col[:, pl.ds(i * C, C)] = img[pl.ds(M + d, R), :].astype(jnp.bfloat16)

    # ---- conv1: in-kernel im2col + single (R, 9C) @ (9C, C) matmul -------------------
    # Zero only the 2*M margin rows once; interior rows are always fully overwritten.
    img[pl.ds(0, M), :] = jnp.zeros((M, C), jnp.float32)
    img[pl.ds(M + R, M), :] = jnp.zeros((M, C), jnp.float32)
    img[pl.ds(M, R), :] = x_ref[...]
    im2col()
    # Conv biases are omitted: training-mode BN's batch mean absorbs them exactly.
    y1 = jnp.dot(col[...], w1_ref[...], preferred_element_type=jnp.float32)
    # Multiplying by `mask` re-zeroes the padding-ring rows, which *is* the zero
    # padding of the second convolution's input.
    hid = jnp.maximum(batchnorm(y1, g1_ref, be1_ref), 0.0) * mask

    # ---- conv2: same structure, reusing both scratches (margin rows stay zero) -------
    img[pl.ds(M, R), :] = hid
    im2col()
    y2 = jnp.dot(col[...], w2_ref[...], preferred_element_type=jnp.float32)

    # bn2 -> + residual -> relu   (pad-ring rows are discarded by the wrapper's crop)
    out = batchnorm(y2, g2_ref, be2_ref) + x_ref[...]
    o_ref[...] = jnp.maximum(out, 0.0)


def basic_alpha_chess_block(x_nchw, params, *, stride=1, eps=1e-5):
    # TODO(synk): stride > 1 is not implemented (the PyTorch module's residual add would
    # shape-error in that case anyway); BatchNorm running-stat updates (module state side
    # effect) are not reproduced since they don't affect the forward output.
    assert stride == 1, "residual add requires stride == 1 (as in the PyTorch module)"
    N, C, H, W = x_nchw.shape
    Hp, Wp = H + 2, W + 2
    R = N * Hp * Wp
    M = Wp + 1                                      # margin rows for flat row shifts

    # glue: NCHW -> zero-padded channels-last rows (single (R, C) f32 input; the kernel
    # does its own im2col from these rows for both convolutions).
    x_nhwc = jnp.transpose(x_nchw, (0, 2, 3, 1)).astype(jnp.float32)
    x_rows = jnp.pad(x_nhwc, ((0, 0), (1, 1), (1, 1), (0, 0))).reshape(R, C)

    # tiny (R, 1) real-pixel mask column (broadcast along lanes inside the kernel).
    m2d = jnp.zeros((Hp, Wp), jnp.float32).at[1:-1, 1:-1].set(1.0)
    mask_col = jnp.broadcast_to(m2d[None], (N, Hp, Wp)).reshape(R, 1)

    w1c = params["w1"].reshape(9 * C, C).astype(jnp.bfloat16)   # HWIO -> (9*Cin, Cout)
    w2c = params["w2"].reshape(9 * C, C).astype(jnp.bfloat16)
    g1 = params["g1"].reshape(1, C).astype(jnp.float32)
    g2 = params["g2"].reshape(1, C).astype(jnp.float32)
    be1 = params["be1"].reshape(1, C).astype(jnp.float32)
    be2 = params["be2"].reshape(1, C).astype(jnp.float32)
    # NOTE: params["b1"]/["b2"] are intentionally NOT passed: the training-mode batch
    # mean contains the per-channel conv bias exactly, so it cancels in BN.

    kernel = functools.partial(_alpha_block_kernel, margin=M, wp=Wp,
                               n_valid=N * H * W, eps=eps)
    vmem = pl.BlockSpec(memory_space=pltpu.MemorySpace.VMEM)
    out_rows = pl.pallas_call(
        kernel,
        out_shape=jax.ShapeDtypeStruct((R, C), jnp.float32),
        in_specs=[vmem] * 8,
        out_specs=vmem,
        scratch_shapes=[pltpu.VMEM((R + 2 * M, C), jnp.float32),   # image / hidden rows
                        pltpu.VMEM((R, 9 * C), jnp.bfloat16)],      # im2col staging
        compiler_params=pltpu.CompilerParams(vmem_limit_bytes=32 * 1024 * 1024),
    )(x_rows, mask_col, w1c, g1, be1, w2c, g2, be2)

    out = out_rows.reshape(N, Hp, Wp, C)[:, 1:-1, 1:-1, :]
    return jnp.transpose(out, (0, 3, 1, 2))         # back to NCHW


def reference(x_nchw, params, eps=1e-5):
    """Pure-JAX reference mirroring the PyTorch forward (training-mode BN)."""
    C = x_nchw.shape[1]

    def conv(x, w_hwio, b):
        y = jax.lax.conv_general_dilated(
            x, w_hwio, window_strides=(1, 1), padding="SAME",
            dimension_numbers=("NCHW", "HWIO", "NCHW"),
            precision=jax.lax.Precision.HIGHEST)
        return y + b.reshape(1, C, 1, 1)

    def bn(y, g, be):
        mean = jnp.mean(y, axis=(0, 2, 3), keepdims=True)
        var = jnp.mean((y - mean) ** 2, axis=(0, 2, 3), keepdims=True)
        return ((y - mean) * jax.lax.rsqrt(var + eps) * g.reshape(1, C, 1, 1)
                + be.reshape(1, C, 1, 1))

    out = jax.nn.relu(bn(conv(x_nchw, params["w1"], params["b1"]),
                         params["g1"], params["be1"]))
    out = bn(conv(out, params["w2"], params["b2"]), params["g2"], params["be2"])
    return jax.nn.relu(out + x_nchw)


if __name__ == "__main__":
    # in_planes == planes == 128 (AlphaChess-style wide filters), 8x8 board, batch 2.
    N, C, H, W = 2, 128, 8, 8
    key = jax.random.PRNGKey(0)
    ks = jax.random.split(key, 9)
    params = {
        "w1": jax.random.normal(ks[0], (3, 3, C, C), jnp.float32) * 0.05,
        "b1": jax.random.normal(ks[1], (C,), jnp.float32) * 0.1,
        "g1": 1.0 + 0.1 * jax.random.normal(ks[2], (C,), jnp.float32),
        "be1": 0.1 * jax.random.normal(ks[3], (C,), jnp.float32),
        "w2": jax.random.normal(ks[4], (3, 3, C, C), jnp.float32) * 0.05,
        "b2": jax.random.normal(ks[5], (C,), jnp.float32) * 0.1,
        "g2": 1.0 + 0.1 * jax.random.normal(ks[6], (C,), jnp.float32),
        "be2": 0.1 * jax.random.normal(ks[7], (C,), jnp.float32),
    }
    x = jax.random.normal(ks[8], (N, C, H, W), jnp.float32)

    out = jax.block_until_ready(basic_alpha_chess_block(x, params))
    ref = jax.block_until_ready(reference(x, params))
    assert out.shape == x.shape and out.dtype == jnp.float32
    err = float(jnp.max(jnp.abs(out - ref)))
    assert err < 3e-2, f"max abs err too large: {err}"
    print("KERNEL_OK")
</pallas_src>

<mosaic_0001>
module attributes {stable_mosaic.version = 11 : i64} {
  func.func @_alpha_block_kernel(%arg0: memref<200x128xf32, #tpu.memory_space<vmem>>, %arg1: memref<200x1xf32, #tpu.memory_space<vmem>>, %arg2: memref<1152x128xbf16, #tpu.memory_space<vmem>>, %arg3: memref<1x128xf32, #tpu.memory_space<vmem>>, %arg4: memref<1x128xf32, #tpu.memory_space<vmem>>, %arg5: memref<1152x128xbf16, #tpu.memory_space<vmem>>, %arg6: memref<1x128xf32, #tpu.memory_space<vmem>>, %arg7: memref<1x128xf32, #tpu.memory_space<vmem>>, %arg8: memref<200x128xf32, #tpu.memory_space<vmem>>, %arg9: memref<222x128xf32, #tpu.memory_space<vmem>>, %arg10: memref<200x1152xbf16, #tpu.memory_space<vmem>>) attributes {dimension_semantics = [], scalar_prefetch = 0 : i64, scratch_operands = 2 : i64, tpu.core_type = #tpu.core_type<tc>} {
    %c0 = arith.constant 0 : index
    %c0_0 = arith.constant 0 : index
    %0 = vector.load %arg1[%c0, %c0_0] : memref<200x1xf32, #tpu.memory_space<vmem>>, vector<200x1xf32>
    %cst = arith.constant 0.000000e+00 : f32
    %1 = vector.broadcast %cst : f32 to vector<11x128xf32>
    %c0_1 = arith.constant 0 : index
    %c0_2 = arith.constant 0 : index
    %2 = vector.load %arg9[%c0_1, %c0_2] : memref<222x128xf32, #tpu.memory_space<vmem>>, vector<11x128xf32>
    tpu.vector_store %arg9[%c0_1, %c0_2], %1 {strides = array<i32>} : memref<222x128xf32, #tpu.memory_space<vmem>>, vector<11x128xf32>,
    %cst_3 = arith.constant 0.000000e+00 : f32
    %3 = vector.broadcast %cst_3 : f32 to vector<11x128xf32>
    %c211 = arith.constant 211 : index
    %c0_4 = arith.constant 0 : index
    %4 = vector.load %arg9[%c211, %c0_4] : memref<222x128xf32, #tpu.memory_space<vmem>>, vector<11x128xf32>
    tpu.vector_store %arg9[%c211, %c0_4], %3 {strides = array<i32>} : memref<222x128xf32, #tpu.memory_space<vmem>>, vector<11x128xf32>,
    %c0_5 = arith.constant 0 : index
    %c0_6 = arith.constant 0 : index
    %5 = vector.load %arg0[%c0_5, %c0_6] : memref<200x128xf32, #tpu.memory_space<vmem>>, vector<200x128xf32>
    %c11 = arith.constant 11 : index
    %c0_7 = arith.constant 0 : index
    %6 = vector.load %arg9[%c11, %c0_7] : memref<222x128xf32, #tpu.memory_space<vmem>>, vector<200x128xf32>
    tpu.vector_store %arg9[%c11, %c0_7], %5 {strides = array<i32>} : memref<222x128xf32, #tpu.memory_space<vmem>>, vector<200x128xf32>,
    %c0_8 = arith.constant 0 : index
    %c0_9 = arith.constant 0 : index
    %7 = vector.load %arg9[%c0_8, %c0_9] : memref<222x128xf32, #tpu.memory_space<vmem>>, vector<200x128xf32>
    %8 = arith.truncf %7 : vector<200x128xf32> to vector<200x128xbf16>
    %c0_10 = arith.constant 0 : index
    %c0_11 = arith.constant 0 : index
    %9 = vector.load %arg10[%c0_10, %c0_11] : memref<200x1152xbf16, #tpu.memory_space<vmem>>, vector<200x128xbf16>
    tpu.vector_store %arg10[%c0_10, %c0_11], %8 {strides = array<i32>} : memref<200x1152xbf16, #tpu.memory_space<vmem>>, vector<200x128xbf16>,
    %c1 = arith.constant 1 : index
    %c0_12 = arith.constant 0 : index
    %10 = vector.load %arg9[%c1, %c0_12] : memref<222x128xf32, #tpu.memory_space<vmem>>, vector<200x128xf32>
    %11 = arith.truncf %10 : vector<200x128xf32> to vector<200x128xbf16>
    %c0_13 = arith.constant 0 : index
    %c128 = arith.constant 128 : index
    %12 = vector.load %arg10[%c0_13, %c128] : memref<200x1152xbf16, #tpu.memory_space<vmem>>, vector<200x128xbf16>
    tpu.vector_store %arg10[%c0_13, %c128], %11 {strides = array<i32>} : memref<200x1152xbf16, #tpu.memory_space<vmem>>, vector<200x128xbf16>,
    %c2 = arith.constant 2 : index
    %c0_14 = arith.constant 0 : index
    %13 = vector.load %arg9[%c2, %c0_14] : memref<222x128xf32, #tpu.memory_space<vmem>>, vector<200x128xf32>
    %14 = arith.truncf %13 : vector<200x128xf32> to vector<200x128xbf16>
    %c0_15 = arith.constant 0 : index
    %c256 = arith.constant 256 : index
    %15 = vector.load %arg10[%c0_15, %c256] : memref<200x1152xbf16, #tpu.memory_space<vmem>>, vector<200x128xbf16>
    tpu.vector_store %arg10[%c0_15, %c256], %14 {strides = array<i32>} : memref<200x1152xbf16, #tpu.memory_space<vmem>>, vector<200x128xbf16>,
    %c10 = arith.constant 10 : index
    %c0_16 = arith.constant 0 : index
    %16 = vector.load %arg9[%c10, %c0_16] : memref<222x128xf32, #tpu.memory_space<vmem>>, vector<200x128xf32>
    %17 = arith.truncf %16 : vector<200x128xf32> to vector<200x128xbf16>
    %c0_17 = arith.constant 0 : index
    %c384 = arith.constant 384 : index
    %18 = vector.load %arg10[%c0_17, %c384] : memref<200x1152xbf16, #tpu.memory_space<vmem>>, vector<200x128xbf16>
    tpu.vector_store %arg10[%c0_17, %c384], %17 {strides = array<i32>} : memref<200x1152xbf16, #tpu.memory_space<vmem>>, vector<200x128xbf16>,
    %c11_18 = arith.constant 11 : index
    %c0_19 = arith.constant 0 : index
    %19 = vector.load %arg9[%c11_18, %c0_19] : memref<222x128xf32, #tpu.memory_space<vmem>>, vector<200x128xf32>
    %20 = arith.truncf %19 : vector<200x128xf32> to vector<200x128xbf16>
    %c0_20 = arith.constant 0 : index
    %c512 = arith.constant 512 : index
    %21 = vector.load %arg10[%c0_20, %c512] : memref<200x1152xbf16, #tpu.memory_space<vmem>>, vector<200x128xbf16>
    tpu.vector_store %arg10[%c0_20, %c512], %20 {strides = array<i32>} : memref<200x1152xbf16, #tpu.memory_space<vmem>>, vector<200x128xbf16>,
    %c12 = arith.constant 12 : index
    %c0_21 = arith.constant 0 : index
    %22 = vector.load %arg9[%c12, %c0_21] : memref<222x128xf32, #tpu.memory_space<vmem>>, vector<200x128xf32>
    %23 = arith.truncf %22 : vector<200x128xf32> to vector<200x128xbf16>
    %c0_22 = arith.constant 0 : index
    %c640 = arith.constant 640 : index
    %24 = vector.load %arg10[%c0_22, %c640] : memref<200x1152xbf16, #tpu.memory_space<vmem>>, vector<200x128xbf16>
    tpu.vector_store %arg10[%c0_22, %c640], %23 {strides = array<i32>} : memref<200x1152xbf16, #tpu.memory_space<vmem>>, vector<200x128xbf16>,
    %c20 = arith.constant 20 : index
    %c0_23 = arith.constant 0 : index
    %25 = vector.load %arg9[%c20, %c0_23] : memref<222x128xf32, #tpu.memory_space<vmem>>, vector<200x128xf32>
    %26 = arith.truncf %25 : vector<200x128xf32> to vector<200x128xbf16>
    %c0_24 = arith.constant 0 : index
    %c768 = arith.constant 768 : index
    %27 = vector.load %arg10[%c0_24, %c768] : memref<200x1152xbf16, #tpu.memory_space<vmem>>, vector<200x128xbf16>
    tpu.vector_store %arg10[%c0_24, %c768], %26 {strides = array<i32>} : memref<200x1152xbf16, #tpu.memory_space<vmem>>, vector<200x128xbf16>,
    %c21 = arith.constant 21 : index
    %c0_25 = arith.constant 0 : index
    %28 = vector.load %arg9[%c21, %c0_25] : memref<222x128xf32, #tpu.memory_space<vmem>>, vector<200x128xf32>
    %29 = arith.truncf %28 : vector<200x128xf32> to vector<200x128xbf16>
    %c0_26 = arith.constant 0 : index
    %c896 = arith.constant 896 : index
    %30 = vector.load %arg10[%c0_26, %c896] : memref<200x1152xbf16, #tpu.memory_space<vmem>>, vector<200x128xbf16>
    tpu.vector_store %arg10[%c0_26, %c896], %29 {strides = array<i32>} : memref<200x1152xbf16, #tpu.memory_space<vmem>>, vector<200x128xbf16>,
    %c22 = arith.constant 22 : index
    %c0_27 = arith.constant 0 : index
    %31 = vector.load %arg9[%c22, %c0_27] : memref<222x128xf32, #tpu.memory_space<vmem>>, vector<200x128xf32>
    %32 = arith.truncf %31 : vector<200x128xf32> to vector<200x128xbf16>
    %c0_28 = arith.constant 0 : index
    %c1024 = arith.constant 1024 : index
    %33 = vector.load %arg10[%c0_28, %c1024] : memref<200x1152xbf16, #tpu.memory_space<vmem>>, vector<200x128xbf16>
    tpu.vector_store %arg10[%c0_28, %c1024], %32 {strides = array<i32>} : memref<200x1152xbf16, #tpu.memory_space<vmem>>, vector<200x128xbf16>,
    %c0_29 = arith.constant 0 : index
    %c0_30 = arith.constant 0 : index
    %34 = vector.load %arg10[%c0_29, %c0_30] : memref<200x1152xbf16, #tpu.memory_space<vmem>>, vector<200x1152xbf16>
    %c0_31 = arith.constant 0 : index
    %c0_32 = arith.constant 0 : index
    %35 = vector.load %arg2[%c0_31, %c0_32] : memref<1152x128xbf16, #tpu.memory_space<vmem>>, vector<1152x128xbf16>
    %cst_33 = arith.constant dense<0.000000e+00> : vector<200x128xf32>
    %36 = tpu.matmul %34, %35, %cst_33 {dimension_numbers = #tpu.dot_dimension_numbers<[1], [0], [0], [1], [0, 0, 1, 1], [], []>} : vector<200x1152xbf16>, vector<1152x128xbf16>, vector<200x128xf32> -> vector<200x128xf32>
    %37 = vector.broadcast %0 : vector<200x1xf32> to vector<200x128xf32>
    %38 = arith.mulf %36, %37 : vector<200x128xf32>
    %cst_34 = arith.constant dense<0.000000e+00> : vector<128xf32>
    %39 = vector.multi_reduction <add>, %38, %cst_34 [0] : vector<200x128xf32> to vector<128xf32>
    %40 = vector.shape_cast %39 : vector<128xf32> to vector<1x128xf32>
    %cst_35 = arith.constant 7.812500e-03 : f32
    %41 = vector.broadcast %cst_35 : f32 to vector<1x128xf32>
    %42 = arith.mulf %40, %41 : vector<1x128xf32>
    %43 = arith.mulf %38, %38 : vector<200x128xf32>
    %cst_36 = arith.constant dense<0.000000e+00> : vector<128xf32>
    %44 = vector.multi_reduction <add>, %43, %cst_36 [0] : vector<200x128xf32> to vector<128xf32>
    %45 = vector.shape_cast %44 : vector<128xf32> to vector<1x128xf32>
    %cst_37 = arith.constant 7.812500e-03 : f32
    %46 = vector.broadcast %cst_37 : f32 to vector<1x128xf32>
    %47 = arith.mulf %45, %46 : vector<1x128xf32>
    %48 = arith.mulf %42, %42 : vector<1x128xf32>
    %49 = arith.subf %47, %48 : vector<1x128xf32>
    %c0_38 = arith.constant 0 : index
    %c0_39 = arith.constant 0 : index
    %50 = vector.load %arg3[%c0_38, %c0_39] : memref<1x128xf32, #tpu.memory_space<vmem>>, vector<1x128xf32>
    %cst_40 = arith.constant 9.99999974E-6 : f32
    %51 = vector.broadcast %cst_40 : f32 to vector<1x128xf32>
    %52 = arith.addf %49, %51 : vector<1x128xf32>
    %53 = math.rsqrt %52 : vector<1x128xf32>
    %54 = arith.mulf %50, %53 : vector<1x128xf32>
    %c0_41 = arith.constant 0 : index
    %c0_42 = arith.constant 0 : index
    %55 = vector.load %arg4[%c0_41, %c0_42] : memref<1x128xf32, #tpu.memory_space<vmem>>, vector<1x128xf32>
    %56 = arith.mulf %42, %54 : vector<1x128xf32>
    %57 = arith.subf %55, %56 : vector<1x128xf32>
    %58 = vector.broadcast %54 : vector<1x128xf32> to vector<200x128xf32>
    %59 = arith.mulf %36, %58 : vector<200x128xf32>
    %60 = vector.broadcast %57 : vector<1x128xf32> to vector<200x128xf32>
    %61 = arith.addf %59, %60 : vector<200x128xf32>
    %cst_43 = arith.constant 0.000000e+00 : f32
    %62 = vector.broadcast %cst_43 : f32 to vector<200x128xf32>
    %63 = arith.maximumf %61, %62 : vector<200x128xf32>
    %64 = vector.broadcast %0 : vector<200x1xf32> to vector<200x128xf32>
    %65 = arith.mulf %63, %64 : vector<200x128xf32>
    %c11_44 = arith.constant 11 : index
    %c0_45 = arith.constant 0 : index
    %66 = vector.load %arg9[%c11_44, %c0_45] : memref<222x128xf32, #tpu.memory_space<vmem>>, vector<200x128xf32>
    tpu.vector_store %arg9[%c11_44, %c0_45], %65 {strides = array<i32>} : memref<222x128xf32, #tpu.memory_space<vmem>>, vector<200x128xf32>,
    %c0_46 = arith.constant 0 : index
    %c0_47 = arith.constant 0 : index
    %67 = vector.load %arg9[%c0_46, %c0_47] : memref<222x128xf32, #tpu.memory_space<vmem>>, vector<200x128xf32>
    %68 = arith.truncf %67 : vector<200x128xf32> to vector<200x128xbf16>
    %c0_48 = arith.constant 0 : index
    %c0_49 = arith.constant 0 : index
    %69 = vector.load %arg10[%c0_48, %c0_49] : memref<200x1152xbf16, #tpu.memory_space<vmem>>, vector<200x128xbf16>
    tpu.vector_store %arg10[%c0_48, %c0_49], %68 {strides = array<i32>} : memref<200x1152xbf16, #tpu.memory_space<vmem>>, vector<200x128xbf16>,
    %c1_50 = arith.constant 1 : index
    %c0_51 = arith.constant 0 : index
    %70 = vector.load %arg9[%c1_50, %c0_51] : memref<222x128xf32, #tpu.memory_space<vmem>>, vector<200x128xf32>
    %71 = arith.truncf %70 : vector<200x128xf32> to vector<200x128xbf16>
    %c0_52 = arith.constant 0 : index
    %c128_53 = arith.constant 128 : index
    %72 = vector.load %arg10[%c0_52, %c128_53] : memref<200x1152xbf16, #tpu.memory_space<vmem>>, vector<200x128xbf16>
    tpu.vector_store %arg10[%c0_52, %c128_53], %71 {strides = array<i32>} : memref<200x1152xbf16, #tpu.memory_space<vmem>>, vector<200x128xbf16>,
    %c2_54 = arith.constant 2 : index
    %c0_55 = arith.constant 0 : index
    %73 = vector.load %arg9[%c2_54, %c0_55] : memref<222x128xf32, #tpu.memory_space<vmem>>, vector<200x128xf32>
    %74 = arith.truncf %73 : vector<200x128xf32> to vector<200x128xbf16>
    %c0_56 = arith.constant 0 : index
    %c256_57 = arith.constant 256 : index
    %75 = vector.load %arg10[%c0_56, %c256_57] : memref<200x1152xbf16, #tpu.memory_space<vmem>>, vector<200x128xbf16>
    tpu.vector_store %arg10[%c0_56, %c256_57], %74 {strides = array<i32>} : memref<200x1152xbf16, #tpu.memory_space<vmem>>, vector<200x128xbf16>,
    %c10_58 = arith.constant 10 : index
    %c0_59 = arith.constant 0 : index
    %76 = vector.load %arg9[%c10_58, %c0_59] : memref<222x128xf32, #tpu.memory_space<vmem>>, vector<200x128xf32>
    %77 = arith.truncf %76 : vector<200x128xf32> to vector<200x128xbf16>
    %c0_60 = arith.constant 0 : index
    %c384_61 = arith.constant 384 : index
    %78 = vector.load %arg10[%c0_60, %c384_61] : memref<200x1152xbf16, #tpu.memory_space<vmem>>, vector<200x128xbf16>
    tpu.vector_store %arg10[%c0_60, %c384_61], %77 {strides = array<i32>} : memref<200x1152xbf16, #tpu.memory_space<vmem>>, vector<200x128xbf16>,
    %c11_62 = arith.constant 11 : index
    %c0_63 = arith.constant 0 : index
    %79 = vector.load %arg9[%c11_62, %c0_63] : memref<222x128xf32, #tpu.memory_space<vmem>>, vector<200x128xf32>
    %80 = arith.truncf %79 : vector<200x128xf32> to vector<200x128xbf16>
    %c0_64 = arith.constant 0 : index
    %c512_65 = arith.constant 512 : index
    %81 = vector.load %arg10[%c0_64, %c512_65] : memref<200x1152xbf16, #tpu.memory_space<vmem>>, vector<200x128xbf16>
    tpu.vector_store %arg10[%c0_64, %c512_65], %80 {strides = array<i32>} : memref<200x1152xbf16, #tpu.memory_space<vmem>>, vector<200x128xbf16>,
    %c12_66 = arith.constant 12 : index
    %c0_67 = arith.constant 0 : index
    %82 = vector.load %arg9[%c12_66, %c0_67] : memref<222x128xf32, #tpu.memory_space<vmem>>, vector<200x128xf32>
    %83 = arith.truncf %82 : vector<200x128xf32> to vector<200x128xbf16>
    %c0_68 = arith.constant 0 : index
    %c640_69 = arith.constant 640 : index
    %84 = vector.load %arg10[%c0_68, %c640_69] : memref<200x1152xbf16, #tpu.memory_space<vmem>>, vector<200x128xbf16>
    tpu.vector_store %arg10[%c0_68, %c640_69], %83 {strides = array<i32>} : memref<200x1152xbf16, #tpu.memory_space<vmem>>, vector<200x128xbf16>,
    %c20_70 = arith.constant 20 : index
    %c0_71 = arith.constant 0 : index
    %85 = vector.load %arg9[%c20_70, %c0_71] : memref<222x128xf32, #tpu.memory_space<vmem>>, vector<200x128xf32>
    %86 = arith.truncf %85 : vector<200x128xf32> to vector<200x128xbf16>
    %c0_72 = arith.constant 0 : index
    %c768_73 = arith.constant 768 : index
    %87 = vector.load %arg10[%c0_72, %c768_73] : memref<200x1152xbf16, #tpu.memory_space<vmem>>, vector<200x128xbf16>
    tpu.vector_store %arg10[%c0_72, %c768_73], %86 {strides = array<i32>} : memref<200x1152xbf16, #tpu.memory_space<vmem>>, vector<200x128xbf16>,
    %c21_74 = arith.constant 21 : index
    %c0_75 = arith.constant 0 : index
    %88 = vector.load %arg9[%c21_74, %c0_75] : memref<222x128xf32, #tpu.memory_space<vmem>>, vector<200x128xf32>
    %89 = arith.truncf %88 : vector<200x128xf32> to vector<200x128xbf16>
    %c0_76 = arith.constant 0 : index
    %c896_77 = arith.constant 896 : index
    %90 = vector.load %arg10[%c0_76, %c896_77] : memref<200x1152xbf16, #tpu.memory_space<vmem>>, vector<200x128xbf16>
    tpu.vector_store %arg10[%c0_76, %c896_77], %89 {strides = array<i32>} : memref<200x1152xbf16, #tpu.memory_space<vmem>>, vector<200x128xbf16>,
    %c22_78 = arith.constant 22 : index
    %c0_79 = arith.constant 0 : index
    %91 = vector.load %arg9[%c22_78, %c0_79] : memref<222x128xf32, #tpu.memory_space<vmem>>, vector<200x128xf32>
    %92 = arith.truncf %91 : vector<200x128xf32> to vector<200x128xbf16>
    %c0_80 = arith.constant 0 : index
    %c1024_81 = arith.constant 1024 : index
    %93 = vector.load %arg10[%c0_80, %c1024_81] : memref<200x1152xbf16, #tpu.memory_space<vmem>>, vector<200x128xbf16>
    tpu.vector_store %arg10[%c0_80, %c1024_81], %92 {strides = array<i32>} : memref<200x1152xbf16, #tpu.memory_space<vmem>>, vector<200x128xbf16>,
    %c0_82 = arith.constant 0 : index
    %c0_83 = arith.constant 0 : index
    %94 = vector.load %arg10[%c0_82, %c0_83] : memref<200x1152xbf16, #tpu.memory_space<vmem>>, vector<200x1152xbf16>
    %c0_84 = arith.constant 0 : index
    %c0_85 = arith.constant 0 : index
    %95 = vector.load %arg5[%c0_84, %c0_85] : memref<1152x128xbf16, #tpu.memory_space<vmem>>, vector<1152x128xbf16>
    %cst_86 = arith.constant dense<0.000000e+00> : vector<200x128xf32>
    %96 = tpu.matmul %94, %95, %cst_86 {dimension_numbers = #tpu.dot_dimension_numbers<[1], [0], [0], [1], [0, 0, 1, 1], [], []>} : vector<200x1152xbf16>, vector<1152x128xbf16>, vector<200x128xf32> -> vector<200x128xf32>
    %97 = vector.broadcast %0 : vector<200x1xf32> to vector<200x128xf32>
    %98 = arith.mulf %96, %97 : vector<200x128xf32>
    %cst_87 = arith.constant dense<0.000000e+00> : vector<128xf32>
    %99 = vector.multi_reduction <add>, %98, %cst_87 [0] : vector<200x128xf32> to vector<128xf32>
    %100 = vector.shape_cast %99 : vector<128xf32> to vector<1x128xf32>
    %cst_88 = arith.constant 7.812500e-03 : f32
    %101 = vector.broadcast %cst_88 : f32 to vector<1x128xf32>
    %102 = arith.mulf %100, %101 : vector<1x128xf32>
    %103 = arith.mulf %98, %98 : vector<200x128xf32>
    %cst_89 = arith.constant dense<0.000000e+00> : vector<128xf32>
    %104 = vector.multi_reduction <add>, %103, %cst_89 [0] : vector<200x128xf32> to vector<128xf32>
    %105 = vector.shape_cast %104 : vector<128xf32> to vector<1x128xf32>
    %cst_90 = arith.constant 7.812500e-03 : f32
    %106 = vector.broadcast %cst_90 : f32 to vector<1x128xf32>
    %107 = arith.mulf %105, %106 : vector<1x128xf32>
    %108 = arith.mulf %102, %102 : vector<1x128xf32>
    %109 = arith.subf %107, %108 : vector<1x128xf32>
    %c0_91 = arith.constant 0 : index
    %c0_92 = arith.constant 0 : index
    %110 = vector.load %arg6[%c0_91, %c0_92] : memref<1x128xf32, #tpu.memory_space<vmem>>, vector<1x128xf32>
    %cst_93 = arith.constant 9.99999974E-6 : f32
    %111 = vector.broadcast %cst_93 : f32 to vector<1x128xf32>
    %112 = arith.addf %109, %111 : vector<1x128xf32>
    %113 = math.rsqrt %112 : vector<1x128xf32>
    %114 = arith.mulf %110, %113 : vector<1x128xf32>
    %c0_94 = arith.constant 0 : index
    %c0_95 = arith.constant 0 : index
    %115 = vector.load %arg7[%c0_94, %c0_95] : memref<1x128xf32, #tpu.memory_space<vmem>>, vector<1x128xf32>
    %116 = arith.mulf %102, %114 : vector<1x128xf32>
    %117 = arith.subf %115, %116 : vector<1x128xf32>
    %118 = vector.broadcast %114 : vector<1x128xf32> to vector<200x128xf32>
    %119 = arith.mulf %96, %118 : vector<200x128xf32>
    %120 = vector.broadcast %117 : vector<1x128xf32> to vector<200x128xf32>
    %121 = arith.addf %119, %120 : vector<200x128xf32>
    %c0_96 = arith.constant 0 : index
    %c0_97 = arith.constant 0 : index
    %122 = vector.load %arg0[%c0_96, %c0_97] : memref<200x128xf32, #tpu.memory_space<vmem>>, vector<200x128xf32>
    %123 = arith.addf %121, %122 : vector<200x128xf32>
    %cst_98 = arith.constant 0.000000e+00 : f32
    %124 = vector.broadcast %cst_98 : f32 to vector<200x128xf32>
    %125 = arith.maximumf %123, %124 : vector<200x128xf32>
    %c0_99 = arith.constant 0 : index
    %c0_100 = arith.constant 0 : index
    %126 = vector.load %arg8[%c0_99, %c0_100] : memref<200x128xf32, #tpu.memory_space<vmem>>, vector<200x128xf32>
    tpu.vector_store %arg8[%c0_99, %c0_100], %125 {strides = array<i32>} : memref<200x128xf32, #tpu.memory_space<vmem>>, vector<200x128xf32>,
    return
  }
}

</mosaic_0001>

<bundles_post_ra>
// kernel: tpu_custom_call.1
= control target key start
LH: loop header
LB: loop body
LE: loop exit
PB: predicated region body
PF: predicated region fallthrough
CT: control target
= control target key end

     0   :  { %13 = vsyncpa [#allocation5], 0  ;;  %s11369_s0 = inlined_call_operand.vmem [shape: f32[200,128], index: 0, kind: input, shape index: {}]   ;;  %s11370_s1 = inlined_call_operand.vmem [shape: f32[200,1], index: 1, kind: input, shape index: {}]   ;;  %s11371_s2 = inlined_call_operand.hbm [shape: bf16[1152,128], index: 2, kind: input, shape index: {}]   ;;  %s11372_s3 = inlined_call_operand.vmem [shape: f32[1,128], index: 3, kind: input, shape index: {}]   ;;  %s11373_s4 = inlined_call_operand.vmem [shape: f32[1,128], index: 4, kind: input, shape index: {}]   ;;  %s11374_s5 = inlined_call_operand.hbm [shape: bf16[1152,128], index: 5, kind: input, shape index: {}]   ;;  %s11375_s6 = inlined_call_operand.vmem [shape: f32[1,128], index: 6, kind: input, shape index: {}]   ;;  %s11376_s7 = inlined_call_operand.vmem [shape: f32[1,128], index: 7, kind: input, shape index: {}]   ;;  %s11377_s8 = inlined_call_operand.hbm [shape: f32[200,128], index: 8, kind: output, shape index: {}]  }
   0x1   :  { %14 = vsyncpa [#allocation8], 0 }
   0x2   :  { %15 = vsyncpa [#allocation6], 0  ;;  %s10223_s27 = smov [#allocation4]  }
   0x3   :  { %s25_s28 = sshll.u32 %s10223_s27, 4  ;;  %s26_s28 = int_to_ptr.vmem [resolvable:$true] %s25_s28 }
   0x4   :  { %s10165_s29 = scalar_lea.vmem %s26_s28, 9216  ;;  %p10170_p1 = scmp.lt.s32.totalorder %s26_s28, %s26_s28 }
   0x5   :  { %p10166_p0 = scmp.ne.s32.totalorder %s26_s28, %s10165_s29  ;;  %p10171_p2 = scmp.lt.s32.totalorder %s10165_s29, %s10165_s29 }
   0x7   :  { %p10172_p3 = por %p10171_p2, %p10170_p1 }
   0x9   :  { %p10173_p4 = pnand %p10172_p3, %p10166_p0 }
   0xb   :  { %10176 = shalt.err (!%p10173_p4)
}
   0xc   :  { %s10224_s30 = smov 64   ;;  %s10225_s9 = smov 4  }
   0xd   :  { %31 = dma.hbm_to_vmem [thread:$0]  %s11371_s2, 9216, %s26_s28, [#allocation5], %s10224_s30, %s10224_s30, %s10225_s9  }
   0xe   :  { %s10226_s12 = smov [#allocation7]  }
   0xf   :  { %s41_s13 = sshll.u32 %s10226_s12, 4  ;;  %s42_s13 = int_to_ptr.vmem [resolvable:$true] %s41_s13 }
  0x10   :  { %s10185_s14 = scalar_lea.vmem %s42_s13, 9216  ;;  %p10190_p6 = scmp.lt.s32.totalorder %s42_s13, %s42_s13 }
  0x11   :  { %p10186_p5 = scmp.ne.s32.totalorder %s42_s13, %s10185_s14  ;;  %p10191_p7 = scmp.lt.s32.totalorder %s10185_s14, %s10185_s14 }
  0x13   :  { %p10192_p8 = por %p10191_p7, %p10190_p6 }
  0x15   :  { %p10193_p9 = pnand %p10192_p8, %p10186_p5 }
  0x17   :  { %10196 = shalt.err (!%p10193_p9)
}
  0x18   :  { %47 = dma.hbm_to_vmem [thread:$0]  %s11374_s5, 9216, %s42_s13, [#allocation8], %s10224_s30, %s10224_s30, %s10225_s9  }
  0x19   :  { %10217 = dma.done.wait [#allocation5], 9216  }
  0x1a   :  { %10218 = vsyncadd [#allocation5], 4294958080 }
  0x1b   :  { %10219 = dma.done.wait [#allocation8], 9216  }
  0x1c   :  { %10220 = vsyncadd [#allocation8], 4294958080  ;;  %v10227_v0 = vmov 0.0   ;;  %v10228_v1 = vmov 0.0|0.0   ;;  %v9690_v2 = vld [vmem:[#allocation4 + $0x78] sm:$0xff]   ;;  %v9694_v6 = vld [vmem:[#allocation4 + $0x70] sm:$0xff]  }
  0x1d   :  { %84 = vst [vmem:[#allocation2] sm:$0xff] %v10227_v0  ;;  %85 = vst [vmem:[#allocation2 + $0x8] sm:$0x7] %v10227_v0  ;;  %v9691_v3 = vld [vmem:[#allocation4 + $0xf8] sm:$0xff]   ;;  %8748 = vmatprep.subr.bf16.mxu0 %v9690_v2  ;;  %v9695_v7 = vld [vmem:[#allocation4 + $0xf0] sm:$0xff]   ;;  %vm10230_vm0 = vmmov 0  }
  0x1e   :  { %86 = vst [vmem:[#allocation2 + $0xd3] sm:$0xff] %v10227_v0  ;;  %87 = vst [vmem:[#allocation2 + $0xdb] sm:$0x7] %v10227_v0  ;;  %v9692_v4 = vld [vmem:[#allocation4 + $0x38] sm:$0xff]   ;;  %8842 = vmatprep.subr.bf16.mxu1 %v9691_v3  ;;  %v9696_v8 = vld [vmem:[#allocation4 + $0x30] sm:$0xff]  }
  0x1f   :  { %264 = vst [vmem:[#allocation3] sm:$0xf] %v10228_v1  ;;  %v9693_v5 = vld [vmem:[#allocation4 + $0xb8] sm:$0xff]   ;;  %8749 = vmatpush3.bf16.msra.mxu0 %v9692_v4  ;;  %v9697_v9 = vld [vmem:[#allocation4 + $0xb0] sm:$0xff]   ;;  %v9698_v10 = vld [vmem:[#allocation4 + $0x68] sm:$0xff]  }
  0x20   :  { %8843 = vmatpush3.bf16.msra.mxu1 %v9693_v5  ;;  %8750 = vmatprep.subr.bf16.mxu0 %v9694_v6  ;;  %v9699_v11 = vld [vmem:[#allocation4 + $0xe8] sm:$0xff]   ;;  %v9702_v14 = vld [vmem:[#allocation4 + $0x60] sm:$0xff]   ;;  %v9706_v18 = vld [vmem:[#allocation4 + $0x58] sm:$0xff]  }
  0x21   :  { %8844 = vmatprep.subr.bf16.mxu1 %v9695_v7  ;;  %v9700_v12 = vld [vmem:[#allocation4 + $0x28] sm:$0xff]   ;;  %v9703_v15 = vld [vmem:[#allocation4 + $0xe0] sm:$0xff]   ;;  %v9707_v19 = vld [vmem:[#allocation4 + $0xd8] sm:$0xff]  }
  0x22   :  { %v9701_v13 = vld [vmem:[#allocation4 + $0xa8] sm:$0xff]   ;;  %v9704_v16 = vld [vmem:[#allocation4 + $0x20] sm:$0xff]   ;;  %v9708_v20 = vld [vmem:[#allocation4 + $0x18] sm:$0xff]  }
  0x23   :  { %8751 = vmatpush3.bf16.msra.mxu0 %v9696_v8  ;;  %v9705_v17 = vld [vmem:[#allocation4 + $0xa0] sm:$0xff]   ;;  %v9709_v21 = vld [vmem:[#allocation4 + $0x98] sm:$0xff]   ;;  %v9710_v22 = vld [vmem:[#allocation4 + $0x50] sm:$0xff]  }
  0x24   :  { %8845 = vmatpush3.bf16.msra.mxu1 %v9697_v9  ;;  %8752 = vmatprep.subr.bf16.mxu0 %v9698_v10  ;;  %v9711_v23 = vld [vmem:[#allocation4 + $0xd0] sm:$0xff]   ;;  %v9714_v26 = vld [vmem:[#allocation4 + $0x48] sm:$0xff]   ;;  %v9718_v30 = vld [vmem:[#allocation4 + $0x40] sm:$0xff]  }
  0x25   :  { %8846 = vmatprep.subr.bf16.mxu1 %v9699_v11  ;;  %v9712_v24 = vld [vmem:[#allocation4 + $0x10] sm:$0xff]   ;;  %v9715_v27 = vld [vmem:[#allocation4 + $0xc8] sm:$0xff]   ;;  %v9719_v31 = vld [vmem:[#allocation4 + $0xc0] sm:$0xff]  }
  0x26   :  { %v9713_v25 = vld [vmem:[#allocation4 + $0x90] sm:$0xff]   ;;  %v9716_v28 = vld [vmem:[#allocation4 + $0x8] sm:$0xff]   ;;  %v9720_v32 = vld [vmem:[#allocation4] sm:$0xff]  }
  0x27   :  { %8753 = vmatpush3.bf16.msra.mxu0 %v9700_v12  ;;  %v9717_v29 = vld [vmem:[#allocation4 + $0x88] sm:$0xff]   ;;  %v9721_v33 = vld [vmem:[#allocation4 + $0x80] sm:$0xff]   ;;  %v9726_v40 = vld [vmem:[#allocation4 + $0x178] sm:$0xff]  }
  0x28   :  { %8847 = vmatpush3.bf16.msra.mxu1 %v9701_v13  ;;  %8754 = vmatprep.subr.bf16.mxu0 %v9702_v14  ;;  %v88_v34 = vld [vmem:[%s11369_s0] sm:$0xff]  ;;  %v89_v36 = vld [vmem:[%s11369_s0 + $0x8] sm:$0xff]  ;;  %v90_v41 = vld [vmem:[%s11369_s0 + $0x10] sm:$0xff] }
  0x29   :  { %8848 = vmatprep.subr.bf16.mxu1 %v9703_v15  ;;  %v289_v35 = vld [vmem:[#allocation2 + $0x1] sm:$0xff]  ;;  %113 = vst [vmem:[#allocation2 + $0xb] sm:$0xff] %v88_v34  ;;  %114 = vst [vmem:[#allocation2 + $0x13] sm:$0xff] %v89_v36  ;;  %v91_v42 = vld [vmem:[%s11369_s0 + $0x18] sm:$0xff] }
  0x2a   :  { %v10292_v37 = vpack.c.bf16 %v289_v35, %v289_v35  ;;  %v440_v38 = vld [vmem:[#allocation2 + $0x2] sm:$0xff]  ;;  %115 = vst [vmem:[#allocation2 + $0x1b] sm:$0xff] %v90_v41  ;;  %116 = vst [vmem:[#allocation2 + $0x23] sm:$0xff] %v91_v42  ;;  %v94_v45 = vld [vmem:[%s11369_s0 + $0x30] sm:$0xff] }
  0x2b   :  { %8755 = vmatpush3.bf16.msra.mxu0 %v9704_v16  ;;  %v10294_v39 = vpack.c.bf16 %v440_v38, %v440_v38  ;;  %v92_v43 = vld [vmem:[%s11369_s0 + $0x20] sm:$0xff]  ;;  %v93_v44 = vld [vmem:[%s11369_s0 + $0x28] sm:$0xff]  ;;  %119 = vst [vmem:[#allocation2 + $0x3b] sm:$0xff] %v94_v45  ;;  %v95_v46 = vld [vmem:[%s11369_s0 + $0x38] sm:$0xff] }
  0x2c   :  { %8849 = vmatpush3.bf16.msra.mxu1 %v9705_v17  ;;  %8756 = vmatprep.subr.bf16.mxu0 %v9706_v18  ;;  %415 = vst [vmem:[#allocation3 + $0x4] sm:$0xf] %v10292_v37  ;;  %117 = vst [vmem:[#allocation2 + $0x2b] sm:$0xff] %v92_v43  ;;  %v96_v8 = vld [vmem:[%s11369_s0 + $0x40] sm:$0xff]  ;;  %v9733_v43 = vld [vmem:[#allocation4 + $0x170] sm:$0xff]  }
  0x2d   :  { %8850 = vmatprep.subr.bf16.mxu1 %v9707_v19  ;;  %566 = vst [vmem:[#allocation3 + $0x8] sm:$0xf] %v10294_v39  ;;  %118 = vst [vmem:[#allocation2 + $0x33] sm:$0xff] %v93_v44  ;;  %v9727_v19 = vld [vmem:[#allocation4 + $0x138] sm:$0xff]   ;;  %v9734_v45 = vld [vmem:[#allocation4 + $0x130] sm:$0xff]  }
  0x2e   :  { %120 = vst [vmem:[#allocation2 + $0x43] sm:$0xff] %v95_v46  ;;  %121 = vst [vmem:[#allocation2 + $0x4b] sm:$0xff] %v96_v8  ;;  %v99_v46 = vld [vmem:[%s11369_s0 + $0x58] sm:$0xff] }
  0x2f   :  { %8757 = vmatpush3.bf16.msra.mxu0 %v9708_v20  ;;  %124 = vst [vmem:[#allocation2 + $0x63] sm:$0xff] %v99_v46 }
  0x30   :  { %8851 = vmatpush3.bf16.msra.mxu1 %v9709_v21  ;;  %8758 = vmatprep.subr.bf16.mxu0 %v9710_v22  ;;  %v139_v47 = vld [vmem:[#allocation2 + $0x8] sm:$0xff]  ;;  %v592_v53 = vld [vmem:[#allocation2 + $0x12] sm:$0xff] }
  0x31   :  { %8852 = vmatprep.subr.bf16.mxu1 %v9711_v23  ;;  %v290_v48 = vld [vmem:[#allocation2 + $0x9] sm:$0xff]  ;;  %v8299_v50 = vpack.c.bf16 %v139_v47, %v139_v47  ;;  %v291_v55 = vld [vmem:[#allocation2 + $0x11] sm:$0xff]  ;;  %v8374_v56 = vpack.c.bf16 %v592_v53, %v592_v53  ;;  %v292_v60 = vld [vmem:[#allocation2 + $0x19] sm:$0xff] }
  0x32   :  { %v441_v49 = vld [vmem:[#allocation2 + $0xa] sm:$0xff]  ;;  %v8324_v51 = vpack.c.bf16 %v290_v48, %v290_v48  ;;  %v8325_v58 = vpack.c.bf16 %v291_v55, %v291_v55  ;;  %v141_v59 = vld [vmem:[#allocation2 + $0x18] sm:$0xff]  ;;  %v8326_v63 = vpack.c.bf16 %v292_v60, %v292_v60  ;;  %v594_v2 = vld [vmem:[#allocation2 + $0x22] sm:$0xff] }
  0x33   :  { %8759 = vmatpush3.bf16.msra.mxu0 %v9712_v24  ;;  %v8349_v52 = vpack.c.bf16 %v441_v49, %v441_v49  ;;  %v140_v54 = vld [vmem:[#allocation2 + $0x10] sm:$0xff]  ;;  %265 = vst [vmem:[#allocation3 + $0x24] sm:$0xf] %v8299_v50  ;;  %v443_v61 = vld [vmem:[#allocation2 + $0x1a] sm:$0xff]  ;;  %718 = vst [vmem:[#allocation3 + $0x30] sm:$0xf] %v8374_v56  ;;  %v8301_v62 = vpack.c.bf16 %v141_v59, %v141_v59  ;;  %v8376_v5 = vpack.c.bf16 %v594_v2, %v594_v2 }
  0x34   :  { %8853 = vmatpush3.bf16.msra.mxu1 %v9713_v25  ;;  %8760 = vmatprep.subr.bf16.mxu0 %v9714_v26  ;;  %v8300_v57 = vpack.c.bf16 %v140_v54, %v140_v54  ;;  %416 = vst [vmem:[#allocation3 + $0x28] sm:$0xf] %v8324_v51  ;;  %417 = vst [vmem:[#allocation3 + $0x4c] sm:$0xf] %v8325_v58  ;;  %v8351_v0 = vpack.c.bf16 %v443_v61, %v443_v61  ;;  %v142_v3 = vld [vmem:[#allocation2 + $0x20] sm:$0xff]  ;;  %v143_v10 = vld [vmem:[#allocation2 + $0x28] sm:$0xff] }
  0x35   :  { %8854 = vmatprep.subr.bf16.mxu1 %v9715_v27  ;;  %567 = vst [vmem:[#allocation3 + $0x2c] sm:$0xf] %v8349_v52  ;;  %717 = vst [vmem:[#allocation3 + $0xc] sm:$0xf] %v8349_v52  ;;  %v293_v4 = vld [vmem:[#allocation2 + $0x21] sm:$0xff]  ;;  %v8302_v6 = vpack.c.bf16 %v142_v3, %v142_v3  ;;  %v294_v11 = vld [vmem:[#allocation2 + $0x29] sm:$0xff]  ;;  %v8303_v13 = vpack.c.bf16 %v143_v10, %v143_v10 }
  0x36   :  { %266 = vst [vmem:[#allocation3 + $0x48] sm:$0xf] %v8300_v57  ;;  %568 = vst [vmem:[#allocation3 + $0x50] sm:$0xf] %v8374_v56  ;;  %v8327_v7 = vpack.c.bf16 %v293_v4, %v293_v4  ;;  %v10319_v9 = vld [vmem:[#allocation3] sm:$0xff]  ;;  %v445_v12 = vld [vmem:[#allocation2 + $0x2a] sm:$0xff]  ;;  %v8328_v14 = vpack.c.bf16 %v294_v11, %v294_v11 }
  0x37   :  { %8761 = vmatpush3.bf16.msra.mxu0 %v9716_v28  ;;  %267 = vst [vmem:[#allocation3 + $0x6c] sm:$0xf] %v8301_v62  ;;  %418 = vst [vmem:[#allocation3 + $0x70] sm:$0xf] %v8326_v63  ;;  %v8353_v15 = vpack.c.bf16 %v445_v12, %v445_v12  ;;  %v596_v16 = vld [vmem:[#allocation2 + $0x32] sm:$0xff]  ;;  %v447_v25 = vld [vmem:[#allocation2 + $0x3a] sm:$0xff] }
  0x38   :  { %8855 = vmatpush3.bf16.msra.mxu1 %v9717_v29  ;;  %8762 = vmatprep.subr.bf16.mxu0 %v9718_v30  ;;  %569 = vst [vmem:[#allocation3 + $0x74] sm:$0xf] %v8351_v0  ;;  %719 = vst [vmem:[#allocation3 + $0x54] sm:$0xf] %v8351_v0  ;;  %v144_v17 = vld [vmem:[#allocation2 + $0x30] sm:$0xff]  ;;  %v145_v18 = vld [vmem:[#allocation2 + $0x38] sm:$0xff]  ;;  %v8378_v20 = vpack.c.bf16 %v596_v16, %v596_v16  ;;  %v8355_v28 = vpack.c.bf16 %v447_v25, %v447_v25 }
  0x39   :  { %8856 = vmatprep.subr.bf16.mxu1 %v9719_v31  ;;  %720 = vst [vmem:[#allocation3 + $0x78] sm:$0xf] %v8376_v5  ;;  %268 = vst [vmem:[#allocation3 + $0x90] sm:$0xf] %v8302_v6  ;;  %v8304_v21 = vpack.c.bf16 %v144_v17, %v144_v17  ;;  %v8305_v22 = vpack.c.bf16 %v145_v18, %v145_v18  ;;  %v295_v23 = vld [vmem:[#allocation2 + $0x31] sm:$0xff]  ;;  %v296_v24 = vld [vmem:[#allocation2 + $0x39] sm:$0xff] }
  0x3a   :  { %419 = vst [vmem:[#allocation3 + $0x94] sm:$0xf] %v8327_v7  ;;  %570 = vst [vmem:[#allocation3 + $0x98] sm:$0xf] %v8376_v5  ;;  %v8329_v26 = vpack.c.bf16 %v295_v23, %v295_v23  ;;  %v8330_v27 = vpack.c.bf16 %v296_v24, %v296_v24  ;;  %v598_v29 = vld [vmem:[#allocation2 + $0x42] sm:$0xff]  ;;  %v9745_v50 = vld [vmem:[#allocation4 + $0x168] sm:$0xff]  }
  0x3b   :  { %8763 = vmatpush3.bf16.msra.mxu0 %v9720_v32  ;;  %269 = vst [vmem:[#allocation3 + $0xb4] sm:$0xf] %v8303_v13  ;;  %420 = vst [vmem:[#allocation3 + $0xb8] sm:$0xf] %v8328_v14  ;;  %v146_v30 = vld [vmem:[#allocation2 + $0x40] sm:$0xff]  ;;  %v8380_v35 = vpack.c.bf16 %v598_v29, %v598_v29  ;;  %v147_v51 = vld [vmem:[#allocation2 + $0x48] sm:$0xff] }
  0x3c   :  { %8857 = vmatpush3.bf16.msra.mxu1 %v9721_v33  ;;  %8936 = vmatprep.subr.bf16.mxu0 %v9726_v40  ;;  %571 = vst [vmem:[#allocation3 + $0xbc] sm:$0xf] %v8353_v15  ;;  %721 = vst [vmem:[#allocation3 + $0x9c] sm:$0xf] %v8353_v15  ;;  %v297_v31 = vld [vmem:[#allocation2 + $0x41] sm:$0xff]  ;;  %v8306_v36 = vpack.c.bf16 %v146_v30, %v146_v30  ;;  %v1503_v40 = vld [vmem:[#allocation3 + $0x2c] sm:$0xff]  ;;  %v8307_v53 = vpack.c.bf16 %v147_v51, %v147_v51 }
  0x3d   :  { %v1502_v32 = vld [vmem:[#allocation3 + $0x24] sm:$0xff]  ;;  %722 = vst [vmem:[#allocation3 + $0xc0] sm:$0xf] %v8378_v20  ;;  %270 = vst [vmem:[#allocation3 + $0xd8] sm:$0xf] %v8304_v21  ;;  %v8331_v38 = vpack.c.bf16 %v297_v31, %v297_v31  ;;  %v9746_v58 = vld [vmem:[#allocation4 + $0x128] sm:$0xff]  }
  0x3e   :  { %v9722_v33 = vld [vmem:[#allocation3 + $0x4] ss:$36 sps:$4 sm:$0xff]   ;;  %271 = vst [vmem:[#allocation3 + $0xfc] sm:$0xf] %v8305_v22  ;;  %572 = vst [vmem:[#allocation3 + $0xe0] sm:$0xf] %v8378_v20  ;;  %v7695_v42 = vcombine.low %v10319_v9, %v1502_v32 }
  0x3f   :  { %v1498_v34 = vld [vmem:[#allocation3 + $0x8] sm:$0xff]  ;;  %3971 = vst [vmem:[#allocation3] sm:$0xf] %v10228_v1  ;;  %4122 = vst [vmem:[#allocation3 + $0x4] sm:$0xf] %v10292_v37  ;;  %2814 = vmatprep.mubr.bf16.mxu0 %v9722_v33  ;;  %v98_v37 = vld [vmem:[%s11369_s0 + $0x50] sm:$0xff] }
  0x40   :  { %v9724_v41 = vld [vmem:[#allocation3 + $0xc] ss:$36 sps:$4 sm:$0xff]   ;;  %421 = vst [vmem:[#allocation3 + $0xdc] sm:$0xf] %v8329_v26  ;;  %422 = vst [vmem:[#allocation3 + $0x100] sm:$0xf] %v8330_v27  ;;  %v7697_v44 = vcombine.low %v1498_v34, %v1503_v40  ;;  %2815 = vmatmul.mubr.bf16.vlgmr.msra.gmra.mxu0 %v7695_v42 }
  0x41   :  { %573 = vst [vmem:[#allocation3 + $0x104] sm:$0xf] %v8355_v28  ;;  %723 = vst [vmem:[#allocation3 + $0xe4] sm:$0xf] %v8355_v28  ;;  %v97_v1 = vld [vmem:[%s11369_s0 + $0x48] sm:$0xff]  ;;  %2950 = vmatprep.mubr.bf16.mxu1 %v9724_v41  ;;  %8937 = vmatpush3.bf16.msra.mxu0 %v9727_v19  ;;  %v1517_v60 = vld [vmem:[#allocation3 + $0x90] sm:$0xff] }
  0x42   :  { %4273 = vst [vmem:[#allocation3 + $0x8] sm:$0xf] %v10294_v39  ;;  %724 = vst [vmem:[#allocation3 + $0x108] sm:$0xf] %v8380_v35  ;;  %v1507_v39 = vld [vmem:[#allocation3 + $0x48] sm:$0xff]  ;;  %2951 = vmatmul.mubr.bf16.vlgmr.msra.gmra.mxu1 %v7697_v44  ;;  %8938 = vmatprep.subr.bf16.mxu0 %v9733_v43  ;;  %v1522_v61 = vld [vmem:[#allocation3 + $0xb4] sm:$0xff] }
  0x43   :  { %272 = vst [vmem:[#allocation3 + $0x120] sm:$0xf] %v8306_v36  ;;  %423 = vst [vmem:[#allocation3 + $0x124] sm:$0xf] %v8331_v38  ;;  %v9728_v47 = vld [vmem:[#allocation3 + $0x4c] ss:$36 sps:$4 sm:$0xff]   ;;  %v7713_v17 = vcombine.low %v1517_v60, %v1522_v61 }
  0x44   :  { %574 = vst [vmem:[#allocation3 + $0x128] sm:$0xf] %v8380_v35  ;;  %122 = vst [vmem:[#allocation2 + $0x53] sm:$0xff] %v97_v1  ;;  %v1512_v48 = vld [vmem:[#allocation3 + $0x6c] sm:$0xff]  ;;  %v9730_v49 = vld [vmem:[#allocation3 + $0x54] ss:$36 sps:$4 sm:$0xff]   ;;  %2822 = vmatprep.mubr.bf16.mxu0 %v9728_v47 }
  0x45   :  { %123 = vst [vmem:[#allocation2 + $0x5b] sm:$0xff] %v98_v37  ;;  %v298_v52 = vld [vmem:[#allocation2 + $0x49] sm:$0xff]  ;;  %2958 = vmatprep.mubr.bf16.mxu1 %v9730_v49  ;;  %v7704_v55 = vcombine.low %v1507_v39, %v1512_v48  ;;  %8939 = vmatpush3.bf16.msra.mxu0 %v9734_v45  ;;  %v9735_v57 = vld [vmem:[#allocation3 + $0x94] ss:$36 sps:$4 sm:$0xff]   ;;  %273 = vst [vmem:[#allocation3 + $0x144] sm:$0xf] %v8307_v53 }
  0x46   :  { %v8332_v54 = vpack.c.bf16 %v298_v52, %v298_v52  ;;  %v9732_v56 = vld [vmem:[#allocation3 + $0x50] ss:$36 sps:$4 sm:$0xff]   ;;  %v9737_v59 = vld [vmem:[#allocation3 + $0x9c] ss:$36 sps:$4 sm:$0xff]   ;;  %8940 = vmatprep.subr.bf16.mxu0 %v9745_v50  ;;  %v9756_v16 = vld [vmem:[#allocation4 + $0x160] sm:$0xff]  }
  0x47   :  { %v449_v62 = vld [vmem:[#allocation2 + $0x4a] sm:$0xff]  ;;  %v9739_v14 = vld [vmem:[#allocation3 + $0x98] ss:$36 sps:$4 sm:$0xff]   ;;  %v100_v21 = vld [vmem:[%s11369_s0 + $0x60] sm:$0xff] }
  0x48   :  { %424 = vst [vmem:[#allocation3 + $0x148] sm:$0xf] %v8332_v54  ;;  %2823 = vmatmul.mubr.bf16.gmra.mxu0 %v7704_v55  ;;  %v8357_v63 = vpack.c.bf16 %v449_v62, %v449_v62  ;;  %v9740_v18 = vld [vmem:[#allocation3 + $0xdc] ss:$36 sps:$4 sm:$0xff]   ;;  %v9758_v20 = vld [vmem:[#allocation4 + $0x120] sm:$0xff]   ;;  %125 = vst [vmem:[#allocation2 + $0x6b] sm:$0xff] %v100_v21 }
  0x49   :  { %2830 = vmatprep.mubr.bf16.mxu0 %v9735_v57  ;;  %8941 = vmatpush3.bf16.msra.mxu0 %v9746_v58  ;;  %v9742_v19 = vld [vmem:[#allocation3 + $0xe4] ss:$36 sps:$4 sm:$0xff]   ;;  %v1527_v27 = vld [vmem:[#allocation3 + $0xd8] sm:$0xff]  ;;  %v102_v31 = vld [vmem:[%s11369_s0 + $0x70] sm:$0xff] }
  0x4a   :  { %2959 = vmatmul.mubr.bf16.gmra.mxu1 %v9732_v56  ;;  %575 = vst [vmem:[#allocation3 + $0x14c] sm:$0xf] %v8357_v63  ;;  %725 = vst [vmem:[#allocation3 + $0x12c] sm:$0xf] %v8357_v63  ;;  %8942 = vmatprep.subr.bf16.mxu0 %v9756_v16  ;;  %v101_v26 = vld [vmem:[%s11369_s0 + $0x68] sm:$0xff]  ;;  %v1532_v28 = vld [vmem:[#allocation3 + $0xfc] sm:$0xff] }
  0x4b   :  { %v600_v0 = vld [vmem:[#allocation2 + $0x52] sm:$0xff]  ;;  %2966 = vmatprep.mubr.bf16.mxu1 %v9737_v59  ;;  %126 = vst [vmem:[#allocation2 + $0x73] sm:$0xff] %v101_v26  ;;  %v9764_v29 = vld [vmem:[#allocation4 + $0x158] sm:$0xff]   ;;  %127 = vst [vmem:[#allocation2 + $0x7b] sm:$0xff] %v102_v31  ;;  %v7722_v36 = vcombine.low %v1527_v27, %v1532_v28 }
  0x4c   :  { %v148_v2 = vld [vmem:[#allocation2 + $0x50] sm:$0xff]  ;;  %v149_v3 = vld [vmem:[#allocation2 + $0x58] sm:$0xff]  ;;  %v8382_v4 = vpack.c.bf16 %v600_v0, %v600_v0  ;;  %v602_v13 = vld [vmem:[#allocation2 + $0x62] sm:$0xff] }
  0x4d   :  { %v8308_v5 = vpack.c.bf16 %v148_v2, %v148_v2  ;;  %v8309_v6 = vpack.c.bf16 %v149_v3, %v149_v3  ;;  %v299_v7 = vld [vmem:[#allocation2 + $0x51] sm:$0xff]  ;;  %v300_v8 = vld [vmem:[#allocation2 + $0x59] sm:$0xff]  ;;  %v8384_v15 = vpack.c.bf16 %v602_v13, %v602_v13  ;;  %v301_v23 = vld [vmem:[#allocation2 + $0x61] sm:$0xff]  ;;  %8943 = vmatpush3.bf16.msra.mxu0 %v9758_v20 }
  0x4e   :  { %v451_v9 = vld [vmem:[#allocation2 + $0x5a] sm:$0xff]  ;;  %v8333_v10 = vpack.c.bf16 %v299_v7, %v299_v7  ;;  %v8334_v11 = vpack.c.bf16 %v300_v8, %v300_v8  ;;  %726 = vst [vmem:[#allocation3 + $0x150] sm:$0xf] %v8382_v4  ;;  %576 = vst [vmem:[#allocation3 + $0x170] sm:$0xf] %v8382_v4  ;;  %v8335_v25 = vpack.c.bf16 %v301_v23, %v301_v23  ;;  %v105_v34 = vld [vmem:[%s11369_s0 + $0x88] sm:$0xff]  ;;  %8944 = vmatprep.subr.bf16.mxu0 %v9764_v29 }
  0x4f   :  { %v8359_v12 = vpack.c.bf16 %v451_v9, %v451_v9  ;;  %274 = vst [vmem:[#allocation3 + $0x168] sm:$0xf] %v8308_v5  ;;  %275 = vst [vmem:[#allocation3 + $0x18c] sm:$0xf] %v8309_v6  ;;  %v150_v22 = vld [vmem:[#allocation2 + $0x60] sm:$0xff]  ;;  %v103_v32 = vld [vmem:[%s11369_s0 + $0x78] sm:$0xff] }
  0x50   :  { %425 = vst [vmem:[#allocation3 + $0x16c] sm:$0xf] %v8333_v10  ;;  %426 = vst [vmem:[#allocation3 + $0x190] sm:$0xf] %v8334_v11  ;;  %v8310_v24 = vpack.c.bf16 %v150_v22, %v150_v22  ;;  %2831 = vmatmul.mubr.bf16.gmra.mxu0 %v7713_v17  ;;  %v9765_v30 = vld [vmem:[#allocation4 + $0x118] sm:$0xff]   ;;  %v151_v41 = vld [vmem:[#allocation2 + $0x68] sm:$0xff] }
  0x51   :  { %577 = vst [vmem:[#allocation3 + $0x194] sm:$0xf] %v8359_v12  ;;  %727 = vst [vmem:[#allocation3 + $0x174] sm:$0xf] %v8359_v12  ;;  %2838 = vmatprep.mubr.bf16.mxu0 %v9740_v18  ;;  %v104_v33 = vld [vmem:[%s11369_s0 + $0x80] sm:$0xff]  ;;  %8945 = vmatpush3.bf16.msra.mxu0 %v9765_v30  ;;  %v302_v42 = vld [vmem:[#allocation2 + $0x69] sm:$0xff]  ;;  %v8311_v43 = vpack.c.bf16 %v151_v41, %v151_v41 }
  0x52   :  { %728 = vst [vmem:[#allocation3 + $0x198] sm:$0xf] %v8384_v15  ;;  %578 = vst [vmem:[#allocation3 + $0x1b8] sm:$0xf] %v8384_v15  ;;  %2967 = vmatmul.mubr.bf16.gmra.mxu1 %v9739_v14  ;;  %v9744_v35 = vld [vmem:[#allocation3 + $0xe0] ss:$36 sps:$4 sm:$0xff]   ;;  %v8336_v44 = vpack.c.bf16 %v302_v42, %v302_v42 }
  0x53   :  { %276 = vst [vmem:[#allocation3 + $0x1b0] sm:$0xf] %v8310_v24  ;;  %427 = vst [vmem:[#allocation3 + $0x1b4] sm:$0xf] %v8335_v25  ;;  %2974 = vmatprep.mubr.bf16.mxu1 %v9742_v19  ;;  %v9747_v38 = vld [vmem:[#allocation3 + $0x124] ss:$36 sps:$4 sm:$0xff]  }
  0x54   :  { %128 = vst [vmem:[#allocation2 + $0x83] sm:$0xff] %v103_v32  ;;  %129 = vst [vmem:[#allocation2 + $0x8b] sm:$0xff] %v104_v33  ;;  %v453_v45 = vld [vmem:[#allocation2 + $0x6a] sm:$0xff]  ;;  %v604_v1 = vld [vmem:[#allocation2 + $0x72] sm:$0xff] }
  0x55   :  { %130 = vst [vmem:[#allocation2 + $0x93] sm:$0xff] %v105_v34  ;;  %v9749_v40 = vld [vmem:[#allocation3 + $0x12c] ss:$36 sps:$4 sm:$0xff]   ;;  %v10352_v46 = vld [vmem:[#allocation3 + $0x120] sm:$0xff]  ;;  %v8361_v47 = vpack.c.bf16 %v453_v45, %v453_v45  ;;  %v8386_v48 = vpack.c.bf16 %v604_v1, %v604_v1  ;;  %277 = vst [vmem:[#allocation3 + $0x1d4] sm:$0xf] %v8311_v43 }
  0x56   :  { %v152_v37 = vld [vmem:[#allocation2 + $0x70] sm:$0xff]  ;;  %v10354_v39 = vld [vmem:[#allocation3 + $0x144] sm:$0xff]  ;;  %428 = vst [vmem:[#allocation3 + $0x1d8] sm:$0xf] %v8336_v44  ;;  %v153_v51 = vld [vmem:[#allocation2 + $0x78] sm:$0xff] }
  0x57   :  { %v8312_v49 = vpack.c.bf16 %v152_v37, %v152_v37  ;;  %v303_v50 = vld [vmem:[#allocation2 + $0x71] sm:$0xff]  ;;  %v304_v52 = vld [vmem:[#allocation2 + $0x79] sm:$0xff]  ;;  %579 = vst [vmem:[#allocation3 + $0x1dc] sm:$0xf] %v8361_v47  ;;  %729 = vst [vmem:[#allocation3 + $0x1bc] sm:$0xf] %v8361_v47  ;;  %v8313_v55 = vpack.c.bf16 %v153_v51, %v153_v51  ;;  %v7731_v11 = vcombine.low %v10352_v46, %v10354_v39 }
  0x58   :  { %2839 = vmatmul.mubr.bf16.gmra.mxu0 %v7722_v36  ;;  %v8337_v53 = vpack.c.bf16 %v303_v50, %v303_v50  ;;  %v455_v54 = vld [vmem:[#allocation2 + $0x7a] sm:$0xff]  ;;  %730 = vst [vmem:[#allocation3 + $0x1e0] sm:$0xf] %v8386_v48  ;;  %v8338_v56 = vpack.c.bf16 %v304_v52, %v304_v52  ;;  %580 = vst [vmem:[#allocation3 + $0x200] sm:$0xf] %v8386_v48  ;;  %v106_v15 = vld [vmem:[%s11369_s0 + $0x90] sm:$0xff] }
  0x59   :  { %2846 = vmatprep.mubr.bf16.mxu0 %v9747_v38  ;;  %278 = vst [vmem:[#allocation3 + $0x1f8] sm:$0xf] %v8312_v49  ;;  %v8363_v57 = vpack.c.bf16 %v455_v54, %v455_v54  ;;  %v9751_v4 = vld [vmem:[#allocation3 + $0x128] ss:$36 sps:$4 sm:$0xff]   ;;  %279 = vst [vmem:[#allocation3 + $0x21c] sm:$0xf] %v8313_v55 }
  0x5a   :  { %2975 = vmatmul.mubr.bf16.gmra.mxu1 %v9744_v35  ;;  %429 = vst [vmem:[#allocation3 + $0x1fc] sm:$0xf] %v8337_v53  ;;  %v9752_v5 = vld [vmem:[#allocation3 + $0x16c] ss:$36 sps:$4 sm:$0xff]   ;;  %430 = vst [vmem:[#allocation3 + $0x220] sm:$0xf] %v8338_v56 }
  0x5b   :  { %v606_v58 = vld [vmem:[#allocation2 + $0x82] sm:$0xff]  ;;  %2982 = vmatprep.mubr.bf16.mxu1 %v9749_v40  ;;  %v457_v3 = vld [vmem:[#allocation2 + $0x8a] sm:$0xff]  ;;  %581 = vst [vmem:[#allocation3 + $0x224] sm:$0xf] %v8363_v57  ;;  %731 = vst [vmem:[#allocation3 + $0x204] sm:$0xf] %v8363_v57 }
  0x5c   :  { %v154_v59 = vld [vmem:[#allocation2 + $0x80] sm:$0xff]  ;;  %v155_v60 = vld [vmem:[#allocation2 + $0x88] sm:$0xff]  ;;  %v8388_v61 = vpack.c.bf16 %v606_v58, %v606_v58  ;;  %v8365_v8 = vpack.c.bf16 %v457_v3, %v457_v3  ;;  %v608_v9 = vld [vmem:[#allocation2 + $0x92] sm:$0xff]  ;;  %131 = vst [vmem:[#allocation2 + $0x9b] sm:$0xff] %v106_v15 }
  0x5d   :  { %v8314_v62 = vpack.c.bf16 %v154_v59, %v154_v59  ;;  %v8315_v63 = vpack.c.bf16 %v155_v60, %v155_v60  ;;  %v305_v0 = vld [vmem:[#allocation2 + $0x81] sm:$0xff]  ;;  %v306_v2 = vld [vmem:[#allocation2 + $0x89] sm:$0xff]  ;;  %v9776_v10 = vld [vmem:[#allocation4 + $0x150] sm:$0xff]   ;;  %v8390_v13 = vpack.c.bf16 %v608_v9, %v608_v9 }
  0x5e   :  { %v8339_v6 = vpack.c.bf16 %v305_v0, %v305_v0  ;;  %v8340_v7 = vpack.c.bf16 %v306_v2, %v306_v2  ;;  %v9754_v12 = vld [vmem:[#allocation3 + $0x174] ss:$36 sps:$4 sm:$0xff]   ;;  %732 = vst [vmem:[#allocation3 + $0x228] sm:$0xf] %v8388_v61  ;;  %582 = vst [vmem:[#allocation3 + $0x248] sm:$0xf] %v8388_v61  ;;  %8946 = vmatprep.subr.bf16.mxu0 %v9776_v10 }
  0x5f   :  { %280 = vst [vmem:[#allocation3 + $0x240] sm:$0xf] %v8314_v62  ;;  %281 = vst [vmem:[#allocation3 + $0x264] sm:$0xf] %v8315_v63  ;;  %v9777_v14 = vld [vmem:[#allocation4 + $0x110] sm:$0xff]   ;;  %v9783_v21 = vld [vmem:[#allocation4 + $0x1f8] sm:$0xff]  }
  0x60   :  { %431 = vst [vmem:[#allocation3 + $0x244] sm:$0xf] %v8339_v6  ;;  %432 = vst [vmem:[#allocation3 + $0x268] sm:$0xf] %v8340_v7  ;;  %v156_v16 = vld [vmem:[#allocation2 + $0x90] sm:$0xff]  ;;  %8947 = vmatpush3.bf16.msra.mxu0 %v9777_v14  ;;  %v107_v20 = vld [vmem:[%s11369_s0 + $0x98] sm:$0xff]  ;;  %9030 = vmatprep.subr.bf16.mxu1 %v9783_v21 }
  0x61   :  { %583 = vst [vmem:[#allocation3 + $0x26c] sm:$0xf] %v8365_v8  ;;  %733 = vst [vmem:[#allocation3 + $0x24c] sm:$0xf] %v8365_v8  ;;  %v307_v17 = vld [vmem:[#allocation2 + $0x91] sm:$0xff]  ;;  %v8316_v18 = vpack.c.bf16 %v156_v16, %v156_v16  ;;  %2847 = vmatmul.mubr.bf16.gmra.mxu0 %v7731_v11  ;;  %v1547_v22 = vld [vmem:[#allocation3 + $0x168] sm:$0xff] }
  0x62   :  { %734 = vst [vmem:[#allocation3 + $0x270] sm:$0xf] %v8390_v13  ;;  %v8341_v19 = vpack.c.bf16 %v307_v17, %v307_v17  ;;  %584 = vst [vmem:[#allocation3 + $0x290] sm:$0xf] %v8390_v13  ;;  %2983 = vmatmul.mubr.bf16.gmra.mxu1 %v9751_v4  ;;  %v1552_v23 = vld [vmem:[#allocation3 + $0x18c] sm:$0xff]  ;;  %2854 = vmatprep.mubr.bf16.mxu0 %v9752_v5  ;;  %v1562_v31 = vld [vmem:[#allocation3 + $0x1d4] sm:$0xff] }
  0x63   :  { %132 = vst [vmem:[#allocation2 + $0xa3] sm:$0xff] %v107_v20  ;;  %282 = vst [vmem:[#allocation3 + $0x288] sm:$0xf] %v8316_v18  ;;  %2990 = vmatprep.mubr.bf16.mxu1 %v9754_v12  ;;  %v7740_v24 = vcombine.low %v1547_v22, %v1552_v23  ;;  %v9757_v25 = vld [vmem:[#allocation3 + $0x170] ss:$36 sps:$4 sm:$0xff]   ;;  %v157_v28 = vld [vmem:[#allocation2 + $0x98] sm:$0xff] }
  0x64   :  { %433 = vst [vmem:[#allocation3 + $0x28c] sm:$0xf] %v8341_v19  ;;  %v9759_v26 = vld [vmem:[#allocation3 + $0x1b4] ss:$36 sps:$4 sm:$0xff]   ;;  %v9761_v27 = vld [vmem:[#allocation3 + $0x1bc] ss:$36 sps:$4 sm:$0xff]   ;;  %v8317_v32 = vpack.c.bf16 %v157_v28, %v157_v28 }
  0x65   :  { %v308_v29 = vld [vmem:[#allocation2 + $0x99] sm:$0xff]  ;;  %v1557_v30 = vld [vmem:[#allocation3 + $0x1b0] sm:$0xff]  ;;  %v109_v46 = vld [vmem:[%s11369_s0 + $0xa8] sm:$0xff] }
  0x66   :  { %v8342_v33 = vpack.c.bf16 %v308_v29, %v308_v29  ;;  %v459_v34 = vld [vmem:[#allocation2 + $0x9a] sm:$0xff]  ;;  %283 = vst [vmem:[#allocation3 + $0x2ac] sm:$0xf] %v8317_v32  ;;  %v9785_v41 = vld [vmem:[#allocation4 + $0x148] sm:$0xff]   ;;  %v7749_v39 = vcombine.low %v1557_v30, %v1562_v31  ;;  %v9768_v47 = vld [vmem:[#allocation3 + $0x204] ss:$36 sps:$4 sm:$0xff]  }
  0x67   :  { %v8367_v36 = vpack.c.bf16 %v459_v34, %v459_v34  ;;  %v9784_v40 = vld [vmem:[#allocation4 + $0x1b8] sm:$0xff]   ;;  %v9786_v42 = vld [vmem:[#allocation4 + $0x1f0] sm:$0xff]   ;;  %8948 = vmatprep.subr.bf16.mxu0 %v9785_v41  ;;  %134 = vst [vmem:[#allocation2 + $0xb3] sm:$0xff] %v109_v46  ;;  %v9791_v50 = vld [vmem:[#allocation4 + $0x108] sm:$0xff]  }
  0x68   :  { %434 = vst [vmem:[#allocation3 + $0x2b0] sm:$0xf] %v8342_v33  ;;  %9031 = vmatpush3.bf16.msra.mxu1 %v9784_v40  ;;  %v108_v43 = vld [vmem:[%s11369_s0 + $0xa0] sm:$0xff]  ;;  %v9763_v44 = vld [vmem:[#allocation3 + $0x1b8] ss:$36 sps:$4 sm:$0xff]   ;;  %8949 = vmatpush3.bf16.msra.mxu0 %v9791_v50  ;;  %v9794_v52 = vld [vmem:[#allocation4 + $0x1e8] sm:$0xff]  }
  0x69   :  { %2855 = vmatmul.mubr.bf16.gmra.mxu0 %v7740_v24  ;;  %585 = vst [vmem:[#allocation3 + $0x2b4] sm:$0xf] %v8367_v36  ;;  %735 = vst [vmem:[#allocation3 + $0x294] sm:$0xf] %v8367_v36  ;;  %v9766_v45 = vld [vmem:[#allocation3 + $0x1fc] ss:$36 sps:$4 sm:$0xff]   ;;  %9032 = vmatprep.subr.bf16.mxu1 %v9786_v42 }
  0x6a   :  { %v610_v35 = vld [vmem:[#allocation2 + $0xa2] sm:$0xff]  ;;  %2991 = vmatmul.mubr.bf16.gmra.mxu1 %v9757_v25  ;;  %2862 = vmatprep.mubr.bf16.mxu0 %v9759_v26  ;;  %133 = vst [vmem:[#allocation2 + $0xab] sm:$0xff] %v108_v43  ;;  %v9792_v51 = vld [vmem:[#allocation4 + $0x1b0] sm:$0xff]   ;;  %v9795_v53 = vld [vmem:[#allocation4 + $0x1a8] sm:$0xff]  }
  0x6b   :  { %v8392_v38 = vpack.c.bf16 %v610_v35, %v610_v35  ;;  %2998 = vmatprep.mubr.bf16.mxu1 %v9761_v27  ;;  %v158_v1 = vld [vmem:[#allocation2 + $0xa0] sm:$0xff]  ;;  %v1567_v54 = vld [vmem:[#allocation3 + $0x1f8] sm:$0xff]  ;;  %v110_v5 = vld [vmem:[%s11369_s0 + $0xb0] sm:$0xff] }
  0x6c   :  { %v309_v37 = vld [vmem:[#allocation2 + $0xa1] sm:$0xff]  ;;  %v8318_v48 = vpack.c.bf16 %v158_v1, %v158_v1  ;;  %9033 = vmatpush3.bf16.msra.mxu1 %v9792_v51  ;;  %v9773_v7 = vld [vmem:[#allocation3 + $0x24c] ss:$36 sps:$4 sm:$0xff]   ;;  %135 = vst [vmem:[#allocation2 + $0xbb] sm:$0xff] %v110_v5  ;;  %v111_v10 = vld [vmem:[%s11369_s0 + $0xb8] sm:$0xff] }
  0x6d   :  { %736 = vst [vmem:[#allocation3 + $0x2b8] sm:$0xf] %v8392_v38  ;;  %586 = vst [vmem:[#allocation3 + $0x2d8] sm:$0xf] %v8392_v38  ;;  %v8343_v49 = vpack.c.bf16 %v309_v37, %v309_v37  ;;  %9034 = vmatprep.subr.bf16.mxu1 %v9794_v52  ;;  %v1572_v55 = vld [vmem:[#allocation3 + $0x21c] sm:$0xff]  ;;  %v9796_v4 = vld [vmem:[#allocation4 + $0x1e0] sm:$0xff]  }
  0x6e   :  { %284 = vst [vmem:[#allocation3 + $0x2d0] sm:$0xf] %v8318_v48  ;;  %v9770_v58 = vld [vmem:[#allocation3 + $0x200] ss:$36 sps:$4 sm:$0xff]   ;;  %v7758_v0 = vcombine.low %v1567_v54, %v1572_v55  ;;  %136 = vst [vmem:[#allocation2 + $0xc3] sm:$0xff] %v111_v10  ;;  %v9807_v19 = vld [vmem:[#allocation4 + $0x1d0] sm:$0xff]  }
  0x6f   :  { %435 = vst [vmem:[#allocation3 + $0x2d4] sm:$0xf] %v8343_v49  ;;  %v9771_v59 = vld [vmem:[#allocation3 + $0x244] ss:$36 sps:$4 sm:$0xff]   ;;  %v9803_v15 = vld [vmem:[#allocation4 + $0x1d8] sm:$0xff]   ;;  %v1592_v30 = vld [vmem:[#allocation3 + $0x2ac] sm:$0xff] }
  0x70   :  { %9035 = vmatpush3.bf16.msra.mxu1 %v9795_v53  ;;  %v9801_v12 = vld [vmem:[#allocation4 + $0x1a0] sm:$0xff]   ;;  %v9805_v17 = vld [vmem:[#allocation4 + $0x198] sm:$0xff]   ;;  %v9778_v23 = vld [vmem:[#allocation3 + $0x28c] ss:$36 sps:$4 sm:$0xff]  }
  0x71   :  { %2863 = vmatmul.mubr.bf16.gmra.mxu0 %v7749_v39  ;;  %v159_v56 = vld [vmem:[#allocation2 + $0xa8] sm:$0xff]  ;;  %v612_v63 = vld [vmem:[#allocation2 + $0xb2] sm:$0xff]  ;;  %9036 = vmatprep.subr.bf16.mxu1 %v9796_v4  ;;  %v1577_v13 = vld [vmem:[#allocation3 + $0x240] sm:$0xff] }
  0x72   :  { %2999 = vmatmul.mubr.bf16.gmra.mxu1 %v9763_v44  ;;  %2870 = vmatprep.mubr.bf16.mxu0 %v9766_v45  ;;  %v310_v57 = vld [vmem:[#allocation2 + $0xa9] sm:$0xff]  ;;  %v8319_v60 = vpack.c.bf16 %v159_v56, %v159_v56  ;;  %v8394_v3 = vpack.c.bf16 %v612_v63, %v612_v63  ;;  %v311_v9 = vld [vmem:[#allocation2 + $0xb1] sm:$0xff]  ;;  %v10376_v25 = vld [vmem:[#allocation2] sm:$0xff] }
  0x73   :  { %3006 = vmatprep.mubr.bf16.mxu1 %v9768_v47  ;;  %v8344_v61 = vpack.c.bf16 %v310_v57, %v310_v57  ;;  %v461_v62 = vld [vmem:[#allocation2 + $0xaa] sm:$0xff]  ;;  %v8345_v11 = vpack.c.bf16 %v311_v9, %v311_v9  ;;  %v161_v22 = vld [vmem:[#allocation2 + $0xb8] sm:$0xff]  ;;  %v112_v40 = vld [vmem:[%s11369_s0 + $0xc0] sm:$0xff] }
  0x74   :  { %v8369_v2 = vpack.c.bf16 %v461_v62, %v461_v62  ;;  %v160_v6 = vld [vmem:[#allocation2 + $0xb0] sm:$0xff]  ;;  %285 = vst [vmem:[#allocation3 + $0x2f4] sm:$0xf] %v8319_v60  ;;  %738 = vst [vmem:[#allocation3 + $0x300] sm:$0xf] %v8394_v3  ;;  %v1582_v14 = vld [vmem:[#allocation3 + $0x264] sm:$0xff]  ;;  %9037 = vmatpush3.bf16.msra.mxu1 %v9801_v12  ;;  %v8321_v24 = vpack.c.bf16 %v161_v22, %v161_v22 }
  0x75   :  { %436 = vst [vmem:[#allocation3 + $0x2f8] sm:$0xf] %v8344_v61  ;;  %v8320_v8 = vpack.c.bf16 %v160_v6, %v160_v6  ;;  %588 = vst [vmem:[#allocation3 + $0x320] sm:$0xf] %v8394_v3  ;;  %v9804_v16 = vld [vmem:[#allocation4 + $0x140] sm:$0xff]   ;;  %9038 = vmatprep.subr.bf16.mxu1 %v9803_v15  ;;  %v7767_v20 = vcombine.low %v1577_v13, %v1582_v14  ;;  %v312_v27 = vld [vmem:[#allocation2 + $0xb9] sm:$0xff] }
  0x76   :  { %587 = vst [vmem:[#allocation3 + $0x2fc] sm:$0xf] %v8369_v2  ;;  %737 = vst [vmem:[#allocation3 + $0x2dc] sm:$0xf] %v8369_v2  ;;  %v9806_v18 = vld [vmem:[#allocation4 + $0x100] sm:$0xff]   ;;  %8950 = vmatprep.subr.bf16.mxu0 %v9804_v16  ;;  %v463_v28 = vld [vmem:[#allocation2 + $0xba] sm:$0xff]  ;;  %v8346_v31 = vpack.c.bf16 %v312_v27, %v312_v27 }
  0x77   :  { %286 = vst [vmem:[#allocation3 + $0x318] sm:$0xf] %v8320_v8  ;;  %437 = vst [vmem:[#allocation3 + $0x31c] sm:$0xf] %v8345_v11  ;;  %v9775_v21 = vld [vmem:[#allocation3 + $0x248] ss:$36 sps:$4 sm:$0xff]   ;;  %8951 = vmatpush3.bf16.msra.mxu0 %v9806_v18  ;;  %v8371_v32 = vpack.c.bf16 %v463_v28, %v463_v28 }
  0x78   :  { %9039 = vmatpush3.bf16.msra.mxu1 %v9805_v17  ;;  %9542 = vmatprep.subr.bf16.mxu0 %v10376_v25  ;;  %v9780_v26 = vld [vmem:[#allocation3 + $0x294] ss:$36 sps:$4 sm:$0xff]   ;;  %v1587_v29 = vld [vmem:[#allocation3 + $0x288] sm:$0xff]  ;;  %287 = vst [vmem:[#allocation3 + $0x33c] sm:$0xf] %v8321_v24  ;;  %v162_v34 = vld [vmem:[#allocation2 + $0xc0] sm:$0xff] }
  0x79   :  { %2871 = vmatmul.mubr.bf16.gmra.mxu0 %v7758_v0  ;;  %9040 = vmatprep.subr.bf16.mxu1 %v9807_v19  ;;  %v614_v33 = vld [vmem:[#allocation2 + $0xc2] sm:$0xff]  ;;  %v8322_v36 = vpack.c.bf16 %v162_v34, %v162_v34  ;;  %438 = vst [vmem:[#allocation3 + $0x340] sm:$0xf] %v8346_v31  ;;  %589 = vst [vmem:[#allocation3 + $0x344] sm:$0xf] %v8371_v32  ;;  %v9810_v42 = vld [vmem:[#allocation4 + $0x190] sm:$0xff]   ;;  %v7776_v37 = vcombine.low %v1587_v29, %v1592_v30 }
  0x7a   :  { %3007 = vmatmul.mubr.bf16.gmra.mxu1 %v9770_v58  ;;  %2878 = vmatprep.mubr.bf16.mxu0 %v9771_v59  ;;  %v8396_v35 = vpack.c.bf16 %v614_v33, %v614_v33  ;;  %v313_v38 = vld [vmem:[#allocation2 + $0xc1] sm:$0xff]  ;;  %739 = vst [vmem:[#allocation3 + $0x324] sm:$0xf] %v8371_v32  ;;  %137 = vst [vmem:[#allocation2 + $0xcb] sm:$0xff] %v112_v40  ;;  %v9813_v43 = vld [vmem:[#allocation4 + $0x1c8] sm:$0xff]  }
  0x7b   :  { %3014 = vmatprep.mubr.bf16.mxu1 %v9773_v7  ;;  %v8347_v41 = vpack.c.bf16 %v313_v38, %v313_v38  ;;  %288 = vst [vmem:[#allocation3 + $0x360] sm:$0xf] %v8322_v36  ;;  %v9782_v44 = vld [vmem:[#allocation3 + $0x290] ss:$36 sps:$4 sm:$0xff]   ;;  %v9815_v39 = vld [vmem:[#allocation4 + $0x1c0] sm:$0xff]   ;;  %v1045_v56 = vld [vmem:[#allocation2 + $0x1c] sm:$0xff] }
  0x7c   :  { %740 = vst [vmem:[#allocation3 + $0x348] sm:$0xf] %v8396_v35  ;;  %590 = vst [vmem:[#allocation3 + $0x368] sm:$0xf] %v8396_v35  ;;  %v9787_v45 = vld [vmem:[#allocation3 + $0x2d4] ss:$36 sps:$4 sm:$0xff]   ;;  %9041 = vmatpush3.bf16.msra.mxu1 %v9810_v42  ;;  %v8449_v59 = vpack.c.bf16 %v1045_v56, %v1045_v56 }
  0x7d   :  { %439 = vst [vmem:[#allocation3 + $0x364] sm:$0xf] %v8347_v41  ;;  %v9814_v1 = vld [vmem:[#allocation4 + $0x188] sm:$0xff]   ;;  %v9789_v46 = vld [vmem:[#allocation3 + $0x2dc] ss:$36 sps:$4 sm:$0xff]   ;;  %9042 = vmatprep.subr.bf16.mxu1 %v9813_v43  ;;  %v894_v51 = vld [vmem:[#allocation2 + $0x14] sm:$0xff] }
  0x7e   :  { %v742_v47 = vld [vmem:[#allocation2 + $0xb] sm:$0xff]  ;;  %v743_v48 = vld [vmem:[#allocation2 + $0x13] sm:$0xff]  ;;  %v8424_v54 = vpack.c.bf16 %v894_v51, %v894_v51  ;;  %v1196_v58 = vld [vmem:[#allocation2 + $0x1d] sm:$0xff]  ;;  %1171 = vst [vmem:[#allocation3 + $0x3c] sm:$0xf] %v8449_v59 }
  0x7f   :  { %v8398_v49 = vpack.c.bf16 %v742_v47, %v742_v47  ;;  %v893_v50 = vld [vmem:[#allocation2 + $0xc] sm:$0xff]  ;;  %v8399_v52 = vpack.c.bf16 %v743_v48, %v743_v48  ;;  %v9818_v55 = vld [vmem:[#allocation4 + $0x180] sm:$0xff]   ;;  %v1195_v57 = vld [vmem:[#allocation2 + $0x15] sm:$0xff]  ;;  %v8474_v61 = vpack.c.bf16 %v1196_v58, %v1196_v58  ;;  %1021 = vst [vmem:[#allocation3 + $0x5c] sm:$0xf] %v8449_v59 }
  0x80   :  { %v8423_v53 = vpack.c.bf16 %v893_v50, %v893_v50  ;;  %9043 = vmatpush3.bf16.msra.mxu1 %v9814_v1  ;;  %1020 = vst [vmem:[#allocation3 + $0x38] sm:$0xf] %v8424_v54  ;;  %1170 = vst [vmem:[#allocation3 + $0x18] sm:$0xf] %v8424_v54  ;;  %v8473_v60 = vpack.c.bf16 %v1195_v57, %v1195_v57  ;;  %v1597_v62 = vld [vmem:[#allocation3 + $0x2d0] sm:$0xff]  ;;  %v744_v5 = vld [vmem:[#allocation2 + $0x1b] sm:$0xff] }
  0x81   :  { %2879 = vmatmul.mubr.bf16.gmra.mxu0 %v7767_v20  ;;  %868 = vst [vmem:[#allocation3 + $0x10] sm:$0xf] %v8398_v49  ;;  %9044 = vmatprep.subr.bf16.mxu1 %v9815_v39  ;;  %869 = vst [vmem:[#allocation3 + $0x34] sm:$0xf] %v8399_v52  ;;  %v1602_v63 = vld [vmem:[#allocation3 + $0x2f4] sm:$0xff]  ;;  %v615_v0 = vld [vmem:[#allocation2 + $0xca] sm:$0xff]  ;;  %v8400_v8 = vpack.c.bf16 %v744_v5, %v744_v5 }
  0x82   :  { %3015 = vmatmul.mubr.bf16.gmra.mxu1 %v9775_v21  ;;  %2886 = vmatprep.mubr.bf16.mxu0 %v9778_v23  ;;  %1019 = vst [vmem:[#allocation3 + $0x14] sm:$0xf] %v8423_v53  ;;  %1321 = vst [vmem:[#allocation3 + $0x1c] sm:$0xf] %v8473_v60  ;;  %v9793_v2 = vld [vmem:[#allocation3 + $0x2d8] ss:$36 sps:$4 sm:$0xff]   ;;  %v8397_v4 = vpack.c.bf16 %v615_v0, %v615_v0  ;;  %v7785_v6 = vcombine.low %v1597_v62, %v1602_v63 }
  0x83   :  { %3022 = vmatprep.mubr.bf16.mxu1 %v9780_v26  ;;  %1322 = vst [vmem:[#allocation3 + $0x40] sm:$0xf] %v8474_v61  ;;  %v9797_v3 = vld [vmem:[#allocation3 + $0x31c] ss:$36 sps:$4 sm:$0xff]   ;;  %v896_v9 = vld [vmem:[#allocation2 + $0x24] sm:$0xff]  ;;  %v1047_v10 = vld [vmem:[#allocation2 + $0x2c] sm:$0xff] }
  0x84   :  { %9045 = vmatpush3.bf16.msra.mxu1 %v9818_v55  ;;  %v745_v7 = vld [vmem:[#allocation2 + $0x23] sm:$0xff]  ;;  %741 = vst [vmem:[#allocation3 + $0x36c] sm:$0xf] %v8397_v4  ;;  %v8426_v12 = vpack.c.bf16 %v896_v9, %v896_v9  ;;  %v8451_v13 = vpack.c.bf16 %v1047_v10, %v1047_v10  ;;  %v1198_v15 = vld [vmem:[#allocation2 + $0x2d] sm:$0xff]  ;;  %870 = vst [vmem:[#allocation3 + $0x58] sm:$0xf] %v8400_v8 }
  0x85   :  { %v8401_v11 = vpack.c.bf16 %v745_v7, %v745_v7  ;;  %v1197_v14 = vld [vmem:[#allocation2 + $0x25] sm:$0xff]  ;;  %v8476_v18 = vpack.c.bf16 %v1198_v15, %v1198_v15  ;;  %v1607_v21 = vld [vmem:[#allocation3 + $0x318] sm:$0xff]  ;;  %v1202_v47 = vld [vmem:[#allocation2 + $0x4d] sm:$0xff] }
  0x86   :  { %v9799_v16 = vld [vmem:[#allocation3 + $0x324] ss:$36 sps:$4 sm:$0xff]   ;;  %v8475_v17 = vpack.c.bf16 %v1197_v14, %v1197_v14  ;;  %1022 = vst [vmem:[#allocation3 + $0x80] sm:$0xf] %v8426_v12  ;;  %1172 = vst [vmem:[#allocation3 + $0x60] sm:$0xf] %v8426_v12  ;;  %v8480_v50 = vpack.c.bf16 %v1202_v47, %v1202_v47 }
  0x87   :  { %v746_v19 = vld [vmem:[#allocation2 + $0x2b] sm:$0xff]  ;;  %871 = vst [vmem:[#allocation3 + $0x7c] sm:$0xf] %v8401_v11  ;;  %1173 = vst [vmem:[#allocation3 + $0x84] sm:$0xf] %v8451_v13  ;;  %v747_v22 = vld [vmem:[#allocation2 + $0x33] sm:$0xff] }
  0x88   :  { %v8402_v20 = vpack.c.bf16 %v746_v19, %v746_v19  ;;  %1023 = vst [vmem:[#allocation3 + $0xa4] sm:$0xf] %v8451_v13  ;;  %1323 = vst [vmem:[#allocation3 + $0x64] sm:$0xf] %v8475_v17  ;;  %v898_v23 = vld [vmem:[#allocation2 + $0x34] sm:$0xff]  ;;  %v1612_v24 = vld [vmem:[#allocation3 + $0x33c] sm:$0xff]  ;;  %v8403_v26 = vpack.c.bf16 %v747_v22, %v747_v22 }
  0x89   :  { %2887 = vmatmul.mubr.bf16.gmra.mxu0 %v7776_v37  ;;  %1324 = vst [vmem:[#allocation3 + $0x88] sm:$0xf] %v8476_v18  ;;  %v8428_v27 = vpack.c.bf16 %v898_v23, %v898_v23  ;;  %v10382_v28 = vld [vmem:[#allocation3 + $0x360] sm:$0xff]  ;;  %v1199_v30 = vld [vmem:[#allocation2 + $0x35] sm:$0xff]  ;;  %v7794_v38 = vcombine.low %v1607_v21, %v1612_v24  ;;  %1328 = vst [vmem:[#allocation3 + $0x118] sm:$0xf] %v8480_v50 }
  0x8a   :  { %3023 = vmatmul.mubr.bf16.gmra.mxu1 %v9782_v44  ;;  %2894 = vmatprep.mubr.bf16.mxu0 %v9787_v45  ;;  %872 = vst [vmem:[#allocation3 + $0xa0] sm:$0xf] %v8402_v20  ;;  %v1049_v29 = vld [vmem:[#allocation2 + $0x3c] sm:$0xff]  ;;  %873 = vst [vmem:[#allocation3 + $0xc4] sm:$0xf] %v8403_v26  ;;  %v8477_v34 = vpack.c.bf16 %v1199_v30, %v1199_v30  ;;  %v900_v44 = vld [vmem:[#allocation2 + $0x44] sm:$0xff]  ;;  %v7804_v1 = vcombine.high %v10382_v28, %v10382_v28 }
  0x8b   :  { %3030 = vmatprep.mubr.bf16.mxu1 %v9789_v46  ;;  %v9802_v31 = vld [vmem:[#allocation3 + $0x320] ss:$36 sps:$4 sm:$0xff]   ;;  %1024 = vst [vmem:[#allocation3 + $0xc8] sm:$0xf] %v8428_v27  ;;  %v8453_v32 = vpack.c.bf16 %v1049_v29, %v1049_v29  ;;  %1174 = vst [vmem:[#allocation3 + $0xa8] sm:$0xf] %v8428_v27  ;;  %v8430_v37 = vpack.c.bf16 %v900_v44, %v900_v44  ;;  %v7803_v56 = vcombine.low %v10382_v28, %v10382_v28 }
  0x8c   :  { %v1200_v33 = vld [vmem:[#allocation2 + $0x3d] sm:$0xff]  ;;  %v1618_v40 = vld [vmem:[#allocation3 + $0x368] sm:$0xff]  ;;  %1325 = vst [vmem:[#allocation3 + $0xac] sm:$0xf] %v8477_v34  ;;  %v751_v53 = vld [vmem:[#allocation2 + $0x53] sm:$0xff] }
  0x8d   :  { %v748_v35 = vld [vmem:[#allocation2 + $0x3b] sm:$0xff]  ;;  %v749_v36 = vld [vmem:[#allocation2 + $0x43] sm:$0xff]  ;;  %v8478_v41 = vpack.c.bf16 %v1200_v33, %v1200_v33  ;;  %v1051_v45 = vld [vmem:[#allocation2 + $0x4c] sm:$0xff]  ;;  %1175 = vst [vmem:[#allocation3 + $0xcc] sm:$0xf] %v8453_v32  ;;  %v7806_v48 = vcombine.high %v1618_v40, %v1618_v40  ;;  %v8407_v57 = vpack.c.bf16 %v751_v53, %v751_v53  ;;  %v7805_v62 = vcombine.low %v1618_v40, %v1618_v40 }
  0x8e   :  { %v8404_v42 = vpack.c.bf16 %v748_v35, %v748_v35  ;;  %v8405_v43 = vpack.c.bf16 %v749_v36, %v749_v36  ;;  %1025 = vst [vmem:[#allocation3 + $0xec] sm:$0xf] %v8453_v32  ;;  %v8455_v46 = vpack.c.bf16 %v1051_v45, %v1051_v45  ;;  %v1201_v39 = vld [vmem:[#allocation2 + $0x45] sm:$0xff]  ;;  %1026 = vst [vmem:[#allocation3 + $0x110] sm:$0xf] %v8430_v37  ;;  %v902_v54 = vld [vmem:[#allocation2 + $0x54] sm:$0xff] }
  0x8f   :  { %1326 = vst [vmem:[#allocation3 + $0xd0] sm:$0xf] %v8478_v41  ;;  %v8479_v49 = vpack.c.bf16 %v1201_v39, %v1201_v39  ;;  %1176 = vst [vmem:[#allocation3 + $0xf0] sm:$0xf] %v8430_v37  ;;  %v750_v51 = vld [vmem:[#allocation2 + $0x4b] sm:$0xff]  ;;  %v1053_v55 = vld [vmem:[#allocation2 + $0x5c] sm:$0xff]  ;;  %v8432_v58 = vpack.c.bf16 %v902_v54, %v902_v54 }
  0x90   :  { %874 = vst [vmem:[#allocation3 + $0xe8] sm:$0xf] %v8404_v42  ;;  %875 = vst [vmem:[#allocation3 + $0x10c] sm:$0xf] %v8405_v43  ;;  %v8406_v52 = vpack.c.bf16 %v750_v51, %v750_v51  ;;  %v8457_v59 = vpack.c.bf16 %v1053_v55, %v1053_v55  ;;  %v1203_v60 = vld [vmem:[#allocation2 + $0x55] sm:$0xff]  ;;  %v1204_v61 = vld [vmem:[#allocation2 + $0x5d] sm:$0xff] }
  0x91   :  { %2895 = vmatmul.mubr.bf16.gmra.mxu0 %v7785_v6  ;;  %1177 = vst [vmem:[#allocation3 + $0x114] sm:$0xf] %v8455_v46  ;;  %1027 = vst [vmem:[#allocation3 + $0x134] sm:$0xf] %v8455_v46  ;;  %v9816_v63 = vld [vmem:[#allocation3 + $0x14] ss:$36 sps:$4 sm:$0xff]   ;;  %v8481_v0 = vpack.c.bf16 %v1203_v60, %v1203_v60 }
  0x92   :  { %3031 = vmatmul.mubr.bf16.gmra.mxu1 %v9793_v2  ;;  %2902 = vmatprep.mubr.bf16.mxu0 %v9797_v3  ;;  %1327 = vst [vmem:[#allocation3 + $0xf4] sm:$0xf] %v8479_v49  ;;  %876 = vst [vmem:[#allocation3 + $0x130] sm:$0xf] %v8406_v52  ;;  %v8482_v2 = vpack.c.bf16 %v1204_v61, %v1204_v61  ;;  %v9820_v3 = vld [vmem:[#allocation3 + $0x1c] ss:$36 sps:$4 sm:$0xff]  }
  0x93   :  { %3038 = vmatprep.mubr.bf16.mxu1 %v9799_v16  ;;  %877 = vst [vmem:[#allocation3 + $0x154] sm:$0xf] %v8407_v57  ;;  %1028 = vst [vmem:[#allocation3 + $0x158] sm:$0xf] %v8432_v58  ;;  %v752_v4 = vld [vmem:[#allocation2 + $0x5b] sm:$0xff]  ;;  %v753_v5 = vld [vmem:[#allocation2 + $0x63] sm:$0xff] }
  0x94   :  { %1178 = vst [vmem:[#allocation3 + $0x138] sm:$0xf] %v8432_v58  ;;  %1179 = vst [vmem:[#allocation3 + $0x15c] sm:$0xf] %v8457_v59  ;;  %v8408_v6 = vpack.c.bf16 %v752_v4, %v752_v4  ;;  %v904_v7 = vld [vmem:[#allocation2 + $0x64] sm:$0xff]  ;;  %v8409_v9 = vpack.c.bf16 %v753_v5, %v753_v5  ;;  %v1055_v11 = vld [vmem:[#allocation2 + $0x6c] sm:$0xff] }
  0x95   :  { %1029 = vst [vmem:[#allocation3 + $0x17c] sm:$0xf] %v8457_v59  ;;  %1329 = vst [vmem:[#allocation3 + $0x13c] sm:$0xf] %v8481_v0  ;;  %v9819_v8 = vld [vmem:[#allocation3 + $0x10] ss:$36 sps:$4 sm:$0xff]   ;;  %v8434_v10 = vpack.c.bf16 %v904_v7, %v904_v7  ;;  %v8459_v13 = vpack.c.bf16 %v1055_v11, %v1055_v11 }
  0x96   :  { %1330 = vst [vmem:[#allocation3 + $0x160] sm:$0xf] %v8482_v2  ;;  %v9822_v12 = vld [vmem:[#allocation4 + $0x238] sm:$0xff]   ;;  %878 = vst [vmem:[#allocation3 + $0x178] sm:$0xf] %v8408_v6  ;;  %v1205_v14 = vld [vmem:[#allocation2 + $0x65] sm:$0xff] }
  0x97   :  { %v1206_v15 = vld [vmem:[#allocation2 + $0x6d] sm:$0xff]  ;;  %879 = vst [vmem:[#allocation3 + $0x19c] sm:$0xf] %v8409_v9  ;;  %1030 = vst [vmem:[#allocation3 + $0x1a0] sm:$0xf] %v8434_v10  ;;  %v8483_v16 = vpack.c.bf16 %v1205_v14, %v1205_v14  ;;  %v1057_v28 = vld [vmem:[#allocation2 + $0x7c] sm:$0xff] }
  0x98   :  { %1180 = vst [vmem:[#allocation3 + $0x180] sm:$0xf] %v8434_v10  ;;  %v8484_v17 = vpack.c.bf16 %v1206_v15, %v1206_v15  ;;  %v754_v18 = vld [vmem:[#allocation2 + $0x6b] sm:$0xff]  ;;  %v755_v19 = vld [vmem:[#allocation2 + $0x73] sm:$0xff]  ;;  %v9824_v22 = vld [vmem:[#allocation3 + $0x5c] ss:$36 sps:$4 sm:$0xff]   ;;  %v8461_v30 = vpack.c.bf16 %v1057_v28, %v1057_v28 }
  0x99   :  { %2903 = vmatmul.mubr.bf16.gmra.mxu0 %v7794_v38  ;;  %v906_v20 = vld [vmem:[#allocation2 + $0x74] sm:$0xff]  ;;  %1181 = vst [vmem:[#allocation3 + $0x1a4] sm:$0xf] %v8459_v13  ;;  %v8410_v23 = vpack.c.bf16 %v754_v18, %v754_v18  ;;  %v8411_v24 = vpack.c.bf16 %v755_v19, %v755_v19  ;;  %1031 = vst [vmem:[#allocation3 + $0x1c4] sm:$0xf] %v8459_v13  ;;  %v757_v36 = vld [vmem:[#allocation2 + $0x83] sm:$0xff] }
  0x9a   :  { %3039 = vmatmul.mubr.bf16.gmra.mxu1 %v9802_v31  ;;  %2910 = vmatprep.mubr.bf16.mxu0 %v7804_v1  ;;  %v9823_v21 = vld [vmem:[#allocation3 + $0x18] ss:$36 sps:$4 sm:$0xff]   ;;  %v8436_v26 = vpack.c.bf16 %v906_v20, %v906_v20  ;;  %v9827_v27 = vld [vmem:[#allocation3 + $0x64] ss:$36 sps:$4 sm:$0xff]   ;;  %1331 = vst [vmem:[#allocation3 + $0x184] sm:$0xf] %v8483_v16  ;;  %v8413_v40 = vpack.c.bf16 %v757_v36, %v757_v36 }
  0x9b   :  { %3046 = vmatprep.mubr.bf16.mxu1 %v7806_v48  ;;  %1332 = vst [vmem:[#allocation3 + $0x1a8] sm:$0xf] %v8484_v17  ;;  %880 = vst [vmem:[#allocation3 + $0x1c0] sm:$0xf] %v8410_v23  ;;  %v1207_v29 = vld [vmem:[#allocation2 + $0x75] sm:$0xff]  ;;  %v1208_v31 = vld [vmem:[#allocation2 + $0x7d] sm:$0xff] }
  0x9c   :  { %881 = vst [vmem:[#allocation3 + $0x1e4] sm:$0xf] %v8411_v24  ;;  %1032 = vst [vmem:[#allocation3 + $0x1e8] sm:$0xf] %v8436_v26  ;;  %v8485_v32 = vpack.c.bf16 %v1207_v29, %v1207_v29  ;;  %v9830_v33 = vld [vmem:[#allocation4 + $0x230] sm:$0xff]   ;;  %v8486_v34 = vpack.c.bf16 %v1208_v31, %v1208_v31  ;;  %v908_v41 = vld [vmem:[#allocation2 + $0x84] sm:$0xff] }
  0x9d   :  { %1182 = vst [vmem:[#allocation3 + $0x1c8] sm:$0xf] %v8436_v26  ;;  %v756_v35 = vld [vmem:[#allocation2 + $0x7b] sm:$0xff]  ;;  %1183 = vst [vmem:[#allocation3 + $0x1ec] sm:$0xf] %v8461_v30  ;;  %v1059_v42 = vld [vmem:[#allocation2 + $0x8c] sm:$0xff]  ;;  %v8438_v45 = vpack.c.bf16 %v908_v41, %v908_v41 }
  0x9e   :  { %1333 = vst [vmem:[#allocation3 + $0x1cc] sm:$0xf] %v8485_v32  ;;  %v8412_v38 = vpack.c.bf16 %v756_v35, %v756_v35  ;;  %1033 = vst [vmem:[#allocation3 + $0x20c] sm:$0xf] %v8461_v30  ;;  %v9826_v43 = vld [vmem:[#allocation3 + $0x58] ss:$36 sps:$4 sm:$0xff]   ;;  %v8463_v1 = vpack.c.bf16 %v1059_v42, %v1059_v42 }
  0x9f   :  { %v9829_v44 = vld [vmem:[#allocation3 + $0x60] ss:$36 sps:$4 sm:$0xff]   ;;  %1334 = vst [vmem:[#allocation3 + $0x1f0] sm:$0xf] %v8486_v34  ;;  %v9843_v37 = vld [vmem:[#allocation4 + $0x228] sm:$0xff]   ;;  %v910_v55 = vld [vmem:[#allocation2 + $0x94] sm:$0xff] }
  0xa0   :  { %882 = vst [vmem:[#allocation3 + $0x208] sm:$0xf] %v8412_v38  ;;  %883 = vst [vmem:[#allocation3 + $0x22c] sm:$0xf] %v8413_v40  ;;  %v1209_v46 = vld [vmem:[#allocation2 + $0x85] sm:$0xff]  ;;  %v1210_v39 = vld [vmem:[#allocation2 + $0x8d] sm:$0xff]  ;;  %v8440_v58 = vpack.c.bf16 %v910_v55, %v910_v55 }
  0xa1   :  { %2911 = vmatmul.mubr.bf16.gmra.mxu0 %v7803_v56  ;;  %v758_v47 = vld [vmem:[#allocation2 + $0x8b] sm:$0xff]  ;;  %1034 = vst [vmem:[#allocation3 + $0x230] sm:$0xf] %v8438_v45  ;;  %1184 = vst [vmem:[#allocation3 + $0x210] sm:$0xf] %v8438_v45  ;;  %v8487_v49 = vpack.c.bf16 %v1209_v46, %v1209_v46  ;;  %v8488_v50 = vpack.c.bf16 %v1210_v39, %v1210_v39  ;;  %v759_v53 = vld [vmem:[#allocation2 + $0x93] sm:$0xff] }
  0xa2   :  { %3047 = vmatmul.mubr.bf16.gmra.mxu1 %v7805_v62  ;;  %3086 = vmatprep.mubr.bf16.mxu0 %v9816_v63  ;;  %v9831_v48 = vld [vmem:[#allocation3 + $0xa4] ss:$36 sps:$4 sm:$0xff]   ;;  %1185 = vst [vmem:[#allocation3 + $0x234] sm:$0xf] %v8463_v1  ;;  %v8414_v51 = vpack.c.bf16 %v758_v47, %v758_v47  ;;  %1035 = vst [vmem:[#allocation3 + $0x254] sm:$0xf] %v8463_v1  ;;  %v8415_v54 = vpack.c.bf16 %v759_v53, %v759_v53 }
  0xa3   :  { %3222 = vmatprep.mubr.bf16.mxu1 %v9820_v3  ;;  %v9834_v52 = vld [vmem:[#allocation3 + $0xac] ss:$36 sps:$4 sm:$0xff]   ;;  %1335 = vst [vmem:[#allocation3 + $0x214] sm:$0xf] %v8487_v49  ;;  %1336 = vst [vmem:[#allocation3 + $0x238] sm:$0xf] %v8488_v50 }
  0xa4   :  { %884 = vst [vmem:[#allocation3 + $0x250] sm:$0xf] %v8414_v51  ;;  %v1061_v56 = vld [vmem:[#allocation2 + $0x9c] sm:$0xff]  ;;  %v9853_v63 = vld [vmem:[#allocation4 + $0x220] sm:$0xff]   ;;  %885 = vst [vmem:[#allocation3 + $0x274] sm:$0xf] %v8415_v54 }
  0xa5   :  { %v1211_v57 = vld [vmem:[#allocation2 + $0x95] sm:$0xff]  ;;  %v8465_v59 = vpack.c.bf16 %v1061_v56, %v1061_v56  ;;  %v1212_v60 = vld [vmem:[#allocation2 + $0x9d] sm:$0xff]  ;;  %v9836_v2 = vld [vmem:[#allocation3 + $0xa8] ss:$36 sps:$4 sm:$0xff]   ;;  %1036 = vst [vmem:[#allocation3 + $0x278] sm:$0xf] %v8440_v58 }
  0xa6   :  { %v8489_v61 = vpack.c.bf16 %v1211_v57, %v1211_v57  ;;  %v9833_v62 = vld [vmem:[#allocation3 + $0xa0] ss:$36 sps:$4 sm:$0xff]   ;;  %v8490_v0 = vpack.c.bf16 %v1212_v60, %v1212_v60  ;;  %1186 = vst [vmem:[#allocation3 + $0x258] sm:$0xf] %v8440_v58  ;;  %v9837_v3 = vld [vmem:[#allocation3 + $0xec] ss:$36 sps:$4 sm:$0xff]  }
  0xa7   :  { %1187 = vst [vmem:[#allocation3 + $0x27c] sm:$0xf] %v8465_v59  ;;  %1037 = vst [vmem:[#allocation3 + $0x29c] sm:$0xf] %v8465_v59  ;;  %v9840_v4 = vld [vmem:[#allocation3 + $0xf4] ss:$36 sps:$4 sm:$0xff]  }
  0xa8   :  { %1337 = vst [vmem:[#allocation3 + $0x25c] sm:$0xf] %v8489_v61  ;;  %1338 = vst [vmem:[#allocation3 + $0x280] sm:$0xf] %v8490_v0  ;;  %v760_v5 = vld [vmem:[#allocation2 + $0x9b] sm:$0xff]  ;;  %v761_v6 = vld [vmem:[#allocation2 + $0xa3] sm:$0xff] }
  0xa9   :  { %3087 = vmatmul.mubr.bf16.vlgmr.msra.gmra.mxu0 %v9819_v8  ;;  %v912_v7 = vld [vmem:[#allocation2 + $0xa4] sm:$0xff]  ;;  %v9863_v8 = vld [vmem:[#allocation4 + $0x218] sm:$0xff]   ;;  %v8416_v9 = vpack.c.bf16 %v760_v5, %v760_v5  ;;  %v8417_v10 = vpack.c.bf16 %v761_v6, %v761_v6  ;;  %v1214_v15 = vld [vmem:[#allocation2 + $0xad] sm:$0xff] }
  0xaa   :  { %9543 = vmatpush3.bf16.msra.mxu0 %v9822_v12  ;;  %3223 = vmatmul.mubr.bf16.vlgmr.msra.gmra.mxu1 %v9823_v21  ;;  %v8442_v11 = vpack.c.bf16 %v912_v7, %v912_v7  ;;  %v1063_v12 = vld [vmem:[#allocation2 + $0xac] sm:$0xff]  ;;  %v8492_v18 = vpack.c.bf16 %v1214_v15, %v1214_v15  ;;  %v914_v21 = vld [vmem:[#allocation2 + $0xb4] sm:$0xff]  ;;  %v9847_v29 = vld [vmem:[#allocation3 + $0x13c] ss:$36 sps:$4 sm:$0xff]  }
  0xab   :  { %3094 = vmatprep.mubr.bf16.mxu0 %v9824_v22  ;;  %3230 = vmatprep.mubr.bf16.mxu1 %v9827_v27  ;;  %886 = vst [vmem:[#allocation3 + $0x298] sm:$0xf] %v8416_v9  ;;  %887 = vst [vmem:[#allocation3 + $0x2bc] sm:$0xf] %v8417_v10  ;;  %v8467_v13 = vpack.c.bf16 %v1063_v12, %v1063_v12  ;;  %v1213_v14 = vld [vmem:[#allocation2 + $0xa5] sm:$0xff]  ;;  %v763_v19 = vld [vmem:[#allocation2 + $0xb3] sm:$0xff]  ;;  %v8444_v26 = vpack.c.bf16 %v914_v21, %v914_v21 }
  0xac   :  { %9544 = vmatprep.subr.bf16.mxu0 %v10376_v25  ;;  %1038 = vst [vmem:[#allocation3 + $0x2c0] sm:$0xf] %v8442_v11  ;;  %1188 = vst [vmem:[#allocation3 + $0x2a0] sm:$0xf] %v8442_v11  ;;  %v762_v16 = vld [vmem:[#allocation2 + $0xab] sm:$0xff]  ;;  %v8491_v17 = vpack.c.bf16 %v1213_v14, %v1213_v14  ;;  %v9876_v23 = vld [vmem:[#allocation4 + $0x210] sm:$0xff]   ;;  %v8419_v24 = vpack.c.bf16 %v763_v19, %v763_v19 }
  0xad   :  { %v8418_v20 = vpack.c.bf16 %v762_v16, %v762_v16  ;;  %v9839_v22 = vld [vmem:[#allocation3 + $0xe8] ss:$36 sps:$4 sm:$0xff]   ;;  %1189 = vst [vmem:[#allocation3 + $0x2c4] sm:$0xf] %v8467_v13  ;;  %1039 = vst [vmem:[#allocation3 + $0x2e4] sm:$0xf] %v8467_v13 }
  0xae   :  { %9545 = vmatpush3.bf16.msra.mxu0 %v9830_v33  ;;  %v9842_v27 = vld [vmem:[#allocation3 + $0xf0] ss:$36 sps:$4 sm:$0xff]   ;;  %1339 = vst [vmem:[#allocation3 + $0x2a4] sm:$0xf] %v8491_v17  ;;  %1340 = vst [vmem:[#allocation3 + $0x2c8] sm:$0xf] %v8492_v18 }
  0xaf   :  { %9546 = vmatprep.subr.bf16.mxu0 %v10376_v25  ;;  %v9844_v28 = vld [vmem:[#allocation3 + $0x134] ss:$36 sps:$4 sm:$0xff]   ;;  %888 = vst [vmem:[#allocation3 + $0x2e0] sm:$0xf] %v8418_v20  ;;  %889 = vst [vmem:[#allocation3 + $0x304] sm:$0xf] %v8419_v24 }
  0xb0   :  { %1040 = vst [vmem:[#allocation3 + $0x308] sm:$0xf] %v8444_v26  ;;  %v9885_v30 = vld [vmem:[#allocation4 + $0x208] sm:$0xff]   ;;  %1190 = vst [vmem:[#allocation3 + $0x2e8] sm:$0xf] %v8444_v26  ;;  %v1065_v31 = vld [vmem:[#allocation2 + $0xbc] sm:$0xff] }
  0xb1   :  { %3095 = vmatmul.mubr.bf16.gmra.mxu0 %v9826_v43  ;;  %v1215_v32 = vld [vmem:[#allocation2 + $0xb5] sm:$0xff]  ;;  %v1216_v33 = vld [vmem:[#allocation2 + $0xbd] sm:$0xff]  ;;  %v8469_v34 = vpack.c.bf16 %v1065_v31, %v1065_v31  ;;  %v1067_v45 = vld [vmem:[#allocation2 + $0xcc] sm:$0xff] }
  0xb2   :  { %3231 = vmatmul.mubr.bf16.gmra.mxu1 %v9829_v44  ;;  %3102 = vmatprep.mubr.bf16.mxu0 %v9831_v48  ;;  %v8493_v35 = vpack.c.bf16 %v1215_v32, %v1215_v32  ;;  %v8494_v36 = vpack.c.bf16 %v1216_v33, %v1216_v33  ;;  %v764_v38 = vld [vmem:[#allocation2 + $0xbb] sm:$0xff]  ;;  %v765_v40 = vld [vmem:[#allocation2 + $0xc3] sm:$0xff]  ;;  %v1218_v46 = vld [vmem:[#allocation2 + $0xcd] sm:$0xff] }
  0xb3   :  { %3238 = vmatprep.mubr.bf16.mxu1 %v9834_v52  ;;  %9547 = vmatpush3.bf16.msra.mxu0 %v9843_v37  ;;  %v916_v41 = vld [vmem:[#allocation2 + $0xc4] sm:$0xff]  ;;  %v8420_v42 = vpack.c.bf16 %v764_v38, %v764_v38  ;;  %v8421_v43 = vpack.c.bf16 %v765_v40, %v765_v40  ;;  %1191 = vst [vmem:[#allocation3 + $0x30c] sm:$0xf] %v8469_v34  ;;  %1041 = vst [vmem:[#allocation3 + $0x32c] sm:$0xf] %v8469_v34  ;;  %v1068_v54 = vld [vmem:[#allocation2 + $0xd4] sm:$0xff] }
  0xb4   :  { %9548 = vmatprep.subr.bf16.mxu0 %v10376_v25  ;;  %v8446_v44 = vpack.c.bf16 %v916_v41, %v916_v41  ;;  %1341 = vst [vmem:[#allocation3 + $0x2ec] sm:$0xf] %v8493_v35  ;;  %1342 = vst [vmem:[#allocation3 + $0x310] sm:$0xf] %v8494_v36  ;;  %v1217_v1 = vld [vmem:[#allocation2 + $0xc5] sm:$0xff]  ;;  %v8471_v37 = vpack.c.bf16 %v1067_v45, %v1067_v45  ;;  %v8496_v48 = vpack.c.bf16 %v1218_v46, %v1218_v46  ;;  %v1219_v55 = vld [vmem:[#allocation2 + $0xd5] sm:$0xff] }
  0xb5   :  { %890 = vst [vmem:[#allocation3 + $0x328] sm:$0xf] %v8420_v42  ;;  %891 = vst [vmem:[#allocation3 + $0x34c] sm:$0xf] %v8421_v43  ;;  %v8495_v39 = vpack.c.bf16 %v1217_v1, %v1217_v1  ;;  %v9846_v47 = vld [vmem:[#allocation3 + $0x130] ss:$36 sps:$4 sm:$0xff]   ;;  %v8472_v57 = vpack.c.bf16 %v1068_v54, %v1068_v54  ;;  %v8497_v58 = vpack.c.bf16 %v1219_v55, %v1219_v55 }
  0xb6   :  { %1042 = vst [vmem:[#allocation3 + $0x350] sm:$0xf] %v8446_v44  ;;  %1192 = vst [vmem:[#allocation3 + $0x330] sm:$0xf] %v8446_v44  ;;  %v9849_v49 = vld [vmem:[#allocation3 + $0x138] ss:$36 sps:$4 sm:$0xff]  }
  0xb7   :  { %9549 = vmatpush3.bf16.msra.mxu0 %v9853_v63  ;;  %1193 = vst [vmem:[#allocation3 + $0x354] sm:$0xf] %v8471_v37  ;;  %1343 = vst [vmem:[#allocation3 + $0x334] sm:$0xf] %v8495_v39  ;;  %v9850_v50 = vld [vmem:[#allocation3 + $0x17c] ss:$36 sps:$4 sm:$0xff]  }
  0xb8   :  { %9550 = vmatprep.subr.bf16.mxu0 %v10376_v25  ;;  %1043 = vst [vmem:[#allocation3 + $0x374] sm:$0xf] %v8471_v37  ;;  %v9854_v51 = vld [vmem:[#allocation3 + $0x184] ss:$36 sps:$4 sm:$0xff]   ;;  %1344 = vst [vmem:[#allocation3 + $0x358] sm:$0xf] %v8496_v48 }
  0xb9   :  { %3103 = vmatmul.mubr.bf16.gmra.mxu0 %v9833_v62  ;;  %v9896_v52 = vld [vmem:[#allocation4 + $0x200] sm:$0xff]   ;;  %v1346_v59 = vld [vmem:[#allocation2 + $0x16] sm:$0xff]  ;;  %1194 = vst [vmem:[#allocation3 + $0x378] sm:$0xf] %v8472_v57  ;;  %1345 = vst [vmem:[#allocation3 + $0x37c] sm:$0xf] %v8497_v58 }
  0xba   :  { %3239 = vmatmul.mubr.bf16.gmra.mxu1 %v9836_v2  ;;  %3110 = vmatprep.mubr.bf16.mxu0 %v9837_v3  ;;  %v766_v53 = vld [vmem:[#allocation2 + $0xcb] sm:$0xff]  ;;  %v1347_v60 = vld [vmem:[#allocation2 + $0x1e] sm:$0xff]  ;;  %v8498_v62 = vpack.c.bf16 %v1346_v59, %v1346_v59  ;;  %v1354_v13 = vld [vmem:[#allocation2 + $0x56] sm:$0xff] }
  0xbb   :  { %3246 = vmatprep.mubr.bf16.mxu1 %v9840_v4  ;;  %9551 = vmatpush3.bf16.msra.mxu0 %v9863_v8  ;;  %v8422_v56 = vpack.c.bf16 %v766_v53, %v766_v53  ;;  %v1348_v61 = vld [vmem:[#allocation2 + $0x26] sm:$0xff]  ;;  %v8499_v63 = vpack.c.bf16 %v1347_v60, %v1347_v60  ;;  %v9852_v2 = vld [vmem:[#allocation3 + $0x178] ss:$36 sps:$4 sm:$0xff]   ;;  %v1353_v12 = vld [vmem:[#allocation2 + $0x4e] sm:$0xff]  ;;  %v8506_v17 = vpack.c.bf16 %v1354_v13, %v1354_v13 }
  0xbc   :  { %9552 = vmatprep.subr.bf16.mxu0 %v10376_v25  ;;  %v8500_v0 = vpack.c.bf16 %v1348_v61, %v1348_v61  ;;  %1472 = vst [vmem:[#allocation3 + $0x20] sm:$0xf] %v8498_v62  ;;  %v1350_v4 = vld [vmem:[#allocation2 + $0x36] sm:$0xff]  ;;  %v1351_v5 = vld [vmem:[#allocation2 + $0x3e] sm:$0xff]  ;;  %v9860_v10 = vld [vmem:[#allocation3 + $0x1cc] ss:$36 sps:$4 sm:$0xff]   ;;  %v8505_v15 = vpack.c.bf16 %v1353_v12, %v1353_v12 }
  0xbd   :  { %892 = vst [vmem:[#allocation3 + $0x370] sm:$0xf] %v8422_v56  ;;  %1473 = vst [vmem:[#allocation3 + $0x44] sm:$0xf] %v8499_v63  ;;  %v9856_v6 = vld [vmem:[#allocation3 + $0x180] ss:$36 sps:$4 sm:$0xff]   ;;  %v8502_v8 = vpack.c.bf16 %v1350_v4, %v1350_v4  ;;  %v8503_v9 = vpack.c.bf16 %v1351_v5, %v1351_v5 }
  0xbe   :  { %1474 = vst [vmem:[#allocation3 + $0x68] sm:$0xf] %v8500_v0  ;;  %v9857_v7 = vld [vmem:[#allocation3 + $0x1c4] ss:$36 sps:$4 sm:$0xff]   ;;  %v1357_v19 = vld [vmem:[#allocation2 + $0x6e] sm:$0xff]  ;;  %v1362_v33 = vld [vmem:[#allocation2 + $0x96] sm:$0xff] }
  0xbf   :  { %9553 = vmatpush3.bf16.msra.mxu0 %v9876_v23  ;;  %v1352_v11 = vld [vmem:[#allocation2 + $0x46] sm:$0xff]  ;;  %1476 = vst [vmem:[#allocation3 + $0xb0] sm:$0xf] %v8502_v8  ;;  %1477 = vst [vmem:[#allocation3 + $0xd4] sm:$0xf] %v8503_v9  ;;  %v1355_v16 = vld [vmem:[#allocation2 + $0x5e] sm:$0xff]  ;;  %v8514_v36 = vpack.c.bf16 %v1362_v33, %v1362_v33 }
  0xc0   :  { %9554 = vmatprep.subr.bf16.mxu0 %v10376_v25  ;;  %v8504_v14 = vpack.c.bf16 %v1352_v11, %v1352_v11  ;;  %v1356_v18 = vld [vmem:[#allocation2 + $0x66] sm:$0xff]  ;;  %v8507_v20 = vpack.c.bf16 %v1355_v16, %v1355_v16  ;;  %v1358_v23 = vld [vmem:[#allocation2 + $0x76] sm:$0xff]  ;;  %v1359_v24 = vld [vmem:[#allocation2 + $0x7e] sm:$0xff]  ;;  %1479 = vst [vmem:[#allocation3 + $0x11c] sm:$0xf] %v8505_v15 }
  0xc1   :  { %3111 = vmatmul.mubr.bf16.gmra.mxu0 %v9839_v22  ;;  %v8508_v21 = vpack.c.bf16 %v1356_v18, %v1356_v18  ;;  %v8509_v22 = vpack.c.bf16 %v1357_v19, %v1357_v19  ;;  %v1360_v26 = vld [vmem:[#allocation2 + $0x86] sm:$0xff]  ;;  %1480 = vst [vmem:[#allocation3 + $0x140] sm:$0xf] %v8506_v17  ;;  %v1363_v34 = vld [vmem:[#allocation2 + $0x9e] sm:$0xff]  ;;  %v1365_v41 = vld [vmem:[#allocation2 + $0xae] sm:$0xff] }
  0xc2   :  { %3247 = vmatmul.mubr.bf16.gmra.mxu1 %v9842_v27  ;;  %3118 = vmatprep.mubr.bf16.mxu0 %v9844_v28  ;;  %v10395_v27 = vld [vmem:[#allocation3 + $0x378] sm:$0xff]  ;;  %1478 = vst [vmem:[#allocation3 + $0xf8] sm:$0xf] %v8504_v14  ;;  %v8510_v28 = vpack.c.bf16 %v1358_v23, %v1358_v23  ;;  %v8512_v31 = vpack.c.bf16 %v1360_v26, %v1360_v26  ;;  %1481 = vst [vmem:[#allocation3 + $0x164] sm:$0xf] %v8507_v20  ;;  %v1364_v40 = vld [vmem:[#allocation2 + $0xa6] sm:$0xff] }
  0xc3   :  { %3254 = vmatprep.mubr.bf16.mxu1 %v9847_v29  ;;  %9555 = vmatpush3.bf16.msra.mxu0 %v9885_v30  ;;  %v8511_v29 = vpack.c.bf16 %v1359_v24, %v1359_v24  ;;  %v1361_v30 = vld [vmem:[#allocation2 + $0x8e] sm:$0xff]  ;;  %4901 = vst [vmem:[#allocation3 + $0x378] sm:$0xf] %v8472_v57  ;;  %5052 = vst [vmem:[#allocation3 + $0x37c] sm:$0xf] %v8497_v58  ;;  %v8515_v38 = vpack.c.bf16 %v1363_v34, %v1363_v34  ;;  %v59_v1 = vld [vmem:[%s11370_s1] sm:$0xff] }
  0xc4   :  { %9556 = vmatprep.subr.bf16.mxu0 %v10376_v25  ;;  %v1349_v25 = vld [vmem:[#allocation2 + $0x2e] sm:$0xff]  ;;  %1482 = vst [vmem:[#allocation3 + $0x188] sm:$0xf] %v8508_v21  ;;  %1483 = vst [vmem:[#allocation3 + $0x1ac] sm:$0xf] %v8509_v22  ;;  %v8513_v32 = vpack.c.bf16 %v1361_v30, %v1361_v30  ;;  %v8516_v43 = vpack.c.bf16 %v1364_v40, %v1364_v40  ;;  %v8517_v44 = vpack.c.bf16 %v1365_v41, %v1365_v41  ;;  %v1366_v37 = vld [vmem:[#allocation2 + $0xb6] sm:$0xff] }
  0xc5   :  { %v8501_v3 = vpack.c.bf16 %v1349_v25, %v1349_v25  ;;  %1484 = vst [vmem:[#allocation3 + $0x1d0] sm:$0xf] %v8510_v28  ;;  %1485 = vst [vmem:[#allocation3 + $0x1f4] sm:$0xf] %v8511_v29  ;;  %v9859_v35 = vld [vmem:[#allocation3 + $0x1c0] ss:$36 sps:$4 sm:$0xff]   ;;  %v8518_v48 = vpack.c.bf16 %v1366_v37, %v1366_v37  ;;  %v7810_v34 = vcombine.high %v10395_v27, %v10395_v27 }
  0xc6   :  { %1486 = vst [vmem:[#allocation3 + $0x218] sm:$0xf] %v8512_v31  ;;  %v9862_v42 = vld [vmem:[#allocation3 + $0x1c8] ss:$36 sps:$4 sm:$0xff]   ;;  %1487 = vst [vmem:[#allocation3 + $0x23c] sm:$0xf] %v8513_v32 }
  0xc7   :  { %9557 = vmatpush3.bf16.msra.mxu0 %v9896_v52  ;;  %1475 = vst [vmem:[#allocation3 + $0x8c] sm:$0xf] %v8501_v3  ;;  %v9864_v45 = vld [vmem:[#allocation3 + $0x20c] ss:$36 sps:$4 sm:$0xff]   ;;  %1488 = vst [vmem:[#allocation3 + $0x260] sm:$0xf] %v8514_v36 }
  0xc8   :  { %1489 = vst [vmem:[#allocation3 + $0x284] sm:$0xf] %v8515_v38  ;;  %1490 = vst [vmem:[#allocation3 + $0x2a8] sm:$0xf] %v8516_v43  ;;  %v1367_v46 = vld [vmem:[#allocation2 + $0xbe] sm:$0xff]  ;;  %v60_v54 = vld [vmem:[%s11370_s1 + $0x8] sm:$0xff] }
  0xc9   :  { %3119 = vmatmul.mubr.bf16.gmra.mxu0 %v9846_v47  ;;  %1491 = vst [vmem:[#allocation3 + $0x2cc] sm:$0xf] %v8517_v44  ;;  %v9867_v39 = vld [vmem:[#allocation3 + $0x214] ss:$36 sps:$4 sm:$0xff]   ;;  %v10229_v47 = vmov 0   ;;  %v1368_v56 = vld [vmem:[#allocation2 + $0xc6] sm:$0xff] }
  0xca   :  { %3255 = vmatmul.mubr.bf16.gmra.mxu1 %v9849_v49  ;;  %3126 = vmatprep.mubr.bf16.mxu0 %v9850_v50  ;;  %v8519_v49 = vpack.c.bf16 %v1367_v46, %v1367_v46  ;;  %1492 = vst [vmem:[#allocation3 + $0x2f0] sm:$0xf] %v8518_v48  ;;  %v9866_v50 = vld [vmem:[#allocation3 + $0x208] ss:$36 sps:$4 sm:$0xff]   ;;  %v9870_v52 = vld [vmem:[#allocation3 + $0x254] ss:$36 sps:$4 sm:$0xff]   ;;  %v8520_v59 = vpack.c.bf16 %v1368_v56, %v1368_v56 }
  0xcb   :  { %3262 = vmatprep.mubr.bf16.mxu1 %v9854_v51  ;;  %9688 = vset.pattern.permute.xlu0 %v10229_v47  ;;  %v9869_v51 = vld [vmem:[#allocation3 + $0x210] ss:$36 sps:$4 sm:$0xff]   ;;  %v9873_v53 = vld [vmem:[#allocation3 + $0x25c] ss:$36 sps:$4 sm:$0xff]   ;;  %v64_v3 = vld [vmem:[%s11370_s1 + $0x28] sm:$0xff]  ;;  %v7809_v46 = vcombine.low %v10395_v27, %v10395_v27 }
  0xcc   :  { %9689 = vset.pattern.permute.xlu1 %v10229_v47  ;;  %3464 = vperm.xlu0 %9688, %v59_v1   ;;  %1493 = vst [vmem:[#allocation3 + $0x314] sm:$0xf] %v8519_v49  ;;  %v61_v55 = vld [vmem:[%s11370_s1 + $0x10] sm:$0xff]  ;;  %v63_v58 = vld [vmem:[%s11370_s1 + $0x20] sm:$0xff]  ;;  %v62_v61 = vld [vmem:[%s11370_s1 + $0x18] sm:$0xff] }
  0xcd   :  { %3474 = vperm.xlu1 %9689, %v61_v55   ;;  %v1369_v57 = vld [vmem:[#allocation2 + $0xce] sm:$0xff]  ;;  %1494 = vst [vmem:[#allocation3 + $0x338] sm:$0xf] %v8520_v59  ;;  %v9875_v0 = vld [vmem:[#allocation3 + $0x258] ss:$36 sps:$4 sm:$0xff]   ;;  %v67_v4 = vld [vmem:[%s11370_s1 + $0x40] sm:$0xff] }
  0xce   :  { %v8521_v60 = vpack.c.bf16 %v1369_v57, %v1369_v57  ;;  %v65_v62 = vld [vmem:[%s11370_s1 + $0x30] sm:$0xff]  ;;  %v9877_v25 = vld [vmem:[#allocation3 + $0x29c] ss:$36 sps:$4 sm:$0xff]   ;;  %v9883_v11 = vld [vmem:[#allocation3 + $0x2e4] ss:$36 sps:$4 sm:$0xff]  }
  0xcf   :  { %v9872_v63 = vld [vmem:[#allocation3 + $0x250] ss:$36 sps:$4 sm:$0xff]   ;;  %v9879_v9 = vld [vmem:[#allocation3 + $0x298] ss:$36 sps:$4 sm:$0xff]   ;;  %v68_v13 = vld [vmem:[%s11370_s1 + $0x48] sm:$0xff] }
  0xd0   :  { %3469 = vperm.xlu0 %9688, %v60_v54   ;;  %1495 = vst [vmem:[#allocation3 + $0x35c] sm:$0xf] %v8521_v60  ;;  %v1370_v5 = vld [vmem:[#allocation2 + $0xd6] sm:$0xff]  ;;  %v9887_v12 = vld [vmem:[#allocation3 + $0x2ec] ss:$36 sps:$4 sm:$0xff]   ;;  %v71_v14 = vld [vmem:[%s11370_s1 + $0x60] sm:$0xff] }
  0xd1   :  { %3127 = vmatmul.mubr.bf16.gmra.mxu0 %v9852_v2  ;;  %3479 = vperm.xlu1 %9689, %v62_v61   ;;  %v9880_v2 = vld [vmem:[#allocation3 + $0x2a4] ss:$36 sps:$4 sm:$0xff]   ;;  %v69_v8 = vld [vmem:[%s11370_s1 + $0x50] sm:$0xff]  ;;  %v70_v16 = vld [vmem:[%s11370_s1 + $0x58] sm:$0xff] }
  0xd2   :  { %3263 = vmatmul.mubr.bf16.gmra.mxu1 %v9856_v6  ;;  %3134 = vmatprep.mubr.bf16.mxu0 %v9857_v7  ;;  %v8522_v6 = vpack.c.bf16 %v1370_v5, %v1370_v5  ;;  %v66_v7 = vld [vmem:[%s11370_s1 + $0x38] sm:$0xff]  ;;  %v73_v17 = vld [vmem:[%s11370_s1 + $0x70] sm:$0xff]  ;;  %v9886_v18 = vld [vmem:[#allocation3 + $0x2e0] ss:$36 sps:$4 sm:$0xff]  }
  0xd3   :  { %3270 = vmatprep.mubr.bf16.mxu1 %v9860_v10  ;;  %v9882_v10 = vld [vmem:[#allocation3 + $0x2a0] ss:$36 sps:$4 sm:$0xff]   ;;  %v9889_v19 = vld [vmem:[#allocation3 + $0x2e8] ss:$36 sps:$4 sm:$0xff]   ;;  %v9893_v21 = vld [vmem:[#allocation3 + $0x334] ss:$36 sps:$4 sm:$0xff]  }
  0xd4   :  { %3484 = vperm.xlu0 %9688, %v63_v58   ;;  %1496 = vst [vmem:[#allocation3 + $0x380] sm:$0xf] %v8522_v6  ;;  %v9890_v20 = vld [vmem:[#allocation3 + $0x32c] ss:$36 sps:$4 sm:$0xff]   ;;  %v75_v23 = vld [vmem:[%s11370_s1 + $0x80] sm:$0xff]  ;;  %v74_v26 = vld [vmem:[%s11370_s1 + $0x78] sm:$0xff] }
  0xd5   :  { %3489 = vperm.xlu1 %9689, %v64_v3   ;;  %v72_v22 = vld [vmem:[%s11370_s1 + $0x68] sm:$0xff]  ;;  %v1619_v24 = vld [vmem:[#allocation3 + $0x370] sm:$0xff]  ;;  %v79_v33 = vld [vmem:[%s11370_s1 + $0xa0] sm:$0xff] }
  0xd6   :  { %v77_v28 = vld [vmem:[%s11370_s1 + $0x90] sm:$0xff]  ;;  %v9892_v29 = vld [vmem:[#allocation3 + $0x328] ss:$36 sps:$4 sm:$0xff]   ;;  %v7808_v31 = vcombine.high %v1619_v24, %v1619_v24  ;;  %v78_v38 = vld [vmem:[%s11370_s1 + $0x98] sm:$0xff]  ;;  %v7807_v1 = vcombine.low %v1619_v24, %v1619_v24 }
  0xd7   :  { %v9895_v30 = vld [vmem:[#allocation3 + $0x330] ss:$36 sps:$4 sm:$0xff]   ;;  %v76_v32 = vld [vmem:[%s11370_s1 + $0x88] sm:$0xff]  ;;  %v83_v47 = vld [vmem:[%s11370_s1 + $0xc0] sm:$0xff] }
  0xd8   :  { %3494 = vperm.xlu0 %9688, %v65_v62   ;;  %v81_v40 = vld [vmem:[%s11370_s1 + $0xb0] sm:$0xff]  ;;  %v10477_v27 = vld [vmem:[#allocation2] sm:$0xff]  ;;  %v82_v55 = vld [vmem:[%s11370_s1 + $0xb8] sm:$0xff] }
  0xd9   :  { %3135 = vmatmul.mubr.bf16.gmra.mxu0 %v9859_v35  ;;  %3499 = vperm.xlu1 %9689, %v66_v7   ;;  %v9900_v58 = vld [vmem:[#allocation3 + $0x20] ss:$36 sps:$4 sm:$0xff]  }
  0xda   :  { %3271 = vmatmul.mubr.bf16.gmra.mxu1 %v9862_v42  ;;  %3142 = vmatprep.mubr.bf16.mxu0 %v9864_v45 }
  0xdb   :  { %3278 = vmatprep.mubr.bf16.mxu1 %v9867_v39  ;;  %v10433_v15 = vld [vmem:[#allocation3 + $0x380] ss:$0 sps:$4 sm:$0xff]   ;;  %v80_v39 = vld [vmem:[%s11370_s1 + $0xa8] sm:$0xff] }
  0xdc   :  { %3504 = vperm.xlu0 %9688, %v67_v4   ;;  %5203 = vst [vmem:[#allocation3 + $0x380] sm:$0xf] %v8522_v6 }
  0xdd   :  { %3509 = vperm.xlu1 %9689, %v68_v13  }
  0xe0   :  { %3514 = vperm.xlu0 %9688, %v69_v8  }
  0xe1   :  { %3143 = vmatmul.mubr.bf16.gmra.mxu0 %v9866_v50  ;;  %3519 = vperm.xlu1 %9689, %v70_v16  }
  0xe2   :  { %3279 = vmatmul.mubr.bf16.gmra.mxu1 %v9869_v51  ;;  %3150 = vmatprep.mubr.bf16.mxu0 %v9870_v52 }
  0xe3   :  { %3286 = vmatprep.mubr.bf16.mxu1 %v9873_v53 }
  0xe4   :  { %3524 = vperm.xlu0 %9688, %v71_v14  }
  0xe5   :  { %3529 = vperm.xlu1 %9689, %v72_v22  }
  0xe8   :  { %3534 = vperm.xlu0 %9688, %v73_v17  }
  0xe9   :  { %3151 = vmatmul.mubr.bf16.gmra.mxu0 %v9872_v63  ;;  %3539 = vperm.xlu1 %9689, %v74_v26  }
  0xea   :  { %3287 = vmatmul.mubr.bf16.gmra.mxu1 %v9875_v0  ;;  %3158 = vmatprep.mubr.bf16.mxu0 %v9877_v25 }
  0xeb   :  { %3294 = vmatprep.mubr.bf16.mxu1 %v9880_v2 }
  0xec   :  { %3544 = vperm.xlu0 %9688, %v75_v23  }
  0xed   :  { %3549 = vperm.xlu1 %9689, %v76_v32  }
  0xf0   :  { %3554 = vperm.xlu0 %9688, %v77_v28  }
  0xf1   :  { %3159 = vmatmul.mubr.bf16.gmra.mxu0 %v9879_v9  ;;  %3559 = vperm.xlu1 %9689, %v78_v38   ;;  %v9901_v9 = vld [vmem:[#allocation3 + $0x68] ss:$36 sps:$4 sm:$0xff]  }
  0xf2   :  { %3295 = vmatmul.mubr.bf16.gmra.mxu1 %v9882_v10  ;;  %3166 = vmatprep.mubr.bf16.mxu0 %v9883_v11 }
  0xf3   :  { %3302 = vmatprep.mubr.bf16.mxu1 %v9887_v12 }
  0xf4   :  { %3564 = vperm.xlu0 %9688, %v79_v33  }
  0xf5   :  { %3569 = vperm.xlu1 %9689, %v80_v39  }
  0xf8   :  { %3574 = vperm.xlu0 %9688, %v81_v40  }
  0xf9   :  { %3167 = vmatmul.mubr.bf16.gmra.mxu0 %v9886_v18  ;;  %3579 = vperm.xlu1 %9689, %v82_v55  }
  0xfa   :  { %3303 = vmatmul.mubr.bf16.gmra.mxu1 %v9889_v19  ;;  %3174 = vmatprep.mubr.bf16.mxu0 %v9890_v20 }
  0xfb   :  { %3310 = vmatprep.mubr.bf16.mxu1 %v9893_v21 }
  0xfc   :  { %3584 = vperm.xlu0 %9688, %v83_v47  }
 0x100   :  { %v8764_v35 = vpop.f32.mrf.mxu0 }
 0x101   :  { %3175 = vmatmul.mubr.bf16.gmra.mxu0 %v9892_v29 }
 0x102   :  { %v8858_v36 = vpop.f32.mrf.mxu1  ;;  %3311 = vmatmul.mubr.bf16.gmra.mxu1 %v9895_v30  ;;  %3182 = vmatprep.mubr.bf16.mxu0 %v7808_v31  ;;  %v8765_v41 = vpop.f32.mrf.mxu0  ;;  %v9902_v31 = vld [vmem:[#allocation3 + $0xb0] ss:$36 sps:$4 sm:$0xff]  }
 0x103   :  { %3318 = vmatprep.mubr.bf16.mxu1 %v7810_v34  ;;  %v8766_v42 = vadd.f32 %v8765_v41, %v8764_v35 }
 0x104   :  { %v8859_v43 = vpop.f32.mrf.mxu1  ;;  %v8767_v45 = vpop.f32.mrf.mxu0 }
 0x105   :  { %v8860_v44 = vadd.f32 %v8859_v43, %v8858_v36 }
 0x106   :  { %v8861_v37 = vpop.f32.mrf.mxu1  ;;  %v8768_v49 = vpop.f32.mrf.mxu0 }
 0x107   :  { %v10475_v48 = vadd.f32 %v8860_v44, %v8766_v42  ;;  %v8769_v50 = vadd.f32 %v8768_v49, %v8767_v45 }
 0x108   :  { %v8862_v51 = vpop.f32.mrf.mxu1  ;;  %v8770_v53 = vpop.f32.mrf.mxu0 }
 0x109   :  { %v8863_v52 = vadd.f32 %v8862_v51, %v8861_v37  ;;  %3183 = vmatmul.mubr.bf16.gmra.mxu0 %v7807_v1 }
 0x10a   :  { %v8864_v54 = vpop.f32.mrf.mxu1  ;;  %3319 = vmatmul.mubr.bf16.gmra.mxu1 %v7809_v46  ;;  %9558 = vmatprep.mubr.msk.bf16.mxu0 %vm10230_vm0, %v10477_v27  ;;  %v8771_v57 = vpop.f32.mrf.mxu0  ;;  %v9903_v46 = vld [vmem:[#allocation3 + $0xf8] ss:$36 sps:$4 sm:$0xff]  }
 0x10b   :  { %v10484_v56 = vadd.f32 %v8863_v52, %v8769_v50  ;;  %v8772_v59 = vadd.f32 %v8771_v57, %v8770_v53 }
 0x10c   :  { %v8865_v60 = vpop.f32.mrf.mxu1  ;;  %v8773_v62 = vpop.f32.mrf.mxu0 }
 0x10d   :  { %v8866_v61 = vadd.f32 %v8865_v60, %v8864_v54 }
 0x10e   :  { %v8867_v63 = vpop.f32.mrf.mxu1  ;;  %v8774_v25 = vpop.f32.mrf.mxu0 }
 0x10f   :  { %v10486_v0 = vadd.f32 %v8866_v61, %v8772_v59  ;;  %v8775_v2 = vadd.f32 %v8774_v25, %v8773_v62  ;;  %v9904_v62 = vld [vmem:[#allocation3 + $0x140] ss:$36 sps:$4 sm:$0xff]  }
 0x110   :  { %v8868_v3 = vpop.f32.mrf.mxu1  ;;  %v8776_v5 = vpop.f32.mrf.mxu0 }
 0x111   :  { %v8869_v4 = vadd.f32 %v8868_v3, %v8867_v63  ;;  %9559 = vmatmul.mubr.bf16.vlgmr.msra.gmra.mxu0 %v9900_v58 }
 0x112   :  { %v8870_v6 = vpop.f32.mrf.mxu1  ;;  %9562 = vmatprep.mubr.msk.bf16.mxu0 %vm10230_vm0, %v10477_v27  ;;  %v8777_v8 = vpop.f32.mrf.mxu0 }
 0x113   :  { %v10490_v7 = vadd.f32 %v8869_v4, %v8775_v2  ;;  %v8778_v10 = vadd.f32 %v8777_v8, %v8776_v5 }
 0x114   :  { %v8871_v11 = vpop.f32.mrf.mxu1  ;;  %v8779_v13 = vpop.f32.mrf.mxu0 }
 0x115   :  { %v8872_v12 = vadd.f32 %v8871_v11, %v8870_v6 }
 0x116   :  { %v8873_v14 = vpop.f32.mrf.mxu1  ;;  %v8780_v17 = vpop.f32.mrf.mxu0 }
 0x117   :  { %v10492_v16 = vadd.f32 %v8872_v12, %v8778_v10  ;;  %v8781_v18 = vadd.f32 %v8780_v17, %v8779_v13  ;;  %v9905_v17 = vld [vmem:[#allocation3 + $0x188] ss:$36 sps:$4 sm:$0xff]  }
 0x118   :  { %v8874_v19 = vpop.f32.mrf.mxu1  ;;  %v8782_v21 = vpop.f32.mrf.mxu0 }
 0x119   :  { %v8875_v20 = vadd.f32 %v8874_v19, %v8873_v14  ;;  %9563 = vmatmul.mubr.bf16.gmra.mxu0 %v9901_v9 }
 0x11a   :  { %v8876_v22 = vpop.f32.mrf.mxu1  ;;  %9566 = vmatprep.mubr.msk.bf16.mxu0 %vm10230_vm0, %v10477_v27  ;;  %v8783_v24 = vpop.f32.mrf.mxu0 }
 0x11b   :  { %v10496_v23 = vadd.f32 %v8875_v20, %v8781_v18  ;;  %v8784_v26 = vadd.f32 %v8783_v24, %v8782_v21 }
 0x11c   :  { %v8877_v28 = vpop.f32.mrf.mxu1  ;;  %v8785_v30 = vpop.f32.mrf.mxu0 }
 0x11d   :  { %v8878_v29 = vadd.f32 %v8877_v28, %v8876_v22 }
 0x11e   :  { %v8879_v32 = vpop.f32.mrf.mxu1  ;;  %v8786_v34 = vpop.f32.mrf.mxu0 }
 0x11f   :  { %v10498_v33 = vadd.f32 %v8878_v29, %v8784_v26  ;;  %v8787_v35 = vadd.f32 %v8786_v34, %v8785_v30 }
 0x120   :  { %v8880_v36 = vpop.f32.mrf.mxu1 }
 0x121   :  { %v8881_v38 = vadd.f32 %v8880_v36, %v8879_v32  ;;  %v8788_v40 = vpop.f32.mrf.mxu0  ;;  %9567 = vmatmul.mubr.bf16.gmra.mxu0 %v9902_v31  ;;  %v9906_v36 = vld [vmem:[#allocation3 + $0x1d0] ss:$36 sps:$4 sm:$0xff]  }
 0x122   :  { %v8882_v41 = vpop.f32.mrf.mxu1  ;;  %9570 = vmatprep.mubr.msk.bf16.mxu0 %vm10230_vm0, %v10477_v27 }
 0x123   :  { %v10502_v42 = vadd.f32 %v8881_v38, %v8787_v35  ;;  %v8789_v43 = vpop.f32.mrf.mxu0 }
 0x124   :  { %v8790_v44 = vadd.f32 %v8789_v43, %v8788_v40  ;;  %v8883_v45 = vpop.f32.mrf.mxu1 }
 0x125   :  { %v8884_v1 = vadd.f32 %v8883_v45, %v8882_v41  ;;  %v8791_v37 = vpop.f32.mrf.mxu0 }
 0x126   :  { %v8885_v39 = vpop.f32.mrf.mxu1 }
 0x127   :  { %v10504_v47 = vadd.f32 %v8884_v1, %v8790_v44  ;;  %v8792_v49 = vpop.f32.mrf.mxu0 }
 0x128   :  { %v8793_v50 = vadd.f32 %v8792_v49, %v8791_v37  ;;  %v8886_v51 = vpop.f32.mrf.mxu1 }
 0x129   :  { %v8887_v52 = vadd.f32 %v8886_v51, %v8885_v39  ;;  %v8794_v53 = vpop.f32.mrf.mxu0  ;;  %9571 = vmatmul.mubr.bf16.gmra.mxu0 %v9903_v46 }
 0x12a   :  { %v8888_v54 = vpop.f32.mrf.mxu1  ;;  %9574 = vmatprep.mubr.msk.bf16.mxu0 %vm10230_vm0, %v10477_v27 }
 0x12b   :  { %v10508_v55 = vadd.f32 %v8887_v52, %v8793_v50  ;;  %v8795_v57 = vpop.f32.mrf.mxu0 }
 0x12c   :  { %v8796_v58 = vadd.f32 %v8795_v57, %v8794_v53  ;;  %v8889_v59 = vpop.f32.mrf.mxu1  ;;  %v9907_v53 = vld [vmem:[#allocation3 + $0x218] ss:$36 sps:$4 sm:$0xff]  }
 0x12d   :  { %v8890_v60 = vadd.f32 %v8889_v59, %v8888_v54  ;;  %v8797_v61 = vpop.f32.mrf.mxu0 }
 0x12e   :  { %v8891_v63 = vpop.f32.mrf.mxu1 }
 0x12f   :  { %v10510_v25 = vadd.f32 %v8890_v60, %v8796_v58  ;;  %v8798_v2 = vpop.f32.mrf.mxu0 }
 0x130   :  { %v8799_v3 = vadd.f32 %v8798_v2, %v8797_v61  ;;  %v8892_v4 = vpop.f32.mrf.mxu1 }
 0x131   :  { %v8893_v5 = vadd.f32 %v8892_v4, %v8891_v63  ;;  %v8800_v6 = vpop.f32.mrf.mxu0  ;;  %9575 = vmatmul.mubr.bf16.gmra.mxu0 %v9904_v62 }
 0x132   :  { %v8894_v8 = vpop.f32.mrf.mxu1  ;;  %9578 = vmatprep.mubr.msk.bf16.mxu0 %vm10230_vm0, %v10477_v27 }
 0x133   :  { %v10514_v9 = vadd.f32 %v8893_v5, %v8799_v3  ;;  %v8801_v10 = vpop.f32.mrf.mxu0 }
 0x134   :  { %v8802_v11 = vadd.f32 %v8801_v10, %v8800_v6  ;;  %v8895_v12 = vpop.f32.mrf.mxu1  ;;  %v9908_v10 = vld [vmem:[#allocation3 + $0x260] ss:$36 sps:$4 sm:$0xff]  }
 0x135   :  { %v8896_v13 = vadd.f32 %v8895_v12, %v8894_v8  ;;  %v8803_v14 = vpop.f32.mrf.mxu0 }
 0x136   :  { %v8897_v18 = vpop.f32.mrf.mxu1 }
 0x137   :  { %v10516_v19 = vadd.f32 %v8896_v13, %v8802_v11  ;;  %v8804_v20 = vpop.f32.mrf.mxu0 }
 0x138   :  { %v8805_v21 = vadd.f32 %v8804_v20, %v8803_v14  ;;  %v8898_v22 = vpop.f32.mrf.mxu1 }
 0x139   :  { %v8899_v24 = vadd.f32 %v8898_v22, %v8897_v18  ;;  %v8806_v26 = vpop.f32.mrf.mxu0  ;;  %9579 = vmatmul.mubr.bf16.gmra.mxu0 %v9905_v17 }
 0x13a   :  { %v8900_v28 = vpop.f32.mrf.mxu1  ;;  %9582 = vmatprep.mubr.msk.bf16.mxu0 %vm10230_vm0, %v10477_v27 }
 0x13b   :  { %v10520_v29 = vadd.f32 %v8899_v24, %v8805_v21  ;;  %v8807_v30 = vpop.f32.mrf.mxu0 }
 0x13c   :  { %v8808_v31 = vadd.f32 %v8807_v30, %v8806_v26  ;;  %v8901_v32 = vpop.f32.mrf.mxu1 }
 0x13d   :  { %v8902_v34 = vadd.f32 %v8901_v32, %v8900_v28  ;;  %v8809_v35 = vpop.f32.mrf.mxu0  ;;  %v9909_v32 = vld [vmem:[#allocation3 + $0x2a8] ss:$36 sps:$4 sm:$0xff]  }
 0x13e   :  { %v8903_v38 = vpop.f32.mrf.mxu1 }
 0x13f   :  { %v10522_v40 = vadd.f32 %v8902_v34, %v8808_v31  ;;  %v8810_v41 = vpop.f32.mrf.mxu0 }
 0x140   :  { %v8811_v43 = vadd.f32 %v8810_v41, %v8809_v35  ;;  %v8904_v44 = vpop.f32.mrf.mxu1 }
 0x141   :  { %v8905_v45 = vadd.f32 %v8904_v44, %v8903_v38  ;;  %v8812_v1 = vpop.f32.mrf.mxu0  ;;  %9583 = vmatmul.mubr.bf16.gmra.mxu0 %v9906_v36 }
 0x142   :  { %v8906_v37 = vpop.f32.mrf.mxu1  ;;  %9586 = vmatprep.mubr.msk.bf16.mxu0 %vm10230_vm0, %v10477_v27 }
 0x143   :  { %v10526_v46 = vadd.f32 %v8905_v45, %v8811_v43  ;;  %v8813_v39 = vpop.f32.mrf.mxu0 }
 0x144   :  { %v8814_v49 = vadd.f32 %v8813_v39, %v8812_v1  ;;  %v8907_v50 = vpop.f32.mrf.mxu1 }
 0x145   :  { %v8908_v51 = vadd.f32 %v8907_v50, %v8906_v37  ;;  %v8815_v52 = vpop.f32.mrf.mxu0 }
 0x146   :  { %v8909_v54 = vpop.f32.mrf.mxu1 }
 0x147   :  { %v10528_v57 = vadd.f32 %v8908_v51, %v8814_v49  ;;  %v8816_v58 = vpop.f32.mrf.mxu0 }
 0x148   :  { %v8817_v59 = vadd.f32 %v8816_v58, %v8815_v52  ;;  %v8910_v60 = vpop.f32.mrf.mxu1  ;;  %v9910_v52 = vld [vmem:[#allocation3 + $0x2f0] ss:$36 sps:$4 sm:$0xff]  }
 0x149   :  { %v8911_v61 = vadd.f32 %v8910_v60, %v8909_v54  ;;  %v8818_v62 = vpop.f32.mrf.mxu0  ;;  %9587 = vmatmul.mubr.bf16.gmra.mxu0 %v9907_v53 }
 0x14a   :  { %v8912_v63 = vpop.f32.mrf.mxu1  ;;  %9590 = vmatprep.mubr.msk.bf16.mxu0 %vm10230_vm0, %v10477_v27 }
 0x14b   :  { %v10532_v2 = vadd.f32 %v8911_v61, %v8817_v59  ;;  %v8819_v3 = vpop.f32.mrf.mxu0 }
 0x14c   :  { %v8820_v4 = vadd.f32 %v8819_v3, %v8818_v62  ;;  %v8913_v5 = vpop.f32.mrf.mxu1 }
 0x14d   :  { %v8914_v6 = vadd.f32 %v8913_v5, %v8912_v63  ;;  %v8821_v8 = vpop.f32.mrf.mxu0 }
 0x14e   :  { %v8915_v11 = vpop.f32.mrf.mxu1 }
 0x14f   :  { %v10534_v12 = vadd.f32 %v8914_v6, %v8820_v4  ;;  %v8822_v13 = vpop.f32.mrf.mxu0 }
 0x150   :  { %v8823_v14 = vadd.f32 %v8822_v13, %v8821_v8  ;;  %v8916_v17 = vpop.f32.mrf.mxu1 }
 0x151   :  { %v8917_v18 = vadd.f32 %v8916_v17, %v8915_v11  ;;  %v8824_v20 = vpop.f32.mrf.mxu0  ;;  %9591 = vmatmul.mubr.bf16.gmra.mxu0 %v9908_v10  ;;  %v9911_v11 = vld [vmem:[#allocation3 + $0x338] ss:$36 sps:$4 sm:$0xff]  }
 0x152   :  { %v8918_v21 = vpop.f32.mrf.mxu1  ;;  %9594 = vmatprep.mubr.msk.bf16.mxu0 %vm10230_vm0, %v10477_v27 }
 0x153   :  { %v10538_v22 = vadd.f32 %v8917_v18, %v8823_v14  ;;  %v8825_v24 = vpop.f32.mrf.mxu0 }
 0x154   :  { %v8826_v26 = vadd.f32 %v8825_v24, %v8824_v20  ;;  %v8919_v28 = vpop.f32.mrf.mxu1 }
 0x155   :  { %v8920_v30 = vadd.f32 %v8919_v28, %v8918_v21  ;;  %v8827_v31 = vpop.f32.mrf.mxu0 }
 0x156   :  { %v8921_v34 = vpop.f32.mrf.mxu1 }
 0x157   :  { %v10540_v35 = vadd.f32 %v8920_v30, %v8826_v26  ;;  %v8828_v36 = vpop.f32.mrf.mxu0 }
 0x158   :  { %v8829_v38 = vadd.f32 %v8828_v36, %v8827_v31  ;;  %v8922_v41 = vpop.f32.mrf.mxu1 }
 0x159   :  { %v8923_v43 = vadd.f32 %v8922_v41, %v8921_v34  ;;  %v8830_v44 = vpop.f32.mrf.mxu0  ;;  %9595 = vmatmul.mubr.bf16.gmra.mxu0 %v9909_v32 }
 0x15a   :  { %v8924_v45 = vpop.f32.mrf.mxu1  ;;  %9598 = vmatprep.mubr.msk.bf16.mxu0 %vm10230_vm0, %v10477_v27 }
 0x15b   :  { %v10544_v1 = vadd.f32 %v8923_v43, %v8829_v38  ;;  %v8831_v37 = vpop.f32.mrf.mxu0 }
 0x15c   :  { %v8832_v39 = vadd.f32 %v8831_v37, %v8830_v44  ;;  %v8925_v49 = vpop.f32.mrf.mxu1 }
 0x15d   :  { %v8926_v50 = vadd.f32 %v8925_v49, %v8924_v45  ;;  %v8833_v51 = vpop.f32.mrf.mxu0 }
 0x15e   :  { %v8927_v53 = vpop.f32.mrf.mxu1 }
 0x15f   :  { %v10546_v54 = vadd.f32 %v8926_v50, %v8832_v39  ;;  %v8834_v58 = vpop.f32.mrf.mxu0 }
 0x160   :  { %v8835_v59 = vadd.f32 %v8834_v58, %v8833_v51  ;;  %v8928_v60 = vpop.f32.mrf.mxu1 }
 0x161   :  { %v8929_v61 = vadd.f32 %v8928_v60, %v8927_v53  ;;  %v8836_v62 = vpop.f32.mrf.mxu0  ;;  %9599 = vmatmul.mubr.bf16.gmra.mxu0 %v9910_v52 }
 0x162   :  { %v8930_v63 = vpop.f32.mrf.mxu1  ;;  %9602 = vmatprep.mubr.msk.bf16.mxu0 %vm10230_vm0, %v10477_v27 }
 0x163   :  { %v10550_v3 = vadd.f32 %v8929_v61, %v8835_v59  ;;  %v8837_v4 = vpop.f32.mrf.mxu0 }
 0x164   :  { %v8838_v5 = vadd.f32 %v8837_v4, %v8836_v62  ;;  %v8931_v6 = vpop.f32.mrf.mxu1 }
 0x165   :  { %v8932_v8 = vadd.f32 %v8931_v6, %v8930_v63  ;;  %v8839_v10 = vpop.f32.mrf.mxu0 }
 0x166   :  { %v8933_v13 = vpop.f32.mrf.mxu1 }
 0x167   :  { %v10552_v14 = vadd.f32 %v8932_v8, %v8838_v5  ;;  %v8840_v17 = vpop.f32.mrf.mxu0 }
 0x168   :  { %v8934_v18 = vpop.f32.mrf.mxu1 }
 0x169   :  { %v8952_v20 = vpop.f32.mrf.mxu0  ;;  %9603 = vmatmul.mubr.bf16.gmra.mxu0 %v9911_v11 }
 0x16a   :  { %v9046_v21 = vpop.f32.mrf.mxu1  ;;  %9606 = vmatprep.mubr.msk.bf16.mxu0 %vm10230_vm0, %v10477_v27 }
 0x16b   :  { %v8953_v24 = vpop.f32.mrf.mxu0 }
 0x16c   :  { %v8954_v26 = vadd.f32 %v8953_v24, %v8952_v20  ;;  %v9047_v28 = vpop.f32.mrf.mxu1 }
 0x16d   :  { %v8955_v30 = vpop.f32.mrf.mxu0  ;;  %v9048_v31 = vadd.f32 %v9047_v28, %v9046_v21 }
 0x16e   :  { %v3089_v32 = vadd.f32 %v8954_v26, %v10475_v48  ;;  %v9049_v34 = vpop.f32.mrf.mxu1 }
 0x16f   :  { %v8956_v36 = vpop.f32.mrf.mxu0 }
 0x170   :  { %v8957_v38 = vadd.f32 %v8956_v36, %v8955_v30  ;;  %v9050_v41 = vpop.f32.mrf.mxu1  ;;  %v10557_v43 = vadd.f32 %v9048_v31, %v3089_v32 }
 0x171   :  { %v8958_v44 = vpop.f32.mrf.mxu0  ;;  %v9051_v45 = vadd.f32 %v9050_v41, %v9049_v34  ;;  %9607 = vmatmul.mubr.bf16.gmra.mxu0 %v10433_v15 }
 0x172   :  { %v3092_v37 = vadd.f32 %v8957_v38, %v10484_v56  ;;  %v9052_v27 = vpop.f32.mrf.mxu1 }
 0x173   :  { %v8959_v39 = vpop.f32.mrf.mxu0 }
 0x174   :  { %v8960_v49 = vadd.f32 %v8959_v39, %v8958_v44  ;;  %v9053_v50 = vpop.f32.mrf.mxu1  ;;  %v10561_v51 = vadd.f32 %v9051_v45, %v3092_v37 }
 0x175   :  { %v8961_v52 = vpop.f32.mrf.mxu0  ;;  %v9054_v48 = vadd.f32 %v9053_v50, %v9052_v27 }
 0x176   :  { %v3097_v53 = vadd.f32 %v8960_v49, %v10486_v0  ;;  %v9055_v58 = vpop.f32.mrf.mxu1 }
 0x177   :  { %v8962_v59 = vpop.f32.mrf.mxu0 }
 0x178   :  { %v8963_v60 = vadd.f32 %v8962_v59, %v8961_v52  ;;  %v9056_v61 = vpop.f32.mrf.mxu1  ;;  %v10564_v62 = vadd.f32 %v9054_v48, %v3097_v53 }
 0x179   :  { %v8964_v63 = vpop.f32.mrf.mxu0  ;;  %v9057_v15 = vadd.f32 %v9056_v61, %v9055_v58 }
 0x17a   :  { %v3100_v56 = vadd.f32 %v8963_v60, %v10490_v7  ;;  %v9058_v4 = vpop.f32.mrf.mxu1 }
 0x17b   :  { %v8965_v5 = vpop.f32.mrf.mxu0 }
 0x17c   :  { %v8966_v6 = vadd.f32 %v8965_v5, %v8964_v63  ;;  %v9059_v8 = vpop.f32.mrf.mxu1  ;;  %v10567_v10 = vadd.f32 %v9057_v15, %v3100_v56 }
 0x17d   :  { %v8967_v11 = vpop.f32.mrf.mxu0  ;;  %v9060_v13 = vadd.f32 %v9059_v8, %v9058_v4 }
 0x17e   :  { %v3105_v0 = vadd.f32 %v8966_v6, %v10492_v16  ;;  %v9061_v17 = vpop.f32.mrf.mxu1 }
 0x17f   :  { %v8968_v18 = vpop.f32.mrf.mxu0 }
 0x180   :  { %v8969_v20 = vadd.f32 %v8968_v18, %v8967_v11  ;;  %v9062_v21 = vpop.f32.mrf.mxu1  ;;  %v10570_v24 = vadd.f32 %v9060_v13, %v3105_v0 }
 0x181   :  { %v8970_v26 = vpop.f32.mrf.mxu0  ;;  %v9063_v28 = vadd.f32 %v9062_v21, %v9061_v17 }
 0x182   :  { %v3108_v7 = vadd.f32 %v8969_v20, %v10496_v23  ;;  %v9064_v30 = vpop.f32.mrf.mxu1 }
 0x183   :  { %v8971_v31 = vpop.f32.mrf.mxu0 }
 0x184   :  { %v8972_v32 = vadd.f32 %v8971_v31, %v8970_v26  ;;  %v9065_v34 = vpop.f32.mrf.mxu1  ;;  %v10573_v36 = vadd.f32 %v9063_v28, %v3108_v7 }
 0x185   :  { %v8973_v38 = vpop.f32.mrf.mxu0  ;;  %v9066_v41 = vadd.f32 %v9065_v34, %v9064_v30 }
 0x186   :  { %v3113_v16 = vadd.f32 %v8972_v32, %v10498_v33  ;;  %v9067_v44 = vpop.f32.mrf.mxu1 }
 0x187   :  { %v8974_v45 = vpop.f32.mrf.mxu0 }
 0x188   :  { %v8975_v37 = vadd.f32 %v8974_v45, %v8973_v38  ;;  %v9068_v27 = vpop.f32.mrf.mxu1  ;;  %v10576_v39 = vadd.f32 %v9066_v41, %v3113_v16 }
 0x189   :  { %v8976_v49 = vpop.f32.mrf.mxu0  ;;  %v9069_v50 = vadd.f32 %v9068_v27, %v9067_v44  ;;  %v9914_v27 = vld [vmem:[#allocation7 + $0x38] sm:$0xff]  }
 0x18a   :  { %v3116_v23 = vadd.f32 %v8975_v37, %v10502_v42  ;;  %v9070_v52 = vpop.f32.mrf.mxu1  ;;  %v9913_v37 = vld [vmem:[#allocation7 + $0x78] sm:$0xff]  }
 0x18b   :  { %v8977_v48 = vpop.f32.mrf.mxu0  ;;  %9145 = vmatprep.subr.bf16.mxu1 %v9913_v37 }
 0x18c   :  { %v8978_v53 = vadd.f32 %v8977_v48, %v8976_v49  ;;  %v9071_v58 = vpop.f32.mrf.mxu1  ;;  %v10579_v59 = vadd.f32 %v9069_v50, %v3116_v23  ;;  %9146 = vmatpush3.bf16.msra.mxu1 %v9914_v27 }
 0x18d   :  { %v8979_v60 = vpop.f32.mrf.mxu0  ;;  %v9072_v61 = vadd.f32 %v9071_v58, %v9070_v52 }
 0x18e   :  { %v3121_v33 = vadd.f32 %v8978_v53, %v10504_v47  ;;  %v9073_v63 = vpop.f32.mrf.mxu1 }
 0x18f   :  { %v8980_v15 = vpop.f32.mrf.mxu0 }
 0x190   :  { %v8981_v56 = vadd.f32 %v8980_v15, %v8979_v60  ;;  %v9074_v4 = vpop.f32.mrf.mxu1  ;;  %v10582_v5 = vadd.f32 %v9072_v61, %v3121_v33 }
 0x191   :  { %v8982_v6 = vpop.f32.mrf.mxu0  ;;  %v9075_v8 = vadd.f32 %v9074_v4, %v9073_v63 }
 0x192   :  { %v3124_v42 = vadd.f32 %v8981_v56, %v10508_v55  ;;  %v9076_v11 = vpop.f32.mrf.mxu1 }
 0x193   :  { %v8983_v13 = vpop.f32.mrf.mxu0 }
 0x194   :  { %v8984_v0 = vadd.f32 %v8983_v13, %v8982_v6  ;;  %v9077_v17 = vpop.f32.mrf.mxu1  ;;  %v10585_v18 = vadd.f32 %v9075_v8, %v3124_v42 }
 0x195   :  { %v8985_v20 = vpop.f32.mrf.mxu0  ;;  %v9078_v21 = vadd.f32 %v9077_v17, %v9076_v11 }
 0x196   :  { %v3129_v47 = vadd.f32 %v8984_v0, %v10510_v25  ;;  %v9079_v26 = vpop.f32.mrf.mxu1 }
 0x197   :  { %v8986_v28 = vpop.f32.mrf.mxu0 }
 0x198   :  { %v8987_v7 = vadd.f32 %v8986_v28, %v8985_v20  ;;  %v9080_v30 = vpop.f32.mrf.mxu1  ;;  %v10588_v31 = vadd.f32 %v9078_v21, %v3129_v47  ;;  %v9915_v20 = vld [vmem:[#allocation7 + $0x70] sm:$0xff]  }
 0x199   :  { %v8988_v32 = vpop.f32.mrf.mxu0  ;;  %v9081_v34 = vadd.f32 %v9080_v30, %v9079_v26  ;;  %v9916_v21 = vld [vmem:[#allocation7 + $0x30] sm:$0xff]   ;;  %9147 = vmatprep.subr.bf16.mxu1 %v9915_v20 }
 0x19a   :  { %v3132_v55 = vadd.f32 %v8987_v7, %v10514_v9  ;;  %v9082_v38 = vpop.f32.mrf.mxu1  ;;  %9148 = vmatpush3.bf16.msra.mxu1 %v9916_v21 }
 0x19b   :  { %v8989_v41 = vpop.f32.mrf.mxu0 }
 0x19c   :  { %v8990_v16 = vadd.f32 %v8989_v41, %v8988_v32  ;;  %v9083_v44 = vpop.f32.mrf.mxu1  ;;  %v10591_v45 = vadd.f32 %v9081_v34, %v3132_v55 }
 0x19d   :  { %v8991_v49 = vpop.f32.mrf.mxu0  ;;  %v9084_v25 = vadd.f32 %v9083_v44, %v9082_v38 }
 0x19e   :  { %v3137_v50 = vadd.f32 %v8990_v16, %v10516_v19  ;;  %v9085_v23 = vpop.f32.mrf.mxu1 }
 0x19f   :  { %v8992_v52 = vpop.f32.mrf.mxu0 }
 0x1a0   :  { %v8993_v48 = vadd.f32 %v8992_v52, %v8991_v49  ;;  %v9086_v53 = vpop.f32.mrf.mxu1  ;;  %v10594_v58 = vadd.f32 %v9084_v25, %v3137_v50 }
 0x1a1   :  { %v8994_v9 = vpop.f32.mrf.mxu0  ;;  %v9087_v60 = vadd.f32 %v9086_v53, %v9085_v23 }
 0x1a2   :  { %v3140_v61 = vadd.f32 %v8993_v48, %v10520_v29  ;;  %v9088_v33 = vpop.f32.mrf.mxu1 }
 0x1a3   :  { %v8995_v63 = vpop.f32.mrf.mxu0 }
 0x1a4   :  { %v8996_v15 = vadd.f32 %v8995_v63, %v8994_v9  ;;  %v9089_v56 = vpop.f32.mrf.mxu1  ;;  %v10597_v4 = vadd.f32 %v9087_v60, %v3140_v61  ;;  %v9917_v9 = vld [vmem:[#allocation7 + $0x68] sm:$0xff]  }
 0x1a5   :  { %v8997_v6 = vpop.f32.mrf.mxu0  ;;  %v9090_v19 = vadd.f32 %v9089_v56, %v9088_v33  ;;  %v9918_v60 = vld [vmem:[#allocation7 + $0x28] sm:$0xff]   ;;  %9149 = vmatprep.subr.bf16.mxu1 %v9917_v9 }
 0x1a6   :  { %v3145_v8 = vadd.f32 %v8996_v15, %v10522_v40  ;;  %v9091_v42 = vpop.f32.mrf.mxu1  ;;  %9150 = vmatpush3.bf16.msra.mxu1 %v9918_v60 }
 0x1a7   :  { %v8998_v11 = vpop.f32.mrf.mxu0 }
 0x1a8   :  { %v8999_v13 = vadd.f32 %v8998_v11, %v8997_v6  ;;  %v9092_v0 = vpop.f32.mrf.mxu1  ;;  %v10600_v17 = vadd.f32 %v9090_v19, %v3145_v8 }
 0x1a9   :  { %v9000_v47 = vpop.f32.mrf.mxu0  ;;  %v9093_v29 = vadd.f32 %v9092_v0, %v9091_v42 }
 0x1aa   :  { %v3148_v26 = vadd.f32 %v8999_v13, %v10526_v46  ;;  %v9094_v28 = vpop.f32.mrf.mxu1 }
 0x1ab   :  { %v9001_v7 = vpop.f32.mrf.mxu0 }
 0x1ac   :  { %v9002_v30 = vadd.f32 %v9001_v7, %v9000_v47  ;;  %v9095_v32 = vpop.f32.mrf.mxu1  ;;  %v10603_v34 = vadd.f32 %v9093_v29, %v3148_v26 }
 0x1ad   :  { %v9003_v40 = vpop.f32.mrf.mxu0  ;;  %v9096_v55 = vadd.f32 %v9095_v32, %v9094_v28 }
 0x1ae   :  { %v3153_v38 = vadd.f32 %v9002_v30, %v10528_v57  ;;  %v9097_v41 = vpop.f32.mrf.mxu1 }
 0x1af   :  { %v9004_v16 = vpop.f32.mrf.mxu0 }
 0x1b0   :  { %v9005_v44 = vadd.f32 %v9004_v16, %v9003_v40  ;;  %v9098_v37 = vpop.f32.mrf.mxu1  ;;  %v10606_v27 = vadd.f32 %v9096_v55, %v3153_v38 }
 0x1b1   :  { %v9006_v49 = vpop.f32.mrf.mxu0  ;;  %v9099_v46 = vadd.f32 %v9098_v37, %v9097_v41 }
 0x1b2   :  { %v3156_v25 = vadd.f32 %v9005_v44, %v10532_v2  ;;  %v9100_v50 = vpop.f32.mrf.mxu1 }
 0x1b3   :  { %v9007_v23 = vpop.f32.mrf.mxu0 }
 0x1b4   :  { %v9008_v52 = vadd.f32 %v9007_v23, %v9006_v49  ;;  %v9101_v48 = vpop.f32.mrf.mxu1  ;;  %v10609_v53 = vadd.f32 %v9099_v46, %v3156_v25 }
 0x1b5   :  { %v9009_v61 = vpop.f32.mrf.mxu0  ;;  %v9102_v57 = vadd.f32 %v9101_v48, %v9100_v50 }
 0x1b6   :  { %v3161_v33 = vadd.f32 %v9008_v52, %v10534_v12  ;;  %v9103_v63 = vpop.f32.mrf.mxu1 }
 0x1b7   :  { %v9010_v15 = vpop.f32.mrf.mxu0 }
 0x1b8   :  { %v9011_v56 = vadd.f32 %v9010_v15, %v9009_v61  ;;  %v9104_v6 = vpop.f32.mrf.mxu1  ;;  %v10612_v19 = vadd.f32 %v9102_v57, %v3161_v33 }
 0x1b9   :  { %v9012_v2 = vpop.f32.mrf.mxu0  ;;  %v9105_v8 = vadd.f32 %v9104_v6, %v9103_v63 }
 0x1ba   :  { %v3164_v42 = vadd.f32 %v9011_v56, %v10538_v22  ;;  %v9106_v11 = vpop.f32.mrf.mxu1 }
 0x1bb   :  { %v9013_v13 = vpop.f32.mrf.mxu0 }
 0x1bc   :  { %v9014_v0 = vadd.f32 %v9013_v13, %v9012_v2  ;;  %v9107_v20 = vpop.f32.mrf.mxu1  ;;  %v10615_v21 = vadd.f32 %v9105_v8, %v3164_v42 }
 0x1bd   :  { %v9015_v47 = vpop.f32.mrf.mxu0  ;;  %v9108_v12 = vadd.f32 %v9107_v20, %v9106_v11 }
 0x1be   :  { %v3169_v29 = vadd.f32 %v9014_v0, %v10540_v35  ;;  %v9109_v26 = vpop.f32.mrf.mxu1 }
 0x1bf   :  { %v9016_v28 = vpop.f32.mrf.mxu0 }
 0x1c0   :  { %v9017_v7 = vadd.f32 %v9016_v28, %v9015_v47  ;;  %v9110_v30 = vpop.f32.mrf.mxu1  ;;  %v10618_v32 = vadd.f32 %v9108_v12, %v3169_v29  ;;  %v9925_v29 = vld [vmem:[#allocation7 + $0xf8] sm:$0xff]  }
 0x1c1   :  { %v9018_v40 = vpop.f32.mrf.mxu0  ;;  %v9111_v55 = vadd.f32 %v9110_v30, %v9109_v26  ;;  %v9926_v26 = vld [vmem:[#allocation7 + $0xb8] sm:$0xff]   ;;  %9239 = vmatprep.subr.bf16.mxu0 %v9925_v29  ;;  %v9928_v30 = vld [vmem:[#allocation7 + $0xb0] sm:$0xff]  }
 0x1c2   :  { %v3172_v22 = vadd.f32 %v9017_v7, %v10544_v1  ;;  %v9112_v38 = vpop.f32.mrf.mxu1  ;;  %9240 = vmatpush3.bf16.msra.mxu0 %v9926_v26  ;;  %v9927_v7 = vld [vmem:[#allocation7 + $0xf0] sm:$0xff]   ;;  %v9937_v26 = vld [vmem:[#allocation7 + $0x40] sm:$0xff]  }
 0x1c3   :  { %v9019_v41 = vpop.f32.mrf.mxu0  ;;  %9241 = vmatprep.subr.bf16.mxu0 %v9927_v7 }
 0x1c4   :  { %v9020_v16 = vadd.f32 %v9019_v41, %v9018_v40  ;;  %v9113_v44 = vpop.f32.mrf.mxu1  ;;  %v10621_v37 = vadd.f32 %v9111_v55, %v3172_v22  ;;  %v9931_v22 = vld [vmem:[#allocation7 + $0xe8] sm:$0xff]  }
 0x1c5   :  { %v9021_v49 = vpop.f32.mrf.mxu0  ;;  %v9114_v46 = vadd.f32 %v9113_v44, %v9112_v38  ;;  %v9932_v38 = vld [vmem:[#allocation7 + $0xa8] sm:$0xff]   ;;  %v9919_v44 = vld [vmem:[#allocation7 + $0x60] sm:$0xff]  }
 0x1c6   :  { %v3177_v35 = vadd.f32 %v9020_v16, %v10546_v54  ;;  %v9115_v25 = vpop.f32.mrf.mxu1  ;;  %9242 = vmatpush3.bf16.msra.mxu0 %v9928_v30  ;;  %9151 = vmatprep.subr.bf16.mxu1 %v9919_v44 }
 0x1c7   :  { %v9022_v50 = vpop.f32.mrf.mxu0  ;;  %9243 = vmatprep.subr.bf16.mxu0 %v9931_v22  ;;  %v9938_v22 = vld [vmem:[#allocation7] sm:$0xff]  }
 0x1c8   :  { %v9023_v23 = vadd.f32 %v9022_v50, %v9021_v49  ;;  %v9116_v52 = vpop.f32.mrf.mxu1  ;;  %v10624_v48 = vadd.f32 %v9114_v46, %v3177_v35  ;;  %v9933_v49 = vld [vmem:[#allocation7 + $0xe0] sm:$0xff]   ;;  %v9921_v35 = vld [vmem:[#allocation7 + $0x58] sm:$0xff]  }
 0x1c9   :  { %v9024_v9 = vpop.f32.mrf.mxu0  ;;  %v9117_v60 = vadd.f32 %v9116_v52, %v9115_v25  ;;  %v9920_v46 = vld [vmem:[#allocation7 + $0x20] sm:$0xff]   ;;  %v10644_v25 = vpop.permute.xlu0 %3464 }
 0x1ca   :  { %v3180_v1 = vadd.f32 %v9023_v23, %v10550_v3  ;;  %v9118_v61 = vpop.f32.mrf.mxu1  ;;  %9244 = vmatpush3.bf16.msra.mxu0 %v9932_v38  ;;  %9152 = vmatpush3.bf16.msra.mxu1 %v9920_v46  ;;  %v9922_v23 = vld [vmem:[#allocation7 + $0x18] sm:$0xff]   ;;  %v9934_v52 = vld [vmem:[#allocation7 + $0xa0] sm:$0xff]  }
 0x1cb   :  { %v9025_v57 = vpop.f32.mrf.mxu0  ;;  %9245 = vmatprep.subr.bf16.mxu0 %v9933_v49  ;;  %9153 = vmatprep.subr.bf16.mxu1 %v9921_v35 }
 0x1cc   :  { %v9026_v33 = vadd.f32 %v9025_v57, %v9024_v9  ;;  %v9119_v63 = vpop.f32.mrf.mxu1  ;;  %v10627_v15 = vadd.f32 %v9117_v60, %v3180_v1  ;;  %v9935_v9 = vld [vmem:[#allocation7 + $0xd8] sm:$0xff]   ;;  %v9923_v1 = vld [vmem:[#allocation7 + $0x50] sm:$0xff]   ;;  %v10648_v57 = vpop.permute.xlu1 %3474 }
 0x1cd   :  { %v9027_v56 = vpop.f32.mrf.mxu0  ;;  %v9120_v6 = vadd.f32 %v9119_v63, %v9118_v61  ;;  %v9936_v61 = vld [vmem:[#allocation7 + $0x98] sm:$0xff]   ;;  %v9939_v63 = vld [vmem:[#allocation7 + $0xd0] sm:$0xff]  }
 0x1ce   :  { %v3185_v54 = vadd.f32 %v9026_v33, %v10552_v14  ;;  %v9121_v2 = vpop.f32.mrf.mxu1  ;;  %9246 = vmatpush3.bf16.msra.mxu0 %v9934_v52  ;;  %9154 = vmatpush3.bf16.msra.mxu1 %v9922_v23  ;;  %v9924_v56 = vld [vmem:[#allocation7 + $0x10] sm:$0xff]  }
 0x1cf   :  { %v9028_v8 = vpop.f32.mrf.mxu0  ;;  %9247 = vmatprep.subr.bf16.mxu0 %v9935_v9  ;;  %9155 = vmatprep.subr.bf16.mxu1 %v9923_v1  ;;  %v9929_v2 = vld [vmem:[#allocation7 + $0x48] sm:$0xff]   ;;  %v9951_v9 = vld [vmem:[#allocation7 + $0x178] sm:$0xff]  }
 0x1d0   :  { %v9122_v42 = vpop.f32.mrf.mxu1  ;;  %v10630_v11 = vadd.f32 %v9120_v6, %v3185_v54  ;;  %v10652_v6 = vpop.permute.xlu0 %3469  ;;  %v9940_v8 = vld [vmem:[#allocation7 + $0x90] sm:$0xff]  }
 0x1d1   :  { %v10632_v13 = vpop.f32.mrf.mxu0 }
 0x1d2   :  { %9248 = vmatpush3.bf16.msra.mxu0 %v9936_v61  ;;  %9156 = vmatpush3.bf16.msra.mxu1 %v9924_v56 }
 0x1d3   :  { %v9560_v0 = vpop.f32.mrf.mxu0  ;;  %9249 = vmatprep.subr.bf16.mxu0 %v9939_v63  ;;  %9157 = vmatprep.subr.bf16.mxu1 %v9929_v2 }
 0x1d4   :  { %v9941_v0 = vld [vmem:[#allocation7 + $0xc8] sm:$0xff]   ;;  %v10658_v7 = vpop.permute.xlu0 %3484 }
 0x1d5   :  { %v10634_v20 = vpop.f32.mrf.mxu0 }
 0x1d6   :  { %9250 = vmatpush3.bf16.msra.mxu0 %v9940_v8  ;;  %v10666_v23 = vadd.f32 %v10634_v20, %v10561_v51 }
 0x1d7   :  { %v9561_v3 = vpop.f32.mrf.mxu0  ;;  %9251 = vmatprep.subr.bf16.mxu0 %v9941_v0 }
 0x1d8   :  { %v9930_v3 = vld [vmem:[#allocation7 + $0x8] sm:$0xff]   ;;  %v10662_v46 = vpop.permute.xlu0 %3494  ;;  %v3588_v56 = vmul.f32 %v10652_v6, %v10666_v23 }
 0x1d9   :  { %v10636_v47 = vpop.f32.mrf.mxu0  ;;  %9158 = vmatpush3.bf16.msra.mxu1 %v9930_v3 }
 0x1da   :  { %9159 = vmatprep.subr.bf16.mxu1 %v9937_v26  ;;  %v10674_v1 = vadd.f32 %v10636_v47, %v10564_v62  ;;  %v3644_v2 = vmul.f32 %v3588_v56, %v3588_v56 }
 0x1db   :  { %v9564_v12 = vpop.f32.mrf.mxu0 }
 0x1dc   :  { %v10656_v12 = vpop.permute.xlu1 %3479  ;;  %v10684_v20 = vpop.permute.xlu0 %3504  ;;  %v3589_v62 = vmul.f32 %v10648_v57, %v10674_v1 }
 0x1dd   :  { %v10638_v28 = vpop.f32.mrf.mxu0  ;;  %9160 = vmatpush3.bf16.msra.mxu1 %v9938_v22  ;;  %11400 = vst [vmem:[#allocation13_spill] sm:$0xff] %v10684_v20 }
 0x1de   :  { %9333 = vmatprep.subr.bf16.mxu1 %v9951_v9  ;;  %v10682_v51 = vadd.f32 %v10638_v28, %v10567_v10 }
 0x1df   :  { %v9565_v14 = vpop.f32.mrf.mxu0 }
 0x1e0   :  { %v9942_v14 = vld [vmem:[#allocation7 + $0x88] sm:$0xff]   ;;  %v10660_v44 = vpop.permute.xlu1 %3489  ;;  %v3590_v8 = vmul.f32 %v10656_v12, %v10682_v51 }
 0x1e1   :  { %v10640_v40 = vpop.f32.mrf.mxu0  ;;  %9252 = vmatpush3.bf16.msra.mxu0 %v9942_v14  ;;  %v10704_v14 = vpop.permute.xlu0 %3514 }
 0x1e3   :  { %v9568_v55 = vpop.f32.mrf.mxu0 }
 0x1e4   :  { %v9943_v55 = vld [vmem:[#allocation7 + $0xc0] sm:$0xff]   ;;  %v10676_v61 = vpop.permute.xlu1 %3499 }
 0x1e5   :  { %v10642_v41 = vpop.f32.mrf.mxu0  ;;  %9253 = vmatprep.subr.bf16.mxu0 %v9943_v55 }
 0x1e6   :  { %v10698_v10 = vadd.f32 %v10642_v41, %v10573_v36 }
 0x1e7   :  { %v9569_v16 = vpop.f32.mrf.mxu0 }
 0x1e8   :  { %v9944_v16 = vld [vmem:[#allocation7 + $0x80] sm:$0xff]   ;;  %v10700_v28 = vpop.permute.xlu1 %3509  ;;  %v3592_v36 = vmul.f32 %v10660_v44, %v10698_v10 }
 0x1e9   :  { %v10646_v50 = vpop.f32.mrf.mxu0  ;;  %9254 = vmatpush3.bf16.msra.mxu0 %v9944_v16 }
 0x1eb   :  { %v9572_v60 = vpop.f32.mrf.mxu0 }
 0x1ec   :  { %v10670_v60 = vadd.f32 %v10632_v13, %v10557_v43  ;;  %v10692_v13 = vadd.f32 %v10640_v40, %v10570_v24  ;;  %v10708_v24 = vadd.f32 %v10646_v50, %v10576_v39  ;;  %v10718_v39 = vpop.permute.xlu1 %3519 }
 0x1ed   :  { %v10650_v33 = vpop.f32.mrf.mxu0 }
 0x1ee   :  { %v3587_v43 = vmul.f32 %v10644_v25, %v10670_v60  ;;  %v3591_v26 = vmul.f32 %v10658_v7, %v10692_v13  ;;  %v10714_v41 = vadd.f32 %v10650_v33, %v10579_v59 }
 0x1ef   :  { %v9573_v54 = vpop.f32.mrf.mxu0 }
 0x1f0   :  { %v3643_v3 = vmul.f32 %v3587_v43, %v3587_v43  ;;  %v3612_v55 = vadd.f32 %v3588_v56, %v3587_v43  ;;  %v3594_v59 = vmul.f32 %v10676_v61, %v10714_v41 }
 0x1f1   :  { %v10654_v42 = vpop.f32.mrf.mxu0 }
 0x1f2   :  { %v3668_v22 = vadd.f32 %v3644_v2, %v3643_v3  ;;  %v10722_v50 = vadd.f32 %v10654_v42, %v10582_v5  ;;  %v3648_v3 = vmul.f32 %v3592_v36, %v3592_v36 }
 0x1f3   :  { %v9576_v29 = vpop.f32.mrf.mxu0 }
 0x1f4   :  { %v3645_v29 = vmul.f32 %v3589_v62, %v3589_v62  ;;  %v3595_v5 = vmul.f32 %v10684_v20, %v10722_v50 }
 0x1f5   :  { %v3395_v30 = vpop.f32.mrf.mxu0 }
 0x1f6   :  { %v3669_v9 = vadd.f32 %v3668_v22, %v3645_v29  ;;  %v10729_v33 = vadd.f32 %v3395_v30, %v10585_v18  ;;  %v3651_v20 = vmul.f32 %v3595_v5, %v3595_v5 }
 0x1f7   :  { %v9577_v38 = vpop.f32.mrf.mxu0 }
 0x1f8   :  { %v3646_v38 = vmul.f32 %v3590_v8, %v3590_v8  ;;  %v3596_v18 = vmul.f32 %v10700_v28, %v10729_v33 }
 0x1f9   :  { %v3400_v49 = vpop.f32.mrf.mxu0 }
 0x1fa   :  { %v3670_v2 = vadd.f32 %v3669_v9, %v3646_v38  ;;  %v10734_v42 = vadd.f32 %v3400_v49, %v10588_v31  ;;  %v3650_v9 = vmul.f32 %v3594_v59, %v3594_v59 }
 0x1fb   :  { %v9580_v35 = vpop.f32.mrf.mxu0 }
 0x1fc   :  { %v3613_v35 = vadd.f32 %v3612_v55, %v3589_v62  ;;  %v3597_v31 = vmul.f32 %v10704_v14, %v10734_v42 }
 0x1fd   :  { %v3403_v52 = vpop.f32.mrf.mxu0 }
 0x1fe   :  { %v3614_v43 = vadd.f32 %v3613_v35, %v3590_v8  ;;  %v10741_v30 = vadd.f32 %v3403_v52, %v10591_v45 }
 0x1ff   :  { %v9581_v63 = vpop.f32.mrf.mxu0 }
 0x200   :  { %v3647_v63 = vmul.f32 %v3591_v26, %v3591_v26  ;;  %v3615_v29 = vadd.f32 %v3614_v43, %v3591_v26  ;;  %v3598_v45 = vmul.f32 %v10718_v39, %v10741_v30 }
 0x201   :  { %v3408_v54 = vpop.f32.mrf.mxu0 }
 0x202   :  { %v3671_v55 = vadd.f32 %v3670_v2, %v3647_v63  ;;  %v3616_v38 = vadd.f32 %v3615_v29, %v3592_v36  ;;  %v10748_v49 = vadd.f32 %v3408_v54, %v10594_v58 }
 0x203   :  { %v9584_v47 = vpop.f32.mrf.mxu0 }
 0x204   :  { %v3593_v47 = vmul.f32 %v10662_v46, %v10708_v24  ;;  %v3672_v35 = vadd.f32 %v3671_v55, %v3648_v3  ;;  %v3652_v55 = vmul.f32 %v3596_v18, %v3596_v18 }
 0x205   :  { %v3411_v0 = vpop.f32.mrf.mxu0 }
 0x206   :  { %v3649_v22 = vmul.f32 %v3593_v47, %v3593_v47  ;;  %v3617_v63 = vadd.f32 %v3616_v38, %v3593_v47  ;;  %v10753_v52 = vadd.f32 %v3411_v0, %v10597_v4 }
 0x207   :  { %v9585_v40 = vpop.f32.mrf.mxu0 }
 0x208   :  { %v10724_v40 = vpop.permute.xlu0 %3524  ;;  %v3673_v43 = vadd.f32 %v3672_v35, %v3649_v22  ;;  %v3618_v3 = vadd.f32 %v3617_v63, %v3594_v59  ;;  %v3653_v35 = vmul.f32 %v3597_v31, %v3597_v31 }
 0x209   :  { %v3416_v16 = vpop.f32.mrf.mxu0  ;;  %v3599_v58 = vmul.f32 %v10724_v40, %v10748_v49 }
 0x20a   :  { %v3674_v29 = vadd.f32 %v3673_v43, %v3650_v9  ;;  %v3619_v22 = vadd.f32 %v3618_v3, %v3595_v5  ;;  %v10760_v54 = vadd.f32 %v3416_v16, %v10600_v17 }
 0x20b   :  { %v9588_v56 = vpop.f32.mrf.mxu0 }
 0x20c   :  { %v10736_v56 = vpop.permute.xlu1 %3529  ;;  %v10743_v2 = vpop.permute.xlu0 %3534  ;;  %v3620_v9 = vadd.f32 %v3619_v22, %v3596_v18 }
 0x20d   :  { %v3419_v62 = vpop.f32.mrf.mxu0  ;;  %11401 = vst [vmem:[#allocation14_spill] sm:$0xff] %v10743_v2  ;;  %v3600_v4 = vmul.f32 %v10736_v56, %v10753_v52  ;;  %v3601_v17 = vmul.f32 %v10743_v2, %v10760_v54 }
 0x20e   :  { %v3621_v5 = vadd.f32 %v3620_v9, %v3597_v31 }
 0x20f   :  { %v9589_v8 = vpop.f32.mrf.mxu0  ;;  %v3657_v2 = vmul.f32 %v3601_v17, %v3601_v17 }
 0x210   :  { %v3675_v8 = vadd.f32 %v3674_v29, %v3651_v20  ;;  %v10755_v38 = vpop.permute.xlu1 %3539  ;;  %v10762_v63 = vpop.permute.xlu0 %3544  ;;  %v10767_v20 = vadd.f32 %v3419_v62, %v10603_v34  ;;  %v3655_v29 = vmul.f32 %v3599_v58, %v3599_v58  ;;  %v3622_v22 = vadd.f32 %v3621_v5, %v3598_v45 }
 0x211   :  { %v3424_v26 = vpop.f32.mrf.mxu0  ;;  %11402 = vst [vmem:[#allocation15_spill] sm:$0xff] %v10762_v63 }
 0x212   :  { %v3676_v43 = vadd.f32 %v3675_v8, %v3652_v55  ;;  %v10772_v16 = vadd.f32 %v3424_v26, %v10606_v27  ;;  %v3602_v34 = vmul.f32 %v10755_v38, %v10767_v20 }
 0x213   :  { %v9592_v36 = vpop.f32.mrf.mxu0 }
 0x214   :  { %v3654_v36 = vmul.f32 %v3598_v45, %v3598_v45  ;;  %v3677_v3 = vadd.f32 %v3676_v43, %v3653_v35  ;;  %v10774_v55 = vpop.permute.xlu1 %3549  ;;  %v3623_v35 = vadd.f32 %v3622_v22, %v3599_v58  ;;  %v10781_v9 = vpop.permute.xlu0 %3554  ;;  %v3603_v27 = vmul.f32 %v10762_v63, %v10772_v16 }
 0x215   :  { %v3427_v47 = vpop.f32.mrf.mxu0  ;;  %11403 = vst [vmem:[#allocation16_spill] sm:$0xff] %v10781_v9 }
 0x216   :  { %v3678_v8 = vadd.f32 %v3677_v3, %v3654_v36  ;;  %v10779_v62 = vadd.f32 %v3427_v47, %v10609_v53  ;;  %v3624_v45 = vadd.f32 %v3623_v35, %v3600_v4  ;;  %v3658_v3 = vmul.f32 %v3602_v34, %v3602_v34 }
 0x217   :  { %v9593_v59 = vpop.f32.mrf.mxu0 }
 0x218   :  { %v3656_v59 = vmul.f32 %v3600_v4, %v3600_v4  ;;  %v3679_v43 = vadd.f32 %v3678_v8, %v3655_v29  ;;  %v3604_v53 = vmul.f32 %v10774_v55, %v10779_v62  ;;  %v10793_v29 = vpop.permute.xlu1 %3559  ;;  %v3659_v8 = vmul.f32 %v3603_v27, %v3603_v27 }
 0x219   :  { %v3432_v0 = vpop.f32.mrf.mxu0  ;;  %11404 = vst [vmem:[#allocation17_spill] sm:$0xff] %v10793_v29 }
 0x21a   :  { %v10786_v36 = vadd.f32 %v3432_v0, %v10612_v19  ;;  %v3680_v5 = vadd.f32 %v3679_v43, %v3656_v59  ;;  %v10800_v0 = vpop.permute.xlu0 %3564  ;;  %v3660_v35 = vmul.f32 %v3604_v53, %v3604_v53 }
 0x21b   :  { %v9596_v18 = vpop.f32.mrf.mxu0  ;;  %11405 = vst [vmem:[#allocation18_spill] sm:$0xff] %v10800_v0 }
 0x21c   :  { %v3625_v18 = vadd.f32 %v3624_v45, %v3601_v17  ;;  %v3681_v22 = vadd.f32 %v3680_v5, %v3657_v2  ;;  %v3605_v19 = vmul.f32 %v10781_v9, %v10786_v36  ;;  %v10809_v5 = vpop.permute.xlu1 %3569 }
 0x21d   :  { %v3435_v31 = vpop.f32.mrf.mxu0  ;;  %11406 = vst [vmem:[#allocation19_spill] sm:$0xff] %v10809_v5 }
 0x21e   :  { %v10791_v58 = vadd.f32 %v3435_v31, %v10615_v21  ;;  %v3682_v59 = vadd.f32 %v3681_v22, %v3658_v3  ;;  %v3661_v45 = vmul.f32 %v3605_v19, %v3605_v19 }
 0x21f   :  { %v9597_v26 = vpop.f32.mrf.mxu0 }
 0x220   :  { %v3626_v26 = vadd.f32 %v3625_v18, %v3602_v34  ;;  %v3606_v21 = vmul.f32 %v10793_v29, %v10791_v58 }
 0x221   :  { %v3440_v47 = vpop.f32.mrf.mxu0 }
 0x222   :  { %v10798_v4 = vadd.f32 %v3440_v47, %v10618_v32  ;;  %v3627_v43 = vadd.f32 %v3626_v26, %v3603_v27  ;;  %v3662_v22 = vmul.f32 %v3606_v21, %v3606_v21 }
 0x223   :  { %v9600_v63 = vpop.f32.mrf.mxu0 }
 0x224   :  { %v3683_v63 = vadd.f32 %v3682_v59, %v3659_v8  ;;  %v3628_v31 = vadd.f32 %v3627_v43, %v3604_v53  ;;  %v3607_v32 = vmul.f32 %v10800_v0, %v10798_v4 }
 0x225   :  { %v3443_v17 = vpop.f32.mrf.mxu0 }
 0x226   :  { %v10805_v2 = vadd.f32 %v3443_v17, %v10621_v37  ;;  %v3684_v47 = vadd.f32 %v3683_v63, %v3660_v35  ;;  %v3629_v18 = vadd.f32 %v3628_v31, %v3605_v19  ;;  %v10816_v37 = vpop.permute.xlu0 %3574  ;;  %v3663_v17 = vmul.f32 %v3607_v32, %v3607_v32 }
 0x227   :  { %v9601_v34 = vpop.f32.mrf.mxu0  ;;  %11408 = vst [vmem:[#allocation21_spill] sm:$0xff] %v10816_v37 }
 0x228   :  { %v3608_v27 = vmul.f32 %v10809_v5, %v10805_v2  ;;  %v3685_v53 = vadd.f32 %v3684_v47, %v3661_v45  ;;  %v3630_v59 = vadd.f32 %v3629_v18, %v3606_v21  ;;  %v10823_v5 = vpop.permute.xlu1 %3579 }
 0x229   :  { %v3448_v3 = vpop.f32.mrf.mxu0  ;;  %11410 = vst [vmem:[#allocation23_spill] sm:$0xff] %v10823_v5 }
 0x22a   :  { %v10814_v26 = vadd.f32 %v3448_v3, %v10624_v48  ;;  %v3686_v35 = vadd.f32 %v3685_v53, %v3662_v22  ;;  %v3631_v63 = vadd.f32 %v3630_v59, %v3607_v32  ;;  %v3664_v19 = vmul.f32 %v3608_v27, %v3608_v27  ;;  %v10828_v32 = vpop.permute.xlu0 %3584 }
 0x22b   :  { %v9604_v8 = vpop.f32.mrf.mxu0  ;;  %11411 = vst [vmem:[#allocation24_spill] sm:$0xff] %v10828_v32 }
 0x22c   :  { %11407 = vst [vmem:[#allocation20_spill] sm:$0xff] %v10814_v26  ;;  %v3609_v43 = vmul.f32 %v10816_v37, %v10814_v26  ;;  %v3687_v3 = vadd.f32 %v3686_v35, %v3663_v17  ;;  %v3632_v0 = vadd.f32 %v3631_v63, %v3608_v27 }
 0x22d   :  { %v3451_v34 = vpop.f32.mrf.mxu0 }
 0x22e   :  { %v10821_v31 = vadd.f32 %v3451_v34, %v10627_v15  ;;  %v3665_v29 = vmul.f32 %v3609_v43, %v3609_v43  ;;  %v3688_v47 = vadd.f32 %v3687_v3, %v3664_v19  ;;  %v3633_v18 = vadd.f32 %v3632_v0, %v3609_v43 }
 0x22f   :  { %v9605_v48 = vpop.f32.mrf.mxu0 }
 0x230   :  { %11409 = vst [vmem:[#allocation22_spill] sm:$0xff] %v10821_v31  ;;  %v3610_v21 = vmul.f32 %v10823_v5, %v10821_v31  ;;  %v3689_v15 = vadd.f32 %v3688_v47, %v3665_v29 }
 0x231   :  { %v3456_v45 = vpop.f32.mrf.mxu0 }
 0x232   :  { %v3666_v8 = vmul.f32 %v3610_v21, %v3610_v21  ;;  %v3457_v22 = vadd.f32 %v3456_v45, %v10630_v11  ;;  %v3634_v59 = vadd.f32 %v3633_v18, %v3610_v21 }
 0x233   :  { %v9608_v53 = vpop.f32.mrf.mxu0 }
 0x234   :  { %v3611_v34 = vmul.f32 %v10828_v32, %v3457_v22  ;;  %v3690_v17 = vadd.f32 %v3689_v15, %v3666_v8  ;;  %v10016_v8 = vld [vmem:[#allocation7 + $0x1f8] sm:$0xff]  }
 0x235   :  { %v3459_v48 = vpop.f32.mrf.mxu0  ;;  %9427 = vmatprep.subr.bf16.mxu0 %v10016_v8 }
 0x236   :  { %v3635_v27 = vadd.f32 %v3634_v59, %v3611_v34  ;;  %v3667_v35 = vmul.f32 %v3611_v34, %v3611_v34  ;;  %v3709_v34 = vlaneseq }
 0x237   :  { %v9609_v63 = vpop.f32.mrf.mxu0 }
 0x238   :  { %v3636_v37 = vrot.slane %v3635_v27, 4  ;;  %v3691_v5 = vadd.f32 %v3690_v17, %v3667_v35 }
 0x23a   :  { %v3637_v31 = vadd.f32 %v3636_v37, %v3635_v27  ;;  %v3692_v19 = vrot.slane %v3691_v5, 4  ;;  %v3710_v37 = vshrl.u32 %v3709_v34, 7 }
 0x23c   :  { %v3638_v0 = vrot.slane %v3637_v31, 2  ;;  %v3693_v43 = vadd.f32 %v3692_v19, %v3691_v5  ;;  %v3701_v5 = vld [vmem:[%s11372_s3] sm:$0x1] }
 0x23e   :  { %v3639_v3 = vadd.f32 %v3638_v0, %v3637_v31  ;;  %v3694_v11 = vrot.slane %v3693_v43, 2  ;;  %v10834_v31 = vsub.s32 0, %v3710_v37 }
 0x240   :  { %v3640_v45 = vrot.slane %v3639_v3, 1  ;;  %v3695_v26 = vadd.f32 %v3694_v11, %v3693_v43  ;;  %11412 = vst [vmem:[#allocation25_spill] sm:$0xff] %v10834_v31 }
 0x242   :  { %v3641_v53 = vadd.f32 %v3640_v45, %v3639_v3  ;;  %v3696_v29 = vrot.slane %v3695_v26, 1 }
 0x244   :  { %v3642_v21 = vmul.f32 0.0078125, %v3641_v53  ;;  %v3697_v47 = vadd.f32 %v3696_v29, %v3695_v26  ;;  %v3705_v26 = vld [vmem:[%s11373_s4] sm:$0x1] }
 0x246   :  { %v3698_v18 = vmul.f32 0.0078125, %v3697_v47  ;;  %v3699_v48 = vmul.f32 %v3642_v21, %v3642_v21 }
 0x248   :  { %v3700_v15 = vsub.f32 %v3698_v18, %v3699_v48 }
 0x24a   :  { %v3702_v59 = vadd.f32 1e-05, %v3700_v15 }
 0x24c   :  { %10149 = vrsqrt.f32 %v3702_v59 }
 0x259   :  { %v10150_v17 = vpop.eup %10149 }
 0x25a   :  { %v3704_v27 = vmul.f32 %v10150_v17, %v3701_v5 }
 0x25c   :  { %v3706_v35 = vmul.f32 %v3704_v27, %v3642_v21  ;;  %v10840_v63 = vrot.slane %v3704_v27, %v10834_v31 }
 0x25e   :  { %v3707_v19 = vsub.f32 %v3705_v26, %v3706_v35  ;;  %v3738_v0 = vmul.f32 %v10840_v63, %v3457_v22  ;;  %v3714_v43 = vmul.f32 %v10840_v63, %v10670_v60  ;;  %v3715_v3 = vmul.f32 %v10840_v63, %v10666_v23 }
 0x25f   :  { %v3716_v11 = vmul.f32 %v10840_v63, %v10674_v1  ;;  %v3717_v45 = vmul.f32 %v10840_v63, %v10682_v51  ;;  %v3718_v53 = vmul.f32 %v10840_v63, %v10692_v13  ;;  %v3719_v29 = vmul.f32 %v10840_v63, %v10698_v10 }
 0x260   :  { %v10856_v22 = vrot.slane %v3707_v19, %v10834_v31  ;;  %v3720_v60 = vmul.f32 %v10840_v63, %v10708_v24  ;;  %v3721_v23 = vmul.f32 %v10840_v63, %v10714_v41  ;;  %v3722_v1 = vmul.f32 %v10840_v63, %v10722_v50 }
 0x261   :  { %v3723_v51 = vmul.f32 %v10840_v63, %v10729_v33  ;;  %v3724_v13 = vmul.f32 %v10840_v63, %v10734_v42  ;;  %v3725_v10 = vmul.f32 %v10840_v63, %v10741_v30  ;;  %v3726_v21 = vmul.f32 %v10840_v63, %v10748_v49 }
 0x262   :  { %v3769_v24 = vadd.f32 %v10856_v22, %v3738_v0  ;;  %v3745_v47 = vadd.f32 %v10856_v22, %v3714_v43  ;;  %v3746_v41 = vadd.f32 %v10856_v22, %v3715_v3  ;;  %v3747_v50 = vadd.f32 %v10856_v22, %v3716_v11 }
 0x263   :  { %v3748_v18 = vadd.f32 %v10856_v22, %v3717_v45  ;;  %v3749_v33 = vadd.f32 %v10856_v22, %v3718_v53  ;;  %v3750_v42 = vadd.f32 %v10856_v22, %v3719_v29  ;;  %v3751_v48 = vadd.f32 %v10856_v22, %v3720_v60 }
 0x264   :  { %v3794_v30 = vmax.f32 %v3769_v24, 0.0  ;;  %v3770_v8 = vmax.f32 %v3745_v47, 0.0  ;;  %v3771_v15 = vmax.f32 %v3746_v41, 0.0  ;;  %v3772_v49 = vmax.f32 %v3747_v50, 0.0 }
 0x265   :  { %v3773_v59 = vmax.f32 %v3748_v18, 0.0  ;;  %v3774_v34 = vmax.f32 %v3749_v33, 0.0  ;;  %v3775_v37 = vmax.f32 %v3750_v42, 0.0  ;;  %v3776_v5 = vmax.f32 %v3751_v48, 0.0  ;;  %v11413_v48 = vld [vmem:[#allocation13_spill] sm:$0xff] }
 0x266   :  { %v3819_v17 = vmul.f32 %v3794_v30, %v10828_v32  ;;  %v3795_v27 = vmul.f32 %v3770_v8, %v10644_v25  ;;  %v3796_v26 = vmul.f32 %v3771_v15, %v10652_v6  ;;  %v3797_v35 = vmul.f32 %v3772_v49, %v10648_v57 }
 0x267   :  { %v3798_v19 = vmul.f32 %v3773_v59, %v10656_v12  ;;  %v3799_v0 = vmul.f32 %v3774_v34, %v10658_v7  ;;  %v3800_v43 = vmul.f32 %v3775_v37, %v10660_v44  ;;  %v3801_v3 = vmul.f32 %v3776_v5, %v10662_v46 }
 0x268   :  { %3844 = vst [vmem:[#allocation2 + $0xcb] sm:$0xff] %v3819_v17  ;;  %3820 = vst [vmem:[#allocation2 + $0xb] sm:$0xff] %v3795_v27  ;;  %v3752_v11 = vadd.f32 %v10856_v22, %v3721_v23  ;;  %v3753_v45 = vadd.f32 %v10856_v22, %v3722_v1  ;;  %v3754_v53 = vadd.f32 %v10856_v22, %v3723_v51 }
 0x269   :  { %3821 = vst [vmem:[#allocation2 + $0x13] sm:$0xff] %v3796_v26  ;;  %3822 = vst [vmem:[#allocation2 + $0x1b] sm:$0xff] %v3797_v35  ;;  %v3755_v29 = vadd.f32 %v10856_v22, %v3724_v13  ;;  %v3756_v60 = vadd.f32 %v10856_v22, %v3725_v10  ;;  %v3757_v24 = vadd.f32 %v10856_v22, %v3726_v21 }
 0x26a   :  { %3823 = vst [vmem:[#allocation2 + $0x23] sm:$0xff] %v3798_v19  ;;  %3824 = vst [vmem:[#allocation2 + $0x2b] sm:$0xff] %v3799_v0  ;;  %v3727_v47 = vmul.f32 %v10840_v63, %v10753_v52  ;;  %v3728_v23 = vmul.f32 %v10840_v63, %v10760_v54  ;;  %v3777_v41 = vmax.f32 %v3752_v11, 0.0  ;;  %v3778_v1 = vmax.f32 %v3753_v45, 0.0  ;;  %v11414_v19 = vld [vmem:[#allocation14_spill] sm:$0xff] }
 0x26b   :  { %3825 = vst [vmem:[#allocation2 + $0x33] sm:$0xff] %v3800_v43  ;;  %3826 = vst [vmem:[#allocation2 + $0x3b] sm:$0xff] %v3801_v3  ;;  %v3779_v50 = vmax.f32 %v3754_v53, 0.0  ;;  %v3780_v51 = vmax.f32 %v3755_v29, 0.0  ;;  %v3781_v18 = vmax.f32 %v3756_v60, 0.0  ;;  %v3782_v13 = vmax.f32 %v3757_v24, 0.0 }
 0x26c   :  { %v3758_v33 = vadd.f32 %v10856_v22, %v3727_v47  ;;  %v3759_v42 = vadd.f32 %v10856_v22, %v3728_v23  ;;  %v3802_v10 = vmul.f32 %v3777_v41, %v10676_v61  ;;  %v3803_v21 = vmul.f32 %v3778_v1, %v11413_v48 }
 0x26d   :  { %v3804_v30 = vmul.f32 %v3779_v50, %v10700_v28  ;;  %v3805_v52 = vmul.f32 %v3780_v51, %v10704_v14  ;;  %v3806_v54 = vmul.f32 %v3781_v18, %v10718_v39  ;;  %v3807_v8 = vmul.f32 %v3782_v13, %v10724_v40 }
 0x26e   :  { %v3783_v15 = vmax.f32 %v3758_v33, 0.0  ;;  %v3784_v49 = vmax.f32 %v3759_v42, 0.0  ;;  %3827 = vst [vmem:[#allocation2 + $0x43] sm:$0xff] %v3802_v10  ;;  %3828 = vst [vmem:[#allocation2 + $0x4b] sm:$0xff] %v3803_v21  ;;  %v3729_v59 = vmul.f32 %v10840_v63, %v10767_v20  ;;  %v3730_v34 = vmul.f32 %v10840_v63, %v10772_v16 }
 0x26f   :  { %3829 = vst [vmem:[#allocation2 + $0x53] sm:$0xff] %v3804_v30  ;;  %3830 = vst [vmem:[#allocation2 + $0x5b] sm:$0xff] %v3805_v52  ;;  %v10912_v37 = vmul.f32 %v10840_v63, %v10779_v62  ;;  %v10916_v5 = vmul.f32 %v10840_v63, %v10786_v36  ;;  %v3846_v17 = vld [vmem:[#allocation2 + $0x8] sm:$0xff]  ;;  %v10922_v16 = vmul.f32 %v10840_v63, %v10791_v58 }
 0x270   :  { %v3997_v27 = vld [vmem:[#allocation2 + $0x9] sm:$0xff]  ;;  %3831 = vst [vmem:[#allocation2 + $0x63] sm:$0xff] %v3806_v54  ;;  %3832 = vst [vmem:[#allocation2 + $0x6b] sm:$0xff] %v3807_v8  ;;  %v3808_v35 = vmul.f32 %v3783_v15, %v10736_v56  ;;  %v3809_v20 = vmul.f32 %v3784_v49, %v11414_v19  ;;  %v10926_v62 = vmul.f32 %v10840_v63, %v10798_v4  ;;  %v4299_v3 = vld [vmem:[#allocation2 + $0x12] sm:$0xff] }
 0x271   :  { %v4148_v26 = vld [vmem:[#allocation2 + $0xa] sm:$0xff]  ;;  %v8524_v0 = vpack.c.bf16 %v3846_v17, %v3846_v17  ;;  %v8549_v36 = vpack.c.bf16 %v3997_v27, %v3997_v27  ;;  %v3848_v45 = vld [vmem:[#allocation2 + $0x18] sm:$0xff]  ;;  %v3760_v53 = vadd.f32 %v10856_v22, %v3729_v59  ;;  %v8599_v29 = vpack.c.bf16 %v4299_v3, %v4299_v3  ;;  %v4301_v51 = vld [vmem:[#allocation2 + $0x22] sm:$0xff] }
 0x272   :  { %v8574_v43 = vpack.c.bf16 %v4148_v26, %v4148_v26  ;;  %v3847_v11 = vld [vmem:[#allocation2 + $0x10] sm:$0xff]  ;;  %v8526_v24 = vpack.c.bf16 %v3848_v45, %v3848_v45  ;;  %v3999_v23 = vld [vmem:[#allocation2 + $0x19] sm:$0xff]  ;;  %3833 = vst [vmem:[#allocation2 + $0x73] sm:$0xff] %v3808_v35  ;;  %3834 = vst [vmem:[#allocation2 + $0x7b] sm:$0xff] %v3809_v20  ;;  %v3761_v58 = vadd.f32 %v10856_v22, %v3730_v34 }
 0x273   :  { %v8525_v60 = vpack.c.bf16 %v3847_v11, %v3847_v11  ;;  %v3998_v47 = vld [vmem:[#allocation2 + $0x11] sm:$0xff]  ;;  %v4150_v41 = vld [vmem:[#allocation2 + $0x1a] sm:$0xff]  ;;  %3972 = vst [vmem:[#allocation3 + $0x24] sm:$0xf] %v8524_v0  ;;  %4123 = vst [vmem:[#allocation3 + $0x28] sm:$0xf] %v8549_v36  ;;  %v8551_v1 = vpack.c.bf16 %v3999_v23, %v3999_v23  ;;  %v8601_v42 = vpack.c.bf16 %v4301_v51, %v4301_v51 }
 0x274   :  { %4274 = vst [vmem:[#allocation3 + $0x2c] sm:$0xf] %v8574_v43  ;;  %4424 = vst [vmem:[#allocation3 + $0xc] sm:$0xf] %v8574_v43  ;;  %v8550_v4 = vpack.c.bf16 %v3998_v47, %v3998_v47  ;;  %v8576_v50 = vpack.c.bf16 %v4150_v41, %v4150_v41  ;;  %v3849_v18 = vld [vmem:[#allocation2 + $0x20] sm:$0xff]  ;;  %v3850_v13 = vld [vmem:[#allocation2 + $0x28] sm:$0xff]  ;;  %v3762_v41 = vadd.f32 %v10856_v22, %v10912_v37 }
 0x275   :  { %v3785_v33 = vmax.f32 %v3760_v53, 0.0  ;;  %4425 = vst [vmem:[#allocation3 + $0x30] sm:$0xf] %v8599_v29  ;;  %3973 = vst [vmem:[#allocation3 + $0x48] sm:$0xf] %v8525_v60  ;;  %v8527_v10 = vpack.c.bf16 %v3849_v18, %v3849_v18  ;;  %v8528_v21 = vpack.c.bf16 %v3850_v13, %v3850_v13  ;;  %v4000_v30 = vld [vmem:[#allocation2 + $0x21] sm:$0xff] }
 0x276   :  { %3974 = vst [vmem:[#allocation3 + $0x6c] sm:$0xf] %v8526_v24  ;;  %4275 = vst [vmem:[#allocation3 + $0x50] sm:$0xf] %v8599_v29  ;;  %v4001_v52 = vld [vmem:[#allocation2 + $0x29] sm:$0xff]  ;;  %v3786_v8 = vmax.f32 %v3761_v58, 0.0  ;;  %v8552_v15 = vpack.c.bf16 %v4000_v30, %v4000_v30 }
 0x277   :  { %v4152_v54 = vld [vmem:[#allocation2 + $0x2a] sm:$0xff]  ;;  %4124 = vst [vmem:[#allocation3 + $0x4c] sm:$0xf] %v8550_v4  ;;  %4125 = vst [vmem:[#allocation3 + $0x70] sm:$0xf] %v8551_v1  ;;  %v8553_v49 = vpack.c.bf16 %v4001_v52, %v4001_v52  ;;  %v4303_v34 = vld [vmem:[#allocation2 + $0x32] sm:$0xff]  ;;  %v3810_v26 = vmul.f32 %v3785_v33, %v10755_v38  ;;  %v3763_v33 = vadd.f32 %v10856_v22, %v10916_v5 }
 0x278   :  { %4276 = vst [vmem:[#allocation3 + $0x74] sm:$0xf] %v8576_v50  ;;  %4426 = vst [vmem:[#allocation3 + $0x54] sm:$0xf] %v8576_v50  ;;  %v8578_v59 = vpack.c.bf16 %v4152_v54, %v4152_v54  ;;  %v3851_v17 = vld [vmem:[#allocation2 + $0x30] sm:$0xff]  ;;  %v3852_v27 = vld [vmem:[#allocation2 + $0x38] sm:$0xff]  ;;  %v8603_v35 = vpack.c.bf16 %v4303_v34, %v4303_v34 }
 0x279   :  { %4427 = vst [vmem:[#allocation3 + $0x78] sm:$0xf] %v8601_v42  ;;  %3975 = vst [vmem:[#allocation3 + $0x90] sm:$0xf] %v8527_v10  ;;  %v8529_v20 = vpack.c.bf16 %v3851_v17, %v3851_v17  ;;  %v8530_v0 = vpack.c.bf16 %v3852_v27, %v3852_v27  ;;  %v4002_v36 = vld [vmem:[#allocation2 + $0x31] sm:$0xff]  ;;  %v4003_v43 = vld [vmem:[#allocation2 + $0x39] sm:$0xff] }
 0x27a   :  { %3976 = vst [vmem:[#allocation3 + $0xb4] sm:$0xf] %v8528_v21  ;;  %4277 = vst [vmem:[#allocation3 + $0x98] sm:$0xf] %v8601_v42  ;;  %v4154_v3 = vld [vmem:[#allocation2 + $0x3a] sm:$0xff]  ;;  %v8554_v53 = vpack.c.bf16 %v4002_v36, %v4002_v36  ;;  %v8555_v29 = vpack.c.bf16 %v4003_v43, %v4003_v43  ;;  %v4305_v24 = vld [vmem:[#allocation2 + $0x42] sm:$0xff] }
 0x27b   :  { %v11415_v11 = vld [vmem:[#allocation15_spill] sm:$0xff]  ;;  %4126 = vst [vmem:[#allocation3 + $0x94] sm:$0xf] %v8552_v15  ;;  %4127 = vst [vmem:[#allocation3 + $0xb8] sm:$0xf] %v8553_v49  ;;  %v8580_v60 = vpack.c.bf16 %v4154_v3, %v4154_v3  ;;  %v3854_v23 = vld [vmem:[#allocation2 + $0x48] sm:$0xff]  ;;  %v8605_v4 = vpack.c.bf16 %v4305_v24, %v4305_v24 }
 0x27c   :  { %v3811_v45 = vmul.f32 %v3786_v8, %v11415_v11  ;;  %4278 = vst [vmem:[#allocation3 + $0xbc] sm:$0xf] %v8578_v59  ;;  %4428 = vst [vmem:[#allocation3 + $0x9c] sm:$0xf] %v8578_v59  ;;  %v3853_v47 = vld [vmem:[#allocation2 + $0x40] sm:$0xff]  ;;  %v8532_v50 = vpack.c.bf16 %v3854_v23, %v3854_v23  ;;  %v4005_v18 = vld [vmem:[#allocation2 + $0x49] sm:$0xff] }
 0x27d   :  { %3835 = vst [vmem:[#allocation2 + $0x83] sm:$0xff] %v3810_v26  ;;  %v9957_v58 = vld [vmem:[#allocation7 + $0x138] sm:$0xff]   ;;  %4429 = vst [vmem:[#allocation3 + $0xc0] sm:$0xf] %v8603_v35  ;;  %v8531_v1 = vpack.c.bf16 %v3853_v47, %v3853_v47  ;;  %v4156_v13 = vld [vmem:[#allocation2 + $0x4a] sm:$0xff]  ;;  %v8557_v42 = vpack.c.bf16 %v4005_v18, %v4005_v18  ;;  %v3787_v54 = vmax.f32 %v3762_v41, 0.0 }
 0x27e   :  { %3977 = vst [vmem:[#allocation3 + $0xd8] sm:$0xf] %v8529_v20  ;;  %3978 = vst [vmem:[#allocation3 + $0xfc] sm:$0xf] %v8530_v0  ;;  %v4004_v51 = vld [vmem:[#allocation2 + $0x41] sm:$0xff]  ;;  %v8582_v10 = vpack.c.bf16 %v4156_v13, %v4156_v13  ;;  %v4307_v21 = vld [vmem:[#allocation2 + $0x52] sm:$0xff]  ;;  %v3765_v20 = vadd.f32 %v10856_v22, %v10926_v62  ;;  %v3735_v0 = vmul.f32 %v10840_v63, %v10805_v2 }
 0x27f   :  { %4279 = vst [vmem:[#allocation3 + $0xe0] sm:$0xf] %v8603_v35  ;;  %3836 = vst [vmem:[#allocation2 + $0x8b] sm:$0xff] %v3811_v45  ;;  %v8556_v37 = vpack.c.bf16 %v4004_v51, %v4004_v51  ;;  %v3855_v30 = vld [vmem:[#allocation2 + $0x50] sm:$0xff]  ;;  %v3856_v52 = vld [vmem:[#allocation2 + $0x58] sm:$0xff]  ;;  %v8607_v59 = vpack.c.bf16 %v4307_v21, %v4307_v21  ;;  %v3788_v17 = vmax.f32 %v3763_v33, 0.0  ;;  %v3812_v26 = vmul.f32 %v3787_v54, %v10774_v55 }
 0x280   :  { %4128 = vst [vmem:[#allocation3 + $0xdc] sm:$0xf] %v8554_v53  ;;  %4129 = vst [vmem:[#allocation3 + $0x100] sm:$0xf] %v8555_v29  ;;  %v9945_v8 = vld [vmem:[#allocation3] ss:$36 sps:$4 sm:$0xff]   ;;  %v8533_v5 = vpack.c.bf16 %v3855_v30, %v3855_v30  ;;  %v8534_v34 = vpack.c.bf16 %v3856_v52, %v3856_v52  ;;  %v3764_v35 = vadd.f32 %v10856_v22, %v10922_v16 }
 0x281   :  { %4280 = vst [vmem:[#allocation3 + $0x104] sm:$0xf] %v8580_v60  ;;  %4430 = vst [vmem:[#allocation3 + $0xe4] sm:$0xf] %v8580_v60  ;;  %v9947_v15 = vld [vmem:[#allocation3 + $0x4] ss:$36 sps:$4 sm:$0xff]   ;;  %v3813_v3 = vmul.f32 %v3788_v17, %v10781_v9  ;;  %v3766_v47 = vadd.f32 %v10856_v22, %v3735_v0 }
 0x282   :  { %v9964_v49 = vld [vmem:[#allocation7 + $0x170] sm:$0xff]   ;;  %4431 = vst [vmem:[#allocation3 + $0x108] sm:$0xf] %v8605_v4  ;;  %3979 = vst [vmem:[#allocation3 + $0x120] sm:$0xf] %v8531_v1  ;;  %6521 = vmatprep.mubr.bf16.mxu1 %v9947_v15  ;;  %v10023_v45 = vld [vmem:[#allocation7 + $0x1b8] sm:$0xff]  }
 0x283   :  { %3980 = vst [vmem:[#allocation3 + $0x144] sm:$0xf] %v8532_v50  ;;  %4281 = vst [vmem:[#allocation3 + $0x128] sm:$0xf] %v8605_v4  ;;  %v9948_v27 = vld [vmem:[#allocation3 + $0x8] ss:$36 sps:$4 sm:$0xff]   ;;  %6522 = vmatmul.mubr.bf16.vlgmr.msra.gmra.mxu1 %v9945_v8 }
 0x284   :  { %4130 = vst [vmem:[#allocation3 + $0x124] sm:$0xf] %v8556_v37  ;;  %4131 = vst [vmem:[#allocation3 + $0x148] sm:$0xf] %v8557_v42  ;;  %v9950_v36 = vld [vmem:[#allocation3 + $0xc] ss:$36 sps:$4 sm:$0xff]   ;;  %9334 = vmatpush3.bf16.msra.mxu1 %v9957_v58 }
 0x285   :  { %4282 = vst [vmem:[#allocation3 + $0x14c] sm:$0xf] %v8582_v10  ;;  %4432 = vst [vmem:[#allocation3 + $0x12c] sm:$0xf] %v8582_v10  ;;  %v9965_v43 = vld [vmem:[#allocation7 + $0x130] sm:$0xff]   ;;  %v11416_v53 = vld [vmem:[#allocation20_spill] sm:$0xff]  ;;  %6657 = vmatprep.mubr.bf16.mxu0 %v9950_v36  ;;  %9335 = vmatprep.subr.bf16.mxu1 %v9964_v49 }
 0x286   :  { %4433 = vst [vmem:[#allocation3 + $0x150] sm:$0xf] %v8607_v59  ;;  %3981 = vst [vmem:[#allocation3 + $0x168] sm:$0xf] %v8533_v5  ;;  %v3736_v29 = vmul.f32 %v10840_v63, %v11416_v53  ;;  %v11417_v16 = vld [vmem:[#allocation22_spill] sm:$0xff]  ;;  %v3789_v2 = vmax.f32 %v3764_v35, 0.0  ;;  %6658 = vmatmul.mubr.bf16.vlgmr.msra.gmra.mxu0 %v9948_v27 }
 0x287   :  { %3982 = vst [vmem:[#allocation3 + $0x18c] sm:$0xf] %v8534_v34  ;;  %4283 = vst [vmem:[#allocation3 + $0x170] sm:$0xf] %v8607_v59  ;;  %v3737_v60 = vmul.f32 %v10840_v63, %v11417_v16  ;;  %v9952_v62 = vld [vmem:[#allocation3 + $0x4c] ss:$36 sps:$4 sm:$0xff]   ;;  %9428 = vmatpush3.bf16.msra.mxu0 %v10023_v45 }
 0x288   :  { %3837 = vst [vmem:[#allocation2 + $0x93] sm:$0xff] %v3812_v26  ;;  %v3790_v24 = vmax.f32 %v3765_v20, 0.0  ;;  %v9956_v23 = vld [vmem:[#allocation3 + $0x54] ss:$36 sps:$4 sm:$0xff]   ;;  %3838 = vst [vmem:[#allocation2 + $0x9b] sm:$0xff] %v3813_v3  ;;  %v3767_v4 = vadd.f32 %v10856_v22, %v3736_v29  ;;  %v5214_v50 = vld [vmem:[#allocation3 + $0x48] sm:$0xff]  ;;  %6529 = vmatprep.mubr.bf16.mxu1 %v9952_v62  ;;  %9336 = vmatpush3.bf16.msra.mxu1 %v9965_v43 }
 0x289   :  { %v10024_v41 = vld [vmem:[#allocation7 + $0x1f0] sm:$0xff]   ;;  %v3768_v1 = vadd.f32 %v10856_v22, %v3737_v60  ;;  %v9978_v63 = vld [vmem:[#allocation7 + $0x168] sm:$0xff]   ;;  %v3791_v37 = vmax.f32 %v3766_v47, 0.0  ;;  %6665 = vmatprep.mubr.bf16.mxu0 %v9956_v23  ;;  %v11420_v21 = vld [vmem:[#allocation19_spill] sm:$0xff] }
 0x28a   :  { %v11418_v51 = vld [vmem:[#allocation17_spill] sm:$0xff]  ;;  %v11419_v13 = vld [vmem:[#allocation18_spill] sm:$0xff]  ;;  %v3792_v10 = vmax.f32 %v3767_v4, 0.0  ;;  %v9986_v54 = vld [vmem:[#allocation7 + $0x160] sm:$0xff]   ;;  %9429 = vmatprep.subr.bf16.mxu0 %v10024_v41  ;;  %9337 = vmatprep.subr.bf16.mxu1 %v9978_v63 }
 0x28b   :  { %v3814_v18 = vmul.f32 %v3789_v2, %v11418_v51  ;;  %v3815_v33 = vmul.f32 %v3790_v24, %v11419_v13  ;;  %v5219_v42 = vld [vmem:[#allocation3 + $0x6c] sm:$0xff]  ;;  %v3793_v58 = vmax.f32 %v3768_v1, 0.0  ;;  %v3816_v30 = vmul.f32 %v3791_v37, %v11420_v21  ;;  %v10025_v22 = vld [vmem:[#allocation7 + $0x1b0] sm:$0xff]   ;;  %v11422_v59 = vld [vmem:[#allocation23_spill] sm:$0xff] }
 0x28c   :  { %v9979_v52 = vld [vmem:[#allocation7 + $0x128] sm:$0xff]   ;;  %v8118_v34 = vcombine.low %v5214_v50, %v5219_v42  ;;  %v9960_v27 = vld [vmem:[#allocation3 + $0x94] ss:$36 sps:$4 sm:$0xff]   ;;  %v9987_v26 = vld [vmem:[#allocation7 + $0x120] sm:$0xff]   ;;  %9430 = vmatpush3.bf16.msra.mxu0 %v10025_v22 }
 0x28d   :  { %3839 = vst [vmem:[#allocation2 + $0xa3] sm:$0xff] %v3814_v18  ;;  %3840 = vst [vmem:[#allocation2 + $0xab] sm:$0xff] %v3815_v33  ;;  %v11421_v8 = vld [vmem:[#allocation21_spill] sm:$0xff]  ;;  %v3818_v5 = vmul.f32 %v3793_v58, %v11422_v59  ;;  %v10000_v20 = vld [vmem:[#allocation7 + $0x158] sm:$0xff]   ;;  %9338 = vmatpush3.bf16.msra.mxu1 %v9979_v52 }
 0x28e   :  { %v3817_v15 = vmul.f32 %v3792_v10, %v11421_v8  ;;  %3841 = vst [vmem:[#allocation2 + $0xb3] sm:$0xff] %v3816_v30  ;;  %v10028_v49 = vld [vmem:[#allocation7 + $0x1e8] sm:$0xff]   ;;  %6530 = vmatmul.mubr.bf16.gmra.mxu1 %v8118_v34  ;;  %v9963_v0 = vld [vmem:[#allocation3 + $0x9c] ss:$36 sps:$4 sm:$0xff]   ;;  %v10036_v43 = vld [vmem:[#allocation7 + $0x1e0] sm:$0xff]   ;;  %9339 = vmatprep.subr.bf16.mxu1 %v9986_v54 }
 0x28f   :  { %v10035_v17 = vld [vmem:[#allocation7 + $0x1a8] sm:$0xff]   ;;  %3843 = vst [vmem:[#allocation2 + $0xc3] sm:$0xff] %v3818_v5  ;;  %6537 = vmatprep.mubr.bf16.mxu1 %v9960_v27  ;;  %v4007_v3 = vld [vmem:[#allocation2 + $0x59] sm:$0xff]  ;;  %v4309_v29 = vld [vmem:[#allocation2 + $0x62] sm:$0xff]  ;;  %9431 = vmatprep.subr.bf16.mxu0 %v10028_v49 }
 0x290   :  { %3842 = vst [vmem:[#allocation2 + $0xbb] sm:$0xff] %v3817_v15  ;;  %v9954_v35 = vld [vmem:[#allocation3 + $0x50] ss:$36 sps:$4 sm:$0xff]   ;;  %v4158_v53 = vld [vmem:[#allocation2 + $0x5a] sm:$0xff]  ;;  %v10956_v16 = vld [vmem:[#allocation7 + $0x1a0] sm:$0xff]   ;;  %v8559_v60 = vpack.c.bf16 %v4007_v3, %v4007_v3  ;;  %v8609_v2 = vpack.c.bf16 %v4309_v29, %v4309_v29  ;;  %9432 = vmatpush3.bf16.msra.mxu0 %v10035_v17 }
 0x291   :  { %v4006_v36 = vld [vmem:[#allocation2 + $0x51] sm:$0xff]  ;;  %6666 = vmatmul.mubr.bf16.gmra.mxu0 %v9954_v35  ;;  %v8584_v62 = vpack.c.bf16 %v4158_v53, %v4158_v53  ;;  %v3857_v24 = vld [vmem:[#allocation2 + $0x60] sm:$0xff]  ;;  %v3858_v47 = vld [vmem:[#allocation2 + $0x68] sm:$0xff]  ;;  %9340 = vmatpush3.bf16.msra.mxu1 %v9987_v26 }
 0x292   :  { %v8558_v45 = vpack.c.bf16 %v4006_v36, %v4006_v36  ;;  %6673 = vmatprep.mubr.bf16.mxu0 %v9963_v0  ;;  %v4008_v23 = vld [vmem:[#allocation2 + $0x61] sm:$0xff]  ;;  %v9958_v4 = vld [vmem:[#allocation3 + $0x90] ss:$36 sps:$4 sm:$0xff]   ;;  %v8535_v1 = vpack.c.bf16 %v3857_v24, %v3857_v24  ;;  %v8536_v50 = vpack.c.bf16 %v3858_v47, %v3858_v47  ;;  %4133 = vst [vmem:[#allocation3 + $0x190] sm:$0xf] %v8559_v60  ;;  %v3860_v54 = vld [vmem:[#allocation2 + $0x78] sm:$0xff] }
 0x293   :  { %v10958_v41 = vld [vmem:[#allocation7 + $0x118] sm:$0xff]   ;;  %v4009_v63 = vld [vmem:[#allocation2 + $0x69] sm:$0xff]  ;;  %v8560_v18 = vpack.c.bf16 %v4008_v23, %v4008_v23  ;;  %v4311_v37 = vld [vmem:[#allocation2 + $0x72] sm:$0xff]  ;;  %4284 = vst [vmem:[#allocation3 + $0x194] sm:$0xf] %v8584_v62  ;;  %9433 = vmatprep.subr.bf16.mxu0 %v10036_v43  ;;  %v8538_v17 = vpack.c.bf16 %v3860_v54, %v3860_v54  ;;  %9341 = vmatprep.subr.bf16.mxu1 %v10000_v20 }
 0x294   :  { %4132 = vst [vmem:[#allocation3 + $0x16c] sm:$0xf] %v8558_v45  ;;  %v4160_v33 = vld [vmem:[#allocation2 + $0x6a] sm:$0xff]  ;;  %v10960_v42 = vld [vmem:[#allocation7 + $0x150] sm:$0xff]   ;;  %v9968_v10 = vld [vmem:[#allocation3 + $0xdc] ss:$36 sps:$4 sm:$0xff]   ;;  %v8561_v58 = vpack.c.bf16 %v4009_v63, %v4009_v63  ;;  %v8611_v22 = vpack.c.bf16 %v4311_v37, %v4311_v37  ;;  %9434 = vmatpush3.bf16.msra.mxu0 %v10956_v16 }
 0x295   :  { %4434 = vst [vmem:[#allocation3 + $0x174] sm:$0xf] %v8584_v62  ;;  %4435 = vst [vmem:[#allocation3 + $0x198] sm:$0xf] %v8609_v2  ;;  %v8586_v30 = vpack.c.bf16 %v4160_v33, %v4160_v33  ;;  %v3859_v52 = vld [vmem:[#allocation2 + $0x70] sm:$0xff]  ;;  %v10962_v5 = vld [vmem:[#allocation7 + $0x1d8] sm:$0xff]   ;;  %9342 = vmatpush3.bf16.msra.mxu1 %v10958_v41 }
 0x296   :  { %4285 = vst [vmem:[#allocation3 + $0x1b8] sm:$0xf] %v8609_v2  ;;  %v4010_v15 = vld [vmem:[#allocation2 + $0x71] sm:$0xff]  ;;  %3983 = vst [vmem:[#allocation3 + $0x1b0] sm:$0xf] %v8535_v1  ;;  %v8537_v49 = vpack.c.bf16 %v3859_v52, %v3859_v52  ;;  %v4011_v27 = vld [vmem:[#allocation2 + $0x79] sm:$0xff]  ;;  %6538 = vmatmul.mubr.bf16.gmra.mxu1 %v9958_v4  ;;  %9343 = vmatprep.subr.bf16.mxu1 %v10960_v42 }
 0x297   :  { %v9961_v34 = vld [vmem:[#allocation3 + $0x98] ss:$36 sps:$4 sm:$0xff]   ;;  %3984 = vst [vmem:[#allocation3 + $0x1d4] sm:$0xf] %v8536_v50  ;;  %4134 = vst [vmem:[#allocation3 + $0x1b4] sm:$0xf] %v8560_v18  ;;  %v8562_v35 = vpack.c.bf16 %v4010_v15, %v4010_v15  ;;  %v8563_v43 = vpack.c.bf16 %v4011_v27, %v4011_v27  ;;  %6545 = vmatprep.mubr.bf16.mxu1 %v9968_v10  ;;  %9435 = vmatprep.subr.bf16.mxu0 %v10962_v5 }
 0x298   :  { %v4162_v0 = vld [vmem:[#allocation2 + $0x7a] sm:$0xff]  ;;  %v4313_v26 = vld [vmem:[#allocation2 + $0x82] sm:$0xff]  ;;  %4135 = vst [vmem:[#allocation3 + $0x1d8] sm:$0xf] %v8561_v58  ;;  %4286 = vst [vmem:[#allocation3 + $0x1dc] sm:$0xf] %v8586_v30 }
 0x299   :  { %v10964_v36 = vld [vmem:[#allocation7 + $0x198] sm:$0xff]   ;;  %v9971_v3 = vld [vmem:[#allocation3 + $0xe4] ss:$36 sps:$4 sm:$0xff]   ;;  %4436 = vst [vmem:[#allocation3 + $0x1bc] sm:$0xf] %v8586_v30  ;;  %v8588_v45 = vpack.c.bf16 %v4162_v0, %v4162_v0  ;;  %v8613_v53 = vpack.c.bf16 %v4313_v26, %v4313_v26  ;;  %v10015_v2 = vld [vmem:[#allocation7 + $0x110] sm:$0xff]   ;;  %6674 = vmatmul.mubr.bf16.gmra.mxu0 %v9961_v34 }
 0x29a   :  { %4437 = vst [vmem:[#allocation3 + $0x1e0] sm:$0xf] %v8611_v22  ;;  %4287 = vst [vmem:[#allocation3 + $0x200] sm:$0xf] %v8611_v22  ;;  %v3861_v29 = vld [vmem:[#allocation2 + $0x80] sm:$0xff]  ;;  %v3862_v60 = vld [vmem:[#allocation2 + $0x88] sm:$0xff]  ;;  %6681 = vmatprep.mubr.bf16.mxu0 %v9971_v3  ;;  %9436 = vmatpush3.bf16.msra.mxu0 %v10964_v36 }
 0x29b   :  { %v4012_v62 = vld [vmem:[#allocation2 + $0x81] sm:$0xff]  ;;  %v10966_v24 = vld [vmem:[#allocation7 + $0x1d0] sm:$0xff]   ;;  %3985 = vst [vmem:[#allocation3 + $0x1f8] sm:$0xf] %v8537_v49  ;;  %3986 = vst [vmem:[#allocation3 + $0x21c] sm:$0xf] %v8538_v17  ;;  %v8539_v20 = vpack.c.bf16 %v3861_v29, %v3861_v29  ;;  %v8540_v47 = vpack.c.bf16 %v3862_v60, %v3862_v60  ;;  %9344 = vmatpush3.bf16.msra.mxu1 %v10015_v2 }
 0x29c   :  { %4136 = vst [vmem:[#allocation3 + $0x1fc] sm:$0xf] %v8562_v35  ;;  %v4013_v23 = vld [vmem:[#allocation2 + $0x89] sm:$0xff]  ;;  %v8564_v1 = vpack.c.bf16 %v4012_v62, %v4012_v62  ;;  %v4315_v63 = vld [vmem:[#allocation2 + $0x92] sm:$0xff]  ;;  %4137 = vst [vmem:[#allocation3 + $0x220] sm:$0xf] %v8563_v43  ;;  %9437 = vmatprep.subr.bf16.mxu0 %v10966_v24 }
 0x29d   :  { %v4164_v50 = vld [vmem:[#allocation2 + $0x8a] sm:$0xff]  ;;  %4288 = vst [vmem:[#allocation3 + $0x224] sm:$0xf] %v8588_v45  ;;  %4438 = vst [vmem:[#allocation3 + $0x204] sm:$0xf] %v8588_v45  ;;  %v8565_v4 = vpack.c.bf16 %v4013_v23, %v4013_v23  ;;  %v8615_v37 = vpack.c.bf16 %v4315_v63, %v4315_v63  ;;  %v3864_v30 = vld [vmem:[#allocation2 + $0x98] sm:$0xff] }
 0x29e   :  { %v10026_v18 = vld [vmem:[#allocation7 + $0x148] sm:$0xff]   ;;  %4439 = vst [vmem:[#allocation3 + $0x228] sm:$0xf] %v8613_v53  ;;  %v8590_v33 = vpack.c.bf16 %v4164_v50, %v4164_v50  ;;  %4289 = vst [vmem:[#allocation3 + $0x248] sm:$0xf] %v8613_v53  ;;  %v8542_v16 = vpack.c.bf16 %v3864_v30, %v3864_v30  ;;  %v4015_v10 = vld [vmem:[#allocation2 + $0x99] sm:$0xff] }
 0x29f   :  { %v3863_v58 = vld [vmem:[#allocation2 + $0x90] sm:$0xff]  ;;  %3987 = vst [vmem:[#allocation3 + $0x240] sm:$0xf] %v8539_v20  ;;  %3988 = vst [vmem:[#allocation3 + $0x264] sm:$0xf] %v8540_v47  ;;  %v4166_v15 = vld [vmem:[#allocation2 + $0x9a] sm:$0xff]  ;;  %v8567_v41 = vpack.c.bf16 %v4015_v10, %v4015_v10  ;;  %9345 = vmatprep.subr.bf16.mxu1 %v10026_v18 }
 0x2a0   :  { %v4014_v22 = vld [vmem:[#allocation2 + $0x91] sm:$0xff]  ;;  %4138 = vst [vmem:[#allocation3 + $0x244] sm:$0xf] %v8564_v1  ;;  %v8541_v52 = vpack.c.bf16 %v3863_v58, %v3863_v58  ;;  %v4317_v49 = vld [vmem:[#allocation2 + $0xa2] sm:$0xff]  ;;  %4139 = vst [vmem:[#allocation3 + $0x268] sm:$0xf] %v8565_v4  ;;  %v8592_v17 = vpack.c.bf16 %v4166_v15, %v4166_v15 }
 0x2a1   :  { %v8566_v54 = vpack.c.bf16 %v4014_v22, %v4014_v22  ;;  %4290 = vst [vmem:[#allocation3 + $0x26c] sm:$0xf] %v8590_v33  ;;  %4440 = vst [vmem:[#allocation3 + $0x24c] sm:$0xf] %v8590_v33  ;;  %v8617_v34 = vpack.c.bf16 %v4317_v49, %v4317_v49  ;;  %v3865_v27 = vld [vmem:[#allocation2 + $0xa0] sm:$0xff]  ;;  %v3866_v35 = vld [vmem:[#allocation2 + $0xa8] sm:$0xff] }
 0x2a2   :  { %4441 = vst [vmem:[#allocation3 + $0x270] sm:$0xf] %v8615_v37  ;;  %4291 = vst [vmem:[#allocation3 + $0x290] sm:$0xf] %v8615_v37  ;;  %v10027_v0 = vld [vmem:[#allocation7 + $0x108] sm:$0xff]   ;;  %v8543_v26 = vpack.c.bf16 %v3865_v27, %v3865_v27  ;;  %v8544_v43 = vpack.c.bf16 %v3866_v35, %v3866_v35  ;;  %v10044_v42 = vld [vmem:[#allocation7 + $0x140] sm:$0xff]  }
 0x2a3   :  { %3989 = vst [vmem:[#allocation3 + $0x288] sm:$0xf] %v8541_v52  ;;  %3990 = vst [vmem:[#allocation3 + $0x2ac] sm:$0xf] %v8542_v16  ;;  %v10047_v3 = vld [vmem:[#allocation7 + $0x190] sm:$0xff]   ;;  %v10048_v45 = vld [vmem:[#allocation7 + $0x1c8] sm:$0xff]   ;;  %9346 = vmatpush3.bf16.msra.mxu1 %v10027_v0 }
 0x2a4   :  { %4140 = vst [vmem:[#allocation3 + $0x28c] sm:$0xf] %v8566_v54  ;;  %4141 = vst [vmem:[#allocation3 + $0x2b0] sm:$0xf] %v8567_v41  ;;  %v9966_v53 = vld [vmem:[#allocation3 + $0xd8] ss:$36 sps:$4 sm:$0xff]   ;;  %9438 = vmatpush3.bf16.msra.mxu0 %v10047_v3  ;;  %9347 = vmatprep.subr.bf16.mxu1 %v10044_v42 }
 0x2a5   :  { %4292 = vst [vmem:[#allocation3 + $0x2b4] sm:$0xf] %v8592_v17  ;;  %4442 = vst [vmem:[#allocation3 + $0x294] sm:$0xf] %v8592_v17  ;;  %v9974_v5 = vld [vmem:[#allocation3 + $0x124] ss:$36 sps:$4 sm:$0xff]   ;;  %6546 = vmatmul.mubr.bf16.gmra.mxu1 %v9966_v53  ;;  %9439 = vmatprep.subr.bf16.mxu0 %v10048_v45 }
 0x2a6   :  { %4443 = vst [vmem:[#allocation3 + $0x2b8] sm:$0xf] %v8617_v34  ;;  %4293 = vst [vmem:[#allocation3 + $0x2d8] sm:$0xf] %v8617_v34  ;;  %v10045_v29 = vld [vmem:[#allocation7 + $0x100] sm:$0xff]   ;;  %v10052_v60 = vld [vmem:[#allocation7 + $0x188] sm:$0xff]   ;;  %6553 = vmatprep.mubr.bf16.mxu1 %v9974_v5 }
 0x2a7   :  { %3991 = vst [vmem:[#allocation3 + $0x2d0] sm:$0xf] %v8543_v26  ;;  %3992 = vst [vmem:[#allocation3 + $0x2f4] sm:$0xf] %v8544_v43  ;;  %v9969_v62 = vld [vmem:[#allocation3 + $0xe0] ss:$36 sps:$4 sm:$0xff]   ;;  %9348 = vmatpush3.bf16.msra.mxu1 %v10045_v29 }
 0x2a8   :  { %v10056_v36 = vld [vmem:[#allocation7 + $0x1c0] sm:$0xff]   ;;  %v9977_v20 = vld [vmem:[#allocation3 + $0x12c] ss:$36 sps:$4 sm:$0xff]   ;;  %6682 = vmatmul.mubr.bf16.gmra.mxu0 %v9969_v62  ;;  %v9985_v50 = vld [vmem:[#allocation3 + $0x174] ss:$36 sps:$4 sm:$0xff]  }
 0x2a9   :  { %6689 = vmatprep.mubr.bf16.mxu0 %v9977_v20  ;;  %9440 = vmatpush3.bf16.msra.mxu0 %v10052_v60  ;;  %v10057_v2 = vld [vmem:[#allocation7 + $0x180] sm:$0xff]   ;;  %v9982_v23 = vld [vmem:[#allocation3 + $0x16c] ss:$36 sps:$4 sm:$0xff]   ;;  %v3868_v52 = vld [vmem:[#allocation2 + $0xb8] sm:$0xff] }
 0x2aa   :  { %9441 = vmatprep.subr.bf16.mxu0 %v10056_v36  ;;  %v9972_v24 = vld [vmem:[#allocation3 + $0x120] ss:$36 sps:$4 sm:$0xff]   ;;  %v9975_v1 = vld [vmem:[#allocation3 + $0x128] ss:$36 sps:$4 sm:$0xff]   ;;  %v4319_v30 = vld [vmem:[#allocation2 + $0xb2] sm:$0xff]  ;;  %v8546_v54 = vpack.c.bf16 %v3868_v52, %v3868_v52 }
 0x2ab   :  { %v10974_v47 = vld [vmem:[#allocation2] sm:$0xff]  ;;  %v4017_v18 = vld [vmem:[#allocation2 + $0xa9] sm:$0xff]  ;;  %v8619_v16 = vpack.c.bf16 %v4319_v30, %v4319_v30  ;;  %v4018_v15 = vld [vmem:[#allocation2 + $0xb1] sm:$0xff] }
 0x2ac   :  { %9610 = vmatprep.subr.bf16.mxu1 %v10974_v47  ;;  %v4016_v63 = vld [vmem:[#allocation2 + $0xa1] sm:$0xff]  ;;  %v4168_v4 = vld [vmem:[#allocation2 + $0xaa] sm:$0xff]  ;;  %v8569_v37 = vpack.c.bf16 %v4017_v18, %v4017_v18  ;;  %v4019_v49 = vld [vmem:[#allocation2 + $0xb9] sm:$0xff]  ;;  %v8570_v34 = vpack.c.bf16 %v4018_v15, %v4018_v15  ;;  %3994 = vst [vmem:[#allocation3 + $0x33c] sm:$0xf] %v8546_v54 }
 0x2ad   :  { %6554 = vmatmul.mubr.bf16.gmra.mxu1 %v9972_v24  ;;  %9442 = vmatpush3.bf16.msra.mxu0 %v10057_v2  ;;  %v8568_v33 = vpack.c.bf16 %v4016_v63, %v4016_v63  ;;  %v8594_v58 = vpack.c.bf16 %v4168_v4, %v4168_v4  ;;  %v3867_v22 = vld [vmem:[#allocation2 + $0xb0] sm:$0xff]  ;;  %v4170_v41 = vld [vmem:[#allocation2 + $0xba] sm:$0xff]  ;;  %v9980_v17 = vld [vmem:[#allocation3 + $0x168] ss:$36 sps:$4 sm:$0xff]   ;;  %v8571_v27 = vpack.c.bf16 %v4019_v49, %v4019_v49 }
 0x2ae   :  { %6561 = vmatprep.mubr.bf16.mxu1 %v9982_v23  ;;  %v8545_v10 = vpack.c.bf16 %v3867_v22, %v3867_v22  ;;  %4143 = vst [vmem:[#allocation3 + $0x2f8] sm:$0xf] %v8569_v37  ;;  %v8596_v35 = vpack.c.bf16 %v4170_v41, %v4170_v41  ;;  %v4321_v0 = vld [vmem:[#allocation2 + $0xc2] sm:$0xff]  ;;  %v9990_v42 = vld [vmem:[#allocation3 + $0x1b4] ss:$36 sps:$4 sm:$0xff]   ;;  %v4322_v5 = vld [vmem:[#allocation2 + $0xca] sm:$0xff] }
 0x2af   :  { %4142 = vst [vmem:[#allocation3 + $0x2d4] sm:$0xf] %v8568_v33  ;;  %4294 = vst [vmem:[#allocation3 + $0x2fc] sm:$0xf] %v8594_v58  ;;  %v3869_v26 = vld [vmem:[#allocation2 + $0xc0] sm:$0xff]  ;;  %v8621_v3 = vpack.c.bf16 %v4321_v0, %v4321_v0  ;;  %v4449_v29 = vld [vmem:[#allocation2 + $0xb] sm:$0xff]  ;;  %v8622_v36 = vpack.c.bf16 %v4322_v5, %v4322_v5 }
 0x2b0   :  { %6690 = vmatmul.mubr.bf16.gmra.mxu0 %v9975_v1  ;;  %4444 = vst [vmem:[#allocation3 + $0x2dc] sm:$0xf] %v8594_v58  ;;  %v4020_v43 = vld [vmem:[#allocation2 + $0xc1] sm:$0xff]  ;;  %4445 = vst [vmem:[#allocation3 + $0x300] sm:$0xf] %v8619_v16  ;;  %v8547_v45 = vpack.c.bf16 %v3869_v26, %v3869_v26  ;;  %v4450_v60 = vld [vmem:[#allocation2 + $0x13] sm:$0xff]  ;;  %v8623_v20 = vpack.c.bf16 %v4449_v29, %v4449_v29 }
 0x2b1   :  { %6697 = vmatprep.mubr.bf16.mxu0 %v9985_v50  ;;  %3993 = vst [vmem:[#allocation3 + $0x318] sm:$0xf] %v8545_v10  ;;  %4295 = vst [vmem:[#allocation3 + $0x320] sm:$0xf] %v8619_v16  ;;  %v8572_v53 = vpack.c.bf16 %v4020_v43, %v4020_v43  ;;  %v9983_v62 = vld [vmem:[#allocation3 + $0x170] ss:$36 sps:$4 sm:$0xff]   ;;  %v8624_v2 = vpack.c.bf16 %v4450_v60, %v4450_v60 }
 0x2b2   :  { %4144 = vst [vmem:[#allocation3 + $0x31c] sm:$0xf] %v8570_v34  ;;  %4145 = vst [vmem:[#allocation3 + $0x340] sm:$0xf] %v8571_v27  ;;  %v4600_v24 = vld [vmem:[#allocation2 + $0xc] sm:$0xff]  ;;  %v4601_v23 = vld [vmem:[#allocation2 + $0x14] sm:$0xff] }
 0x2b3   :  { %4296 = vst [vmem:[#allocation3 + $0x344] sm:$0xf] %v8596_v35  ;;  %4446 = vst [vmem:[#allocation3 + $0x324] sm:$0xf] %v8596_v35  ;;  %v4752_v1 = vld [vmem:[#allocation2 + $0x1c] sm:$0xff]  ;;  %v8648_v63 = vpack.c.bf16 %v4600_v24, %v4600_v24  ;;  %v8649_v18 = vpack.c.bf16 %v4601_v23, %v4601_v23  ;;  %v4603_v10 = vld [vmem:[#allocation2 + $0x24] sm:$0xff] }
 0x2b4   :  { %v9993_v50 = vld [vmem:[#allocation3 + $0x1bc] ss:$36 sps:$4 sm:$0xff]   ;;  %4447 = vst [vmem:[#allocation3 + $0x348] sm:$0xf] %v8621_v3  ;;  %3995 = vst [vmem:[#allocation3 + $0x360] sm:$0xf] %v8547_v45  ;;  %v8674_v4 = vpack.c.bf16 %v4752_v1, %v4752_v1  ;;  %v8651_v49 = vpack.c.bf16 %v4603_v10, %v4603_v10 }
 0x2b5   :  { %4146 = vst [vmem:[#allocation3 + $0x364] sm:$0xf] %v8572_v53  ;;  %4297 = vst [vmem:[#allocation3 + $0x368] sm:$0xf] %v8621_v3  ;;  %v4902_v33 = vld [vmem:[#allocation2 + $0x15] sm:$0xff]  ;;  %v4903_v37 = vld [vmem:[#allocation2 + $0x1d] sm:$0xff]  ;;  %6562 = vmatmul.mubr.bf16.gmra.mxu1 %v9980_v17 }
 0x2b6   :  { %v4451_v58 = vld [vmem:[#allocation2 + $0x1b] sm:$0xff]  ;;  %4448 = vst [vmem:[#allocation3 + $0x36c] sm:$0xf] %v8622_v36  ;;  %4575 = vst [vmem:[#allocation3 + $0x10] sm:$0xf] %v8623_v20  ;;  %v8698_v30 = vpack.c.bf16 %v4902_v33, %v4902_v33  ;;  %v8699_v22 = vpack.c.bf16 %v4903_v37, %v4903_v37  ;;  %v4452_v52 = vld [vmem:[#allocation2 + $0x23] sm:$0xff]  ;;  %6569 = vmatprep.mubr.bf16.mxu1 %v9990_v42 }
 0x2b7   :  { %4576 = vst [vmem:[#allocation3 + $0x34] sm:$0xf] %v8624_v2  ;;  %v8625_v16 = vpack.c.bf16 %v4451_v58, %v4451_v58  ;;  %v4754_v54 = vld [vmem:[#allocation2 + $0x2c] sm:$0xff]  ;;  %4726 = vst [vmem:[#allocation3 + $0x14] sm:$0xf] %v8648_v63  ;;  %v8626_v15 = vpack.c.bf16 %v4452_v52, %v4452_v52  ;;  %v4605_v42 = vld [vmem:[#allocation2 + $0x34] sm:$0xff] }
 0x2b8   :  { %4727 = vst [vmem:[#allocation3 + $0x38] sm:$0xf] %v8649_v18  ;;  %4877 = vst [vmem:[#allocation3 + $0x18] sm:$0xf] %v8649_v18  ;;  %v8676_v41 = vpack.c.bf16 %v4754_v54, %v4754_v54  ;;  %v4904_v34 = vld [vmem:[#allocation2 + $0x25] sm:$0xff]  ;;  %v4905_v17 = vld [vmem:[#allocation2 + $0x2d] sm:$0xff]  ;;  %6698 = vmatmul.mubr.bf16.gmra.mxu0 %v9983_v62  ;;  %v8653_v53 = vpack.c.bf16 %v4605_v42, %v4605_v42 }
 0x2b9   :  { %4878 = vst [vmem:[#allocation3 + $0x3c] sm:$0xf] %v8674_v4  ;;  %4728 = vst [vmem:[#allocation3 + $0x5c] sm:$0xf] %v8674_v4  ;;  %v4453_v27 = vld [vmem:[#allocation2 + $0x2b] sm:$0xff]  ;;  %v8700_v35 = vpack.c.bf16 %v4904_v34, %v4904_v34  ;;  %v8701_v0 = vpack.c.bf16 %v4905_v17, %v4905_v17  ;;  %v4454_v26 = vld [vmem:[#allocation2 + $0x33] sm:$0xff]  ;;  %6705 = vmatprep.mubr.bf16.mxu0 %v9993_v50 }
 0x2ba   :  { %5028 = vst [vmem:[#allocation3 + $0x1c] sm:$0xf] %v8698_v30  ;;  %5029 = vst [vmem:[#allocation3 + $0x40] sm:$0xf] %v8699_v22  ;;  %v8627_v43 = vpack.c.bf16 %v4453_v27, %v4453_v27  ;;  %v4756_v3 = vld [vmem:[#allocation2 + $0x3c] sm:$0xff]  ;;  %v8628_v45 = vpack.c.bf16 %v4454_v26, %v4454_v26  ;;  %v4607_v58 = vld [vmem:[#allocation2 + $0x44] sm:$0xff] }
 0x2bb   :  { %4577 = vst [vmem:[#allocation3 + $0x58] sm:$0xf] %v8625_v16  ;;  %4578 = vst [vmem:[#allocation3 + $0x7c] sm:$0xf] %v8626_v15  ;;  %v8678_v5 = vpack.c.bf16 %v4756_v3, %v4756_v3  ;;  %v9988_v29 = vld [vmem:[#allocation3 + $0x1b0] ss:$36 sps:$4 sm:$0xff]   ;;  %v8655_v52 = vpack.c.bf16 %v4607_v58, %v4607_v58 }
 0x2bc   :  { %4729 = vst [vmem:[#allocation3 + $0x80] sm:$0xf] %v8651_v49  ;;  %4879 = vst [vmem:[#allocation3 + $0x60] sm:$0xf] %v8651_v49  ;;  %v9996_v60 = vld [vmem:[#allocation3 + $0x1fc] ss:$36 sps:$4 sm:$0xff]  }
 0x2bd   :  { %4880 = vst [vmem:[#allocation3 + $0x84] sm:$0xf] %v8676_v41  ;;  %4730 = vst [vmem:[#allocation3 + $0xa4] sm:$0xf] %v8676_v41  ;;  %v9991_v62 = vld [vmem:[#allocation3 + $0x1b8] ss:$36 sps:$4 sm:$0xff]   ;;  %6570 = vmatmul.mubr.bf16.gmra.mxu1 %v9988_v29 }
 0x2be   :  { %5030 = vst [vmem:[#allocation3 + $0x64] sm:$0xf] %v8700_v35  ;;  %5031 = vst [vmem:[#allocation3 + $0x88] sm:$0xf] %v8701_v0  ;;  %6577 = vmatprep.mubr.bf16.mxu1 %v9996_v60  ;;  %v9999_v36 = vld [vmem:[#allocation3 + $0x204] ss:$36 sps:$4 sm:$0xff]  }
 0x2bf   :  { %4579 = vst [vmem:[#allocation3 + $0xa0] sm:$0xf] %v8627_v43  ;;  %4580 = vst [vmem:[#allocation3 + $0xc4] sm:$0xf] %v8628_v45  ;;  %v9994_v20 = vld [vmem:[#allocation3 + $0x1f8] ss:$36 sps:$4 sm:$0xff]  }
 0x2c0   :  { %4731 = vst [vmem:[#allocation3 + $0xc8] sm:$0xf] %v8653_v53  ;;  %4881 = vst [vmem:[#allocation3 + $0xa8] sm:$0xf] %v8653_v53  ;;  %6706 = vmatmul.mubr.bf16.gmra.mxu0 %v9991_v62  ;;  %v9997_v2 = vld [vmem:[#allocation3 + $0x200] ss:$36 sps:$4 sm:$0xff]  }
 0x2c1   :  { %4882 = vst [vmem:[#allocation3 + $0xcc] sm:$0xf] %v8678_v5  ;;  %4732 = vst [vmem:[#allocation3 + $0xec] sm:$0xf] %v8678_v5  ;;  %6713 = vmatprep.mubr.bf16.mxu0 %v9999_v36  ;;  %v10004_v24 = vld [vmem:[#allocation3 + $0x244] ss:$36 sps:$4 sm:$0xff]  }
 0x2c2   :  { %v4906_v23 = vld [vmem:[#allocation2 + $0x35] sm:$0xff]  ;;  %v10007_v1 = vld [vmem:[#allocation3 + $0x24c] ss:$36 sps:$4 sm:$0xff]   ;;  %v4907_v50 = vld [vmem:[#allocation2 + $0x3d] sm:$0xff]  ;;  %4733 = vst [vmem:[#allocation3 + $0x110] sm:$0xf] %v8655_v52 }
 0x2c3   :  { %v8702_v63 = vpack.c.bf16 %v4906_v23, %v4906_v23  ;;  %v4455_v18 = vld [vmem:[#allocation2 + $0x3b] sm:$0xff]  ;;  %v8703_v4 = vpack.c.bf16 %v4907_v50, %v4907_v50  ;;  %v4456_v33 = vld [vmem:[#allocation2 + $0x43] sm:$0xff]  ;;  %v4758_v30 = vld [vmem:[#allocation2 + $0x4c] sm:$0xff]  ;;  %4883 = vst [vmem:[#allocation3 + $0xf0] sm:$0xf] %v8655_v52 }
 0x2c4   :  { %v8629_v37 = vpack.c.bf16 %v4455_v18, %v4455_v18  ;;  %v8630_v22 = vpack.c.bf16 %v4456_v33, %v4456_v33  ;;  %v8680_v16 = vpack.c.bf16 %v4758_v30, %v4758_v30  ;;  %v4908_v10 = vld [vmem:[#allocation2 + $0x45] sm:$0xff]  ;;  %v4909_v54 = vld [vmem:[#allocation2 + $0x4d] sm:$0xff]  ;;  %v4760_v35 = vld [vmem:[#allocation2 + $0x5c] sm:$0xff] }
 0x2c5   :  { %6578 = vmatmul.mubr.bf16.gmra.mxu1 %v9994_v20  ;;  %5032 = vst [vmem:[#allocation3 + $0xac] sm:$0xf] %v8702_v63  ;;  %v4457_v15 = vld [vmem:[#allocation2 + $0x4b] sm:$0xff]  ;;  %5033 = vst [vmem:[#allocation3 + $0xd0] sm:$0xf] %v8703_v4  ;;  %v8704_v49 = vpack.c.bf16 %v4908_v10, %v4908_v10  ;;  %v8705_v41 = vpack.c.bf16 %v4909_v54, %v4909_v54  ;;  %v4458_v34 = vld [vmem:[#allocation2 + $0x53] sm:$0xff]  ;;  %v8682_v42 = vpack.c.bf16 %v4760_v35, %v4760_v35 }
 0x2c6   :  { %6585 = vmatprep.mubr.bf16.mxu1 %v10004_v24  ;;  %4581 = vst [vmem:[#allocation3 + $0xe8] sm:$0xf] %v8629_v37  ;;  %v8631_v17 = vpack.c.bf16 %v4457_v15, %v4457_v15  ;;  %v4609_v27 = vld [vmem:[#allocation2 + $0x54] sm:$0xff]  ;;  %v10002_v0 = vld [vmem:[#allocation3 + $0x240] ss:$36 sps:$4 sm:$0xff]   ;;  %v8632_v26 = vpack.c.bf16 %v4458_v34, %v4458_v34  ;;  %v4461_v58 = vld [vmem:[#allocation2 + $0x6b] sm:$0xff] }
 0x2c7   :  { %4582 = vst [vmem:[#allocation3 + $0x10c] sm:$0xf] %v8630_v22  ;;  %4884 = vst [vmem:[#allocation3 + $0x114] sm:$0xf] %v8680_v16  ;;  %v8657_v43 = vpack.c.bf16 %v4609_v27, %v4609_v27  ;;  %v4910_v3 = vld [vmem:[#allocation2 + $0x55] sm:$0xff]  ;;  %v4911_v45 = vld [vmem:[#allocation2 + $0x5d] sm:$0xff]  ;;  %v8635_v22 = vpack.c.bf16 %v4461_v58, %v4461_v58 }
 0x2c8   :  { %6714 = vmatmul.mubr.bf16.gmra.mxu0 %v9997_v2  ;;  %4734 = vst [vmem:[#allocation3 + $0x134] sm:$0xf] %v8680_v16  ;;  %v10010_v53 = vld [vmem:[#allocation3 + $0x28c] ss:$36 sps:$4 sm:$0xff]   ;;  %5034 = vst [vmem:[#allocation3 + $0xf4] sm:$0xf] %v8704_v49  ;;  %v8706_v5 = vpack.c.bf16 %v4910_v3, %v4910_v3  ;;  %v8707_v29 = vpack.c.bf16 %v4911_v45, %v4911_v45 }
 0x2c9   :  { %6721 = vmatprep.mubr.bf16.mxu0 %v10007_v1  ;;  %5035 = vst [vmem:[#allocation3 + $0x118] sm:$0xf] %v8705_v41  ;;  %4583 = vst [vmem:[#allocation3 + $0x130] sm:$0xf] %v8631_v17  ;;  %v4459_v60 = vld [vmem:[#allocation2 + $0x5b] sm:$0xff]  ;;  %v4460_v62 = vld [vmem:[#allocation2 + $0x63] sm:$0xff] }
 0x2ca   :  { %v4611_v36 = vld [vmem:[#allocation2 + $0x64] sm:$0xff]  ;;  %4584 = vst [vmem:[#allocation3 + $0x154] sm:$0xf] %v8632_v26  ;;  %4735 = vst [vmem:[#allocation3 + $0x158] sm:$0xf] %v8657_v43  ;;  %v8633_v2 = vpack.c.bf16 %v4459_v60, %v4459_v60  ;;  %v8634_v24 = vpack.c.bf16 %v4460_v62, %v4460_v62  ;;  %v4762_v1 = vld [vmem:[#allocation2 + $0x6c] sm:$0xff] }
 0x2cb   :  { %v10005_v20 = vld [vmem:[#allocation3 + $0x248] ss:$36 sps:$4 sm:$0xff]   ;;  %4885 = vst [vmem:[#allocation3 + $0x138] sm:$0xf] %v8657_v43  ;;  %4886 = vst [vmem:[#allocation3 + $0x15c] sm:$0xf] %v8682_v42  ;;  %v8659_v23 = vpack.c.bf16 %v4611_v36, %v4611_v36  ;;  %v8684_v4 = vpack.c.bf16 %v4762_v1, %v4762_v1 }
 0x2cc   :  { %4736 = vst [vmem:[#allocation3 + $0x17c] sm:$0xf] %v8682_v42  ;;  %v4912_v50 = vld [vmem:[#allocation2 + $0x65] sm:$0xff]  ;;  %v4913_v63 = vld [vmem:[#allocation2 + $0x6d] sm:$0xff]  ;;  %5036 = vst [vmem:[#allocation3 + $0x13c] sm:$0xf] %v8706_v5 }
 0x2cd   :  { %v10013_v18 = vld [vmem:[#allocation3 + $0x294] ss:$36 sps:$4 sm:$0xff]   ;;  %5037 = vst [vmem:[#allocation3 + $0x160] sm:$0xf] %v8707_v29  ;;  %v8708_v33 = vpack.c.bf16 %v4912_v50, %v4912_v50  ;;  %v8709_v37 = vpack.c.bf16 %v4913_v63, %v4913_v63  ;;  %6586 = vmatmul.mubr.bf16.gmra.mxu1 %v10002_v0  ;;  %4585 = vst [vmem:[#allocation3 + $0x178] sm:$0xf] %v8633_v2 }
 0x2ce   :  { %v4462_v30 = vld [vmem:[#allocation2 + $0x73] sm:$0xff]  ;;  %4586 = vst [vmem:[#allocation3 + $0x19c] sm:$0xf] %v8634_v24  ;;  %4737 = vst [vmem:[#allocation3 + $0x1a0] sm:$0xf] %v8659_v23  ;;  %v4764_v10 = vld [vmem:[#allocation2 + $0x7c] sm:$0xff]  ;;  %6593 = vmatprep.mubr.bf16.mxu1 %v10010_v53 }
 0x2cf   :  { %4887 = vst [vmem:[#allocation3 + $0x180] sm:$0xf] %v8659_v23  ;;  %v8636_v52 = vpack.c.bf16 %v4462_v30, %v4462_v30  ;;  %v4613_v16 = vld [vmem:[#allocation2 + $0x74] sm:$0xff]  ;;  %4888 = vst [vmem:[#allocation3 + $0x1a4] sm:$0xf] %v8684_v4  ;;  %v8686_v49 = vpack.c.bf16 %v4764_v10, %v4764_v10  ;;  %v4915_v41 = vld [vmem:[#allocation2 + $0x7d] sm:$0xff] }
 0x2d0   :  { %v4914_v54 = vld [vmem:[#allocation2 + $0x75] sm:$0xff]  ;;  %5038 = vst [vmem:[#allocation3 + $0x184] sm:$0xf] %v8708_v33  ;;  %5039 = vst [vmem:[#allocation3 + $0x1a8] sm:$0xf] %v8709_v37  ;;  %v8661_v15 = vpack.c.bf16 %v4613_v16, %v4613_v16  ;;  %6722 = vmatmul.mubr.bf16.gmra.mxu0 %v10005_v20  ;;  %v8711_v27 = vpack.c.bf16 %v4915_v41, %v4915_v41  ;;  %v4464_v53 = vld [vmem:[#allocation2 + $0x83] sm:$0xff] }
 0x2d1   :  { %4738 = vst [vmem:[#allocation3 + $0x1c4] sm:$0xf] %v8684_v4  ;;  %v8710_v34 = vpack.c.bf16 %v4914_v54, %v4914_v54  ;;  %v4463_v17 = vld [vmem:[#allocation2 + $0x7b] sm:$0xff]  ;;  %4587 = vst [vmem:[#allocation3 + $0x1c0] sm:$0xf] %v8635_v22  ;;  %6729 = vmatprep.mubr.bf16.mxu0 %v10013_v18  ;;  %v8638_v29 = vpack.c.bf16 %v4464_v53, %v4464_v53  ;;  %v4615_v60 = vld [vmem:[#allocation2 + $0x84] sm:$0xff] }
 0x2d2   :  { %4588 = vst [vmem:[#allocation3 + $0x1e4] sm:$0xf] %v8636_v52  ;;  %v8637_v35 = vpack.c.bf16 %v4463_v17, %v4463_v17  ;;  %4739 = vst [vmem:[#allocation3 + $0x1e8] sm:$0xf] %v8661_v15  ;;  %v10008_v0 = vld [vmem:[#allocation3 + $0x288] ss:$36 sps:$4 sm:$0xff]   ;;  %v8663_v20 = vpack.c.bf16 %v4615_v60, %v4615_v60 }
 0x2d3   :  { %4889 = vst [vmem:[#allocation3 + $0x1c8] sm:$0xf] %v8661_v15  ;;  %4890 = vst [vmem:[#allocation3 + $0x1ec] sm:$0xf] %v8686_v49  ;;  %v10019_v26 = vld [vmem:[#allocation3 + $0x2d4] ss:$36 sps:$4 sm:$0xff]  }
 0x2d4   :  { %5040 = vst [vmem:[#allocation3 + $0x1cc] sm:$0xf] %v8710_v34  ;;  %4740 = vst [vmem:[#allocation3 + $0x20c] sm:$0xf] %v8686_v49  ;;  %v10011_v43 = vld [vmem:[#allocation3 + $0x290] ss:$36 sps:$4 sm:$0xff]  }
 0x2d5   :  { %5041 = vst [vmem:[#allocation3 + $0x1f0] sm:$0xf] %v8711_v27  ;;  %4589 = vst [vmem:[#allocation3 + $0x208] sm:$0xf] %v8637_v35  ;;  %6594 = vmatmul.mubr.bf16.gmra.mxu1 %v10008_v0  ;;  %v10022_v42 = vld [vmem:[#allocation3 + $0x2dc] ss:$36 sps:$4 sm:$0xff]  }
 0x2d6   :  { %6601 = vmatprep.mubr.bf16.mxu1 %v10019_v26  ;;  %v10017_v3 = vld [vmem:[#allocation3 + $0x2d0] ss:$36 sps:$4 sm:$0xff]   ;;  %v10031_v45 = vld [vmem:[#allocation3 + $0x31c] ss:$36 sps:$4 sm:$0xff]   ;;  %v10034_v36 = vld [vmem:[#allocation3 + $0x324] ss:$36 sps:$4 sm:$0xff]  }
 0x2d7   :  { %v10020_v5 = vld [vmem:[#allocation3 + $0x2d8] ss:$36 sps:$4 sm:$0xff]   ;;  %v4766_v62 = vld [vmem:[#allocation2 + $0x8c] sm:$0xff]  ;;  %4590 = vst [vmem:[#allocation3 + $0x22c] sm:$0xf] %v8638_v29  ;;  %v4468_v49 = vld [vmem:[#allocation2 + $0xa3] sm:$0xff] }
 0x2d8   :  { %6730 = vmatmul.mubr.bf16.gmra.mxu0 %v10011_v43  ;;  %v8688_v2 = vpack.c.bf16 %v4766_v62, %v4766_v62  ;;  %v4916_v24 = vld [vmem:[#allocation2 + $0x85] sm:$0xff]  ;;  %v4917_v23 = vld [vmem:[#allocation2 + $0x8d] sm:$0xff]  ;;  %4741 = vst [vmem:[#allocation3 + $0x230] sm:$0xf] %v8663_v20  ;;  %4891 = vst [vmem:[#allocation3 + $0x210] sm:$0xf] %v8663_v20  ;;  %v8642_v17 = vpack.c.bf16 %v4468_v49, %v4468_v49 }
 0x2d9   :  { %6737 = vmatprep.mubr.bf16.mxu0 %v10022_v42  ;;  %v8712_v1 = vpack.c.bf16 %v4916_v24, %v4916_v24  ;;  %v8713_v50 = vpack.c.bf16 %v4917_v23, %v4917_v23  ;;  %v4465_v63 = vld [vmem:[#allocation2 + $0x8b] sm:$0xff]  ;;  %v4466_v18 = vld [vmem:[#allocation2 + $0x93] sm:$0xff]  ;;  %v4768_v30 = vld [vmem:[#allocation2 + $0x9c] sm:$0xff] }
 0x2da   :  { %v4617_v4 = vld [vmem:[#allocation2 + $0x94] sm:$0xff]  ;;  %4892 = vst [vmem:[#allocation3 + $0x234] sm:$0xf] %v8688_v2  ;;  %v8639_v33 = vpack.c.bf16 %v4465_v63, %v4465_v63  ;;  %v8640_v37 = vpack.c.bf16 %v4466_v18, %v4466_v18  ;;  %4742 = vst [vmem:[#allocation3 + $0x254] sm:$0xf] %v8688_v2  ;;  %v4919_v52 = vld [vmem:[#allocation2 + $0x9d] sm:$0xff]  ;;  %v8690_v16 = vpack.c.bf16 %v4768_v30, %v4768_v30 }
 0x2db   :  { %v8665_v58 = vpack.c.bf16 %v4617_v4, %v4617_v4  ;;  %v4918_v22 = vld [vmem:[#allocation2 + $0x95] sm:$0xff]  ;;  %5042 = vst [vmem:[#allocation3 + $0x214] sm:$0xf] %v8712_v1  ;;  %5043 = vst [vmem:[#allocation3 + $0x238] sm:$0xf] %v8713_v50  ;;  %v8715_v54 = vpack.c.bf16 %v4919_v52, %v4919_v52  ;;  %v4619_v41 = vld [vmem:[#allocation2 + $0xa4] sm:$0xff] }
 0x2dc   :  { %v8714_v10 = vpack.c.bf16 %v4918_v22, %v4918_v22  ;;  %v4467_v15 = vld [vmem:[#allocation2 + $0x9b] sm:$0xff]  ;;  %4591 = vst [vmem:[#allocation3 + $0x250] sm:$0xf] %v8639_v33  ;;  %4592 = vst [vmem:[#allocation3 + $0x274] sm:$0xf] %v8640_v37  ;;  %v8667_v27 = vpack.c.bf16 %v4619_v41, %v4619_v41  ;;  %v4770_v35 = vld [vmem:[#allocation2 + $0xac] sm:$0xff] }
 0x2dd   :  { %6602 = vmatmul.mubr.bf16.gmra.mxu1 %v10017_v3  ;;  %4743 = vst [vmem:[#allocation3 + $0x278] sm:$0xf] %v8665_v58  ;;  %4893 = vst [vmem:[#allocation3 + $0x258] sm:$0xf] %v8665_v58  ;;  %v8641_v34 = vpack.c.bf16 %v4467_v15, %v4467_v15  ;;  %v4920_v0 = vld [vmem:[#allocation2 + $0xa5] sm:$0xff]  ;;  %v4921_v26 = vld [vmem:[#allocation2 + $0xad] sm:$0xff]  ;;  %v8692_v3 = vpack.c.bf16 %v4770_v35, %v4770_v35 }
 0x2de   :  { %6609 = vmatprep.mubr.bf16.mxu1 %v10031_v45  ;;  %v10029_v43 = vld [vmem:[#allocation3 + $0x318] ss:$36 sps:$4 sm:$0xff]   ;;  %v5324_v42 = vld [vmem:[#allocation3 + $0x360] sm:$0xff]  ;;  %4894 = vst [vmem:[#allocation3 + $0x27c] sm:$0xf] %v8690_v16  ;;  %v8716_v45 = vpack.c.bf16 %v4920_v0, %v4920_v0  ;;  %v8717_v53 = vpack.c.bf16 %v4921_v26, %v4921_v26  ;;  %v5325_v24 = vld [vmem:[#allocation3 + $0x368] sm:$0xff] }
 0x2df   :  { %5044 = vst [vmem:[#allocation3 + $0x25c] sm:$0xf] %v8714_v10  ;;  %5045 = vst [vmem:[#allocation3 + $0x280] sm:$0xf] %v8715_v54  ;;  %v4470_v29 = vld [vmem:[#allocation2 + $0xb3] sm:$0xff]  ;;  %v4772_v20 = vld [vmem:[#allocation2 + $0xbc] sm:$0xff]  ;;  %v8218_v4 = vcombine.high %v5324_v42, %v5324_v42  ;;  %v8220_v15 = vcombine.high %v5325_v24, %v5325_v24  ;;  %v8217_v49 = vcombine.low %v5324_v42, %v5324_v42 }
 0x2e0   :  { %6738 = vmatmul.mubr.bf16.gmra.mxu0 %v10020_v5  ;;  %4744 = vst [vmem:[#allocation3 + $0x29c] sm:$0xf] %v8690_v16  ;;  %v4469_v5 = vld [vmem:[#allocation2 + $0xab] sm:$0xff]  ;;  %4593 = vst [vmem:[#allocation3 + $0x298] sm:$0xf] %v8641_v34  ;;  %v8644_v62 = vpack.c.bf16 %v4470_v29, %v4470_v29  ;;  %v4922_v2 = vld [vmem:[#allocation2 + $0xb5] sm:$0xff]  ;;  %v8694_v1 = vpack.c.bf16 %v4772_v20, %v4772_v20  ;;  %v8219_v34 = vcombine.low %v5325_v24, %v5325_v24 }
 0x2e1   :  { %6745 = vmatprep.mubr.bf16.mxu0 %v10034_v36  ;;  %4594 = vst [vmem:[#allocation3 + $0x2bc] sm:$0xf] %v8642_v17  ;;  %4745 = vst [vmem:[#allocation3 + $0x2c0] sm:$0xf] %v8667_v27  ;;  %v8643_v60 = vpack.c.bf16 %v4469_v5, %v4469_v5  ;;  %v4621_v36 = vld [vmem:[#allocation2 + $0xb4] sm:$0xff]  ;;  %v4923_v50 = vld [vmem:[#allocation2 + $0xbd] sm:$0xff]  ;;  %v8718_v63 = vpack.c.bf16 %v4922_v2, %v4922_v2 }
 0x2e2   :  { %4895 = vst [vmem:[#allocation3 + $0x2a0] sm:$0xf] %v8667_v27  ;;  %4896 = vst [vmem:[#allocation3 + $0x2c4] sm:$0xf] %v8692_v3  ;;  %v8669_v23 = vpack.c.bf16 %v4621_v36, %v4621_v36  ;;  %v4471_v18 = vld [vmem:[#allocation2 + $0xbb] sm:$0xff]  ;;  %v8719_v33 = vpack.c.bf16 %v4923_v50, %v4923_v50  ;;  %v4472_v37 = vld [vmem:[#allocation2 + $0xc3] sm:$0xff] }
 0x2e3   :  { %5046 = vst [vmem:[#allocation3 + $0x2a4] sm:$0xf] %v8716_v45  ;;  %5047 = vst [vmem:[#allocation3 + $0x2c8] sm:$0xf] %v8717_v53  ;;  %v8645_v58 = vpack.c.bf16 %v4471_v18, %v4471_v18  ;;  %v4623_v30 = vld [vmem:[#allocation2 + $0xc4] sm:$0xff]  ;;  %v4774_v22 = vld [vmem:[#allocation2 + $0xcc] sm:$0xff]  ;;  %v8646_v16 = vpack.c.bf16 %v4472_v37, %v4472_v37 }
 0x2e4   :  { %4746 = vst [vmem:[#allocation3 + $0x2e4] sm:$0xf] %v8692_v3  ;;  %4595 = vst [vmem:[#allocation3 + $0x2e0] sm:$0xf] %v8643_v60  ;;  %v10032_v52 = vld [vmem:[#allocation3 + $0x320] ss:$36 sps:$4 sm:$0xff]   ;;  %v8671_v10 = vpack.c.bf16 %v4623_v30, %v4623_v30  ;;  %v8696_v54 = vpack.c.bf16 %v4774_v22, %v4774_v22 }
 0x2e5   :  { %4596 = vst [vmem:[#allocation3 + $0x304] sm:$0xf] %v8644_v62  ;;  %6610 = vmatmul.mubr.bf16.gmra.mxu1 %v10029_v43  ;;  %4747 = vst [vmem:[#allocation3 + $0x308] sm:$0xf] %v8669_v23  ;;  %v10051_v41 = vld [vmem:[#allocation3 + $0x14] ss:$36 sps:$4 sm:$0xff]  }
 0x2e6   :  { %4897 = vst [vmem:[#allocation3 + $0x2e8] sm:$0xf] %v8669_v23  ;;  %4898 = vst [vmem:[#allocation3 + $0x30c] sm:$0xf] %v8694_v1  ;;  %6617 = vmatprep.mubr.bf16.mxu1 %v8218_v4  ;;  %v10055_v17 = vld [vmem:[#allocation3 + $0x1c] ss:$36 sps:$4 sm:$0xff]  }
 0x2e7   :  { %5048 = vst [vmem:[#allocation3 + $0x2ec] sm:$0xf] %v8718_v63  ;;  %4748 = vst [vmem:[#allocation3 + $0x32c] sm:$0xf] %v8694_v1  ;;  %v10064_v27 = vld [vmem:[#allocation7 + $0x238] sm:$0xff]   ;;  %v4924_v35 = vld [vmem:[#allocation2 + $0xc5] sm:$0xff] }
 0x2e8   :  { %5049 = vst [vmem:[#allocation3 + $0x310] sm:$0xf] %v8719_v33  ;;  %4597 = vst [vmem:[#allocation3 + $0x328] sm:$0xf] %v8645_v58  ;;  %6746 = vmatmul.mubr.bf16.gmra.mxu0 %v10032_v52  ;;  %v10049_v0 = vld [vmem:[#allocation3 + $0x10] ss:$36 sps:$4 sm:$0xff]   ;;  %v8720_v43 = vpack.c.bf16 %v4924_v35, %v4924_v35 }
 0x2e9   :  { %4598 = vst [vmem:[#allocation3 + $0x34c] sm:$0xf] %v8646_v16  ;;  %4749 = vst [vmem:[#allocation3 + $0x350] sm:$0xf] %v8671_v10  ;;  %6753 = vmatprep.mubr.bf16.mxu0 %v8220_v15  ;;  %v4925_v26 = vld [vmem:[#allocation2 + $0xcd] sm:$0xff]  ;;  %v5053_v29 = vld [vmem:[#allocation2 + $0x16] sm:$0xff] }
 0x2ea   :  { %4899 = vst [vmem:[#allocation3 + $0x330] sm:$0xf] %v8671_v10  ;;  %4900 = vst [vmem:[#allocation3 + $0x354] sm:$0xf] %v8696_v54  ;;  %v4473_v3 = vld [vmem:[#allocation2 + $0xcb] sm:$0xff]  ;;  %v8721_v53 = vpack.c.bf16 %v4925_v26, %v4925_v26  ;;  %v5054_v60 = vld [vmem:[#allocation2 + $0x1e] sm:$0xff]  ;;  %v8723_v42 = vpack.c.bf16 %v5053_v29, %v5053_v29 }
 0x2eb   :  { %4750 = vst [vmem:[#allocation3 + $0x374] sm:$0xf] %v8696_v54  ;;  %v10060_v45 = vld [vmem:[#allocation3 + $0x5c] ss:$36 sps:$4 sm:$0xff]   ;;  %v8647_v5 = vpack.c.bf16 %v4473_v3, %v4473_v3  ;;  %5050 = vst [vmem:[#allocation3 + $0x334] sm:$0xf] %v8720_v43  ;;  %v8724_v36 = vpack.c.bf16 %v5054_v60, %v5054_v60 }
 0x2ec   :  { %v10053_v62 = vld [vmem:[#allocation3 + $0x18] ss:$36 sps:$4 sm:$0xff]   ;;  %v5055_v20 = vld [vmem:[#allocation2 + $0x26] sm:$0xff]  ;;  %v5056_v2 = vld [vmem:[#allocation2 + $0x2e] sm:$0xff]  ;;  %5051 = vst [vmem:[#allocation3 + $0x358] sm:$0xf] %v8721_v53 }
 0x2ed   :  { %6618 = vmatmul.mubr.bf16.gmra.mxu1 %v8217_v49  ;;  %v5057_v24 = vld [vmem:[#allocation2 + $0x36] sm:$0xff]  ;;  %v10063_v23 = vld [vmem:[#allocation3 + $0x64] ss:$36 sps:$4 sm:$0xff]   ;;  %4599 = vst [vmem:[#allocation3 + $0x370] sm:$0xf] %v8647_v5  ;;  %v8725_v50 = vpack.c.bf16 %v5055_v20, %v5055_v20  ;;  %v8726_v63 = vpack.c.bf16 %v5056_v2, %v5056_v2  ;;  %v5060_v37 = vld [vmem:[#allocation2 + $0x4e] sm:$0xff] }
 0x2ee   :  { %6793 = vmatprep.mubr.bf16.mxu1 %v10051_v41  ;;  %v10071_v1 = vld [vmem:[#allocation7 + $0x230] sm:$0xff]   ;;  %v5058_v18 = vld [vmem:[#allocation2 + $0x3e] sm:$0xff]  ;;  %v8727_v4 = vpack.c.bf16 %v5057_v24, %v5057_v24  ;;  %v5059_v33 = vld [vmem:[#allocation2 + $0x46] sm:$0xff]  ;;  %5179 = vst [vmem:[#allocation3 + $0x20] sm:$0xf] %v8723_v42  ;;  %v8730_v22 = vpack.c.bf16 %v5060_v37, %v5060_v37 }
 0x2ef   :  { %5180 = vst [vmem:[#allocation3 + $0x44] sm:$0xf] %v8724_v36  ;;  %v8728_v58 = vpack.c.bf16 %v5058_v18, %v5058_v18  ;;  %v8729_v30 = vpack.c.bf16 %v5059_v33, %v5059_v33  ;;  %v5061_v52 = vld [vmem:[#allocation2 + $0x56] sm:$0xff]  ;;  %v5062_v16 = vld [vmem:[#allocation2 + $0x5e] sm:$0xff]  ;;  %v5063_v10 = vld [vmem:[#allocation2 + $0x66] sm:$0xff] }
 0x2f0   :  { %6754 = vmatmul.mubr.bf16.gmra.mxu0 %v8219_v34  ;;  %5181 = vst [vmem:[#allocation3 + $0x68] sm:$0xf] %v8725_v50  ;;  %5182 = vst [vmem:[#allocation3 + $0x8c] sm:$0xf] %v8726_v63  ;;  %v8731_v54 = vpack.c.bf16 %v5061_v52, %v5061_v52  ;;  %v8732_v15 = vpack.c.bf16 %v5062_v16, %v5062_v16  ;;  %v5064_v49 = vld [vmem:[#allocation2 + $0x6e] sm:$0xff]  ;;  %v8733_v41 = vpack.c.bf16 %v5063_v10, %v5063_v10  ;;  %v5065_v34 = vld [vmem:[#allocation2 + $0x76] sm:$0xff] }
 0x2f1   :  { %6929 = vmatprep.mubr.bf16.mxu0 %v10055_v17  ;;  %5183 = vst [vmem:[#allocation3 + $0xb0] sm:$0xf] %v8727_v4  ;;  %v5066_v17 = vld [vmem:[#allocation2 + $0x7e] sm:$0xff]  ;;  %5184 = vst [vmem:[#allocation3 + $0xd4] sm:$0xf] %v8728_v58  ;;  %v8734_v35 = vpack.c.bf16 %v5064_v49, %v5064_v49  ;;  %v5067_v43 = vld [vmem:[#allocation2 + $0x86] sm:$0xff] }
 0x2f2   :  { %5185 = vst [vmem:[#allocation3 + $0xf8] sm:$0xf] %v8729_v30  ;;  %5186 = vst [vmem:[#allocation3 + $0x11c] sm:$0xf] %v8730_v22  ;;  %v8736_v26 = vpack.c.bf16 %v5066_v17, %v5066_v17  ;;  %v5069_v3 = vld [vmem:[#allocation2 + $0x96] sm:$0xff]  ;;  %v5070_v5 = vld [vmem:[#allocation2 + $0x9e] sm:$0xff] }
 0x2f3   :  { %5187 = vst [vmem:[#allocation3 + $0x140] sm:$0xf] %v8731_v54  ;;  %5188 = vst [vmem:[#allocation3 + $0x164] sm:$0xf] %v8732_v15  ;;  %v8739_v29 = vpack.c.bf16 %v5069_v3, %v5069_v3  ;;  %v5071_v60 = vld [vmem:[#allocation2 + $0xa6] sm:$0xff]  ;;  %v8740_v42 = vpack.c.bf16 %v5070_v5, %v5070_v5  ;;  %v5073_v2 = vld [vmem:[#allocation2 + $0xb6] sm:$0xff] }
 0x2f4   :  { %5189 = vst [vmem:[#allocation3 + $0x188] sm:$0xf] %v8733_v41  ;;  %5190 = vst [vmem:[#allocation3 + $0x1ac] sm:$0xf] %v8734_v35  ;;  %v8741_v36 = vpack.c.bf16 %v5071_v60, %v5071_v60  ;;  %v5074_v24 = vld [vmem:[#allocation2 + $0xbe] sm:$0xff]  ;;  %v5075_v50 = vld [vmem:[#allocation2 + $0xc6] sm:$0xff]  ;;  %v8743_v63 = vpack.c.bf16 %v5073_v2, %v5073_v2 }
 0x2f5   :  { %6794 = vmatmul.mubr.bf16.vlgmr.msra.gmra.mxu1 %v10049_v0  ;;  %v8735_v0 = vpack.c.bf16 %v5065_v34, %v5065_v34  ;;  %5192 = vst [vmem:[#allocation3 + $0x1f4] sm:$0xf] %v8736_v26  ;;  %5195 = vst [vmem:[#allocation3 + $0x260] sm:$0xf] %v8739_v29  ;;  %v8744_v18 = vpack.c.bf16 %v5074_v24, %v5074_v24  ;;  %v5076_v4 = vld [vmem:[#allocation2 + $0xce] sm:$0xff]  ;;  %v8745_v33 = vpack.c.bf16 %v5075_v50, %v5075_v50  ;;  %v10979_v16 = vld [vmem:[#allocation2] sm:$0xff] }
 0x2f6   :  { %6801 = vmatprep.mubr.bf16.mxu1 %v10060_v45  ;;  %9611 = vmatpush3.bf16.msra.mxu1 %v10064_v27  ;;  %v5068_v27 = vld [vmem:[#allocation2 + $0x8e] sm:$0xff]  ;;  %v8737_v45 = vpack.c.bf16 %v5067_v43, %v5067_v43  ;;  %v10058_v37 = vld [vmem:[#allocation3 + $0x58] ss:$36 sps:$4 sm:$0xff]   ;;  %v10061_v58 = vld [vmem:[#allocation3 + $0x60] ss:$36 sps:$4 sm:$0xff]   ;;  %v8746_v30 = vpack.c.bf16 %v5076_v4, %v5076_v4 }
 0x2f7   :  { %9612 = vmatprep.subr.bf16.mxu1 %v10974_v47  ;;  %v8738_v53 = vpack.c.bf16 %v5068_v27, %v5068_v27  ;;  %5191 = vst [vmem:[#allocation3 + $0x1d0] sm:$0xf] %v8735_v0  ;;  %5196 = vst [vmem:[#allocation3 + $0x284] sm:$0xf] %v8740_v42  ;;  %v10067_v22 = vld [vmem:[#allocation3 + $0xa4] ss:$36 sps:$4 sm:$0xff]  }
 0x2f8   :  { %6930 = vmatmul.mubr.bf16.vlgmr.msra.gmra.mxu0 %v10053_v62  ;;  %v5072_v62 = vld [vmem:[#allocation2 + $0xae] sm:$0xff]  ;;  %5193 = vst [vmem:[#allocation3 + $0x218] sm:$0xf] %v8737_v45  ;;  %5197 = vst [vmem:[#allocation3 + $0x2a8] sm:$0xf] %v8741_v36  ;;  %v10104_v10 = vld [vmem:[#allocation7 + $0x218] sm:$0xff]  }
 0x2f9   :  { %6937 = vmatprep.mubr.bf16.mxu0 %v10063_v23  ;;  %v8742_v20 = vpack.c.bf16 %v5072_v62, %v5072_v62  ;;  %v10084_v23 = vld [vmem:[#allocation7 + $0x228] sm:$0xff]   ;;  %5194 = vst [vmem:[#allocation3 + $0x23c] sm:$0xf] %v8738_v53  ;;  %5199 = vst [vmem:[#allocation3 + $0x2f0] sm:$0xf] %v8743_v63  ;;  %v10117_v41 = vld [vmem:[#allocation7 + $0x210] sm:$0xff]  }
 0x2fa   :  { %9613 = vmatpush3.bf16.msra.mxu1 %v10071_v1  ;;  %5200 = vst [vmem:[#allocation3 + $0x314] sm:$0xf] %v8744_v18  ;;  %5201 = vst [vmem:[#allocation3 + $0x338] sm:$0xf] %v8745_v33  ;;  %v10091_v1 = vld [vmem:[#allocation7 + $0x220] sm:$0xff]   ;;  %v10124_v34 = vld [vmem:[#allocation7 + $0x208] sm:$0xff]  }
 0x2fb   :  { %9614 = vmatprep.subr.bf16.mxu1 %v10974_v47  ;;  %5198 = vst [vmem:[#allocation3 + $0x2cc] sm:$0xf] %v8742_v20  ;;  %5202 = vst [vmem:[#allocation3 + $0x35c] sm:$0xf] %v8746_v30  ;;  %v10070_v52 = vld [vmem:[#allocation3 + $0xac] ss:$36 sps:$4 sm:$0xff]  }
 0x2fc   :  { %v10065_v47 = vld [vmem:[#allocation3 + $0xa0] ss:$36 sps:$4 sm:$0xff]   ;;  %v10068_v54 = vld [vmem:[#allocation3 + $0xa8] ss:$36 sps:$4 sm:$0xff]   ;;  %v10077_v49 = vld [vmem:[#allocation3 + $0xf4] ss:$36 sps:$4 sm:$0xff]  }
 0x2fd   :  { %6802 = vmatmul.mubr.bf16.gmra.mxu1 %v10058_v37  ;;  %v10074_v15 = vld [vmem:[#allocation3 + $0xec] ss:$36 sps:$4 sm:$0xff]   ;;  %v10080_v35 = vld [vmem:[#allocation3 + $0x134] ss:$36 sps:$4 sm:$0xff]   ;;  %v10083_v26 = vld [vmem:[#allocation3 + $0x13c] ss:$36 sps:$4 sm:$0xff]  }
 0x2fe   :  { %6809 = vmatprep.mubr.bf16.mxu1 %v10067_v22  ;;  %9615 = vmatpush3.bf16.msra.mxu1 %v10084_v23  ;;  %v10072_v17 = vld [vmem:[#allocation3 + $0xe8] ss:$36 sps:$4 sm:$0xff]   ;;  %v10075_v0 = vld [vmem:[#allocation3 + $0xf0] ss:$36 sps:$4 sm:$0xff]   ;;  %v10087_v3 = vld [vmem:[#allocation3 + $0x17c] ss:$36 sps:$4 sm:$0xff]  }
 0x2ff   :  { %9616 = vmatprep.subr.bf16.mxu1 %v10979_v16  ;;  %v10133_v43 = vld [vmem:[#allocation7 + $0x200] sm:$0xff]   ;;  %v10078_v27 = vld [vmem:[#allocation3 + $0x130] ss:$36 sps:$4 sm:$0xff]   ;;  %v10081_v45 = vld [vmem:[#allocation3 + $0x138] ss:$36 sps:$4 sm:$0xff]  }
 0x300   :  { %6938 = vmatmul.mubr.bf16.gmra.mxu0 %v10061_v58  ;;  %v10090_v53 = vld [vmem:[#allocation3 + $0x184] ss:$36 sps:$4 sm:$0xff]   ;;  %v10085_v5 = vld [vmem:[#allocation3 + $0x178] ss:$36 sps:$4 sm:$0xff]   ;;  %v10097_v62 = vld [vmem:[#allocation3 + $0x1cc] ss:$36 sps:$4 sm:$0xff]  }
 0x301   :  { %6945 = vmatprep.mubr.bf16.mxu0 %v10070_v52  ;;  %v10094_v29 = vld [vmem:[#allocation3 + $0x1c4] ss:$36 sps:$4 sm:$0xff]   ;;  %v10100_v36 = vld [vmem:[#allocation3 + $0x20c] ss:$36 sps:$4 sm:$0xff]   ;;  %v10103_v2 = vld [vmem:[#allocation3 + $0x214] ss:$36 sps:$4 sm:$0xff]  }
 0x302   :  { %9617 = vmatpush3.bf16.msra.mxu1 %v10091_v1  ;;  %v10088_v60 = vld [vmem:[#allocation3 + $0x180] ss:$36 sps:$4 sm:$0xff]   ;;  %v10095_v20 = vld [vmem:[#allocation3 + $0x1c8] ss:$36 sps:$4 sm:$0xff]   ;;  %v10107_v50 = vld [vmem:[#allocation3 + $0x254] ss:$36 sps:$4 sm:$0xff]  }
 0x303   :  { %9618 = vmatprep.subr.bf16.mxu1 %v10979_v16  ;;  %v10092_v42 = vld [vmem:[#allocation3 + $0x1c0] ss:$36 sps:$4 sm:$0xff]   ;;  %v10098_v24 = vld [vmem:[#allocation3 + $0x208] ss:$36 sps:$4 sm:$0xff]   ;;  %v10101_v23 = vld [vmem:[#allocation3 + $0x210] ss:$36 sps:$4 sm:$0xff]  }
 0x304   :  { %v10110_v63 = vld [vmem:[#allocation3 + $0x25c] ss:$36 sps:$4 sm:$0xff]   ;;  %v10105_v18 = vld [vmem:[#allocation3 + $0x250] ss:$36 sps:$4 sm:$0xff]   ;;  %v10116_v37 = vld [vmem:[#allocation3 + $0x2a4] ss:$36 sps:$4 sm:$0xff]  }
 0x305   :  { %6810 = vmatmul.mubr.bf16.gmra.mxu1 %v10065_v47  ;;  %v10113_v4 = vld [vmem:[#allocation3 + $0x29c] ss:$36 sps:$4 sm:$0xff]   ;;  %v10120_v30 = vld [vmem:[#allocation3 + $0x2e4] ss:$36 sps:$4 sm:$0xff]   ;;  %v10123_v1 = vld [vmem:[#allocation3 + $0x2ec] ss:$36 sps:$4 sm:$0xff]  }
 0x306   :  { %6817 = vmatprep.mubr.bf16.mxu1 %v10074_v15  ;;  %9619 = vmatpush3.bf16.msra.mxu1 %v10104_v10  ;;  %v10108_v33 = vld [vmem:[#allocation3 + $0x258] ss:$36 sps:$4 sm:$0xff]   ;;  %v10114_v22 = vld [vmem:[#allocation3 + $0x2a0] ss:$36 sps:$4 sm:$0xff]   ;;  %v10127_v47 = vld [vmem:[#allocation3 + $0x32c] ss:$36 sps:$4 sm:$0xff]  }
 0x307   :  { %9620 = vmatprep.subr.bf16.mxu1 %v10979_v16  ;;  %v10111_v58 = vld [vmem:[#allocation3 + $0x298] ss:$36 sps:$4 sm:$0xff]   ;;  %v10118_v52 = vld [vmem:[#allocation3 + $0x2e0] ss:$36 sps:$4 sm:$0xff]   ;;  %v10121_v10 = vld [vmem:[#allocation3 + $0x2e8] ss:$36 sps:$4 sm:$0xff]  }
 0x308   :  { %6946 = vmatmul.mubr.bf16.gmra.mxu0 %v10068_v54  ;;  %v10130_v54 = vld [vmem:[#allocation3 + $0x334] ss:$36 sps:$4 sm:$0xff]  }
 0x309   :  { %6953 = vmatprep.mubr.bf16.mxu0 %v10077_v49  ;;  %v5326_v15 = vld [vmem:[#allocation3 + $0x370] sm:$0xff]  ;;  %v5327_v49 = vld [vmem:[#allocation3 + $0x378] sm:$0xff] }
 0x30a   :  { %9621 = vmatpush3.bf16.msra.mxu1 %v10117_v41  ;;  %v10125_v41 = vld [vmem:[#allocation3 + $0x328] ss:$36 sps:$4 sm:$0xff]  }
 0x30b   :  { %9622 = vmatprep.subr.bf16.mxu1 %v10979_v16 }
 0x30d   :  { %6818 = vmatmul.mubr.bf16.gmra.mxu1 %v10072_v17  ;;  %v8224_v17 = vcombine.high %v5327_v49, %v5327_v49 }
 0x30e   :  { %6825 = vmatprep.mubr.bf16.mxu1 %v10080_v35  ;;  %9623 = vmatpush3.bf16.msra.mxu1 %v10124_v34  ;;  %v8222_v34 = vcombine.high %v5326_v15, %v5326_v15  ;;  %v10128_v35 = vld [vmem:[#allocation3 + $0x330] ss:$36 sps:$4 sm:$0xff]  }
 0x30f   :  { %9624 = vmatprep.subr.bf16.mxu1 %v10979_v16 }
 0x310   :  { %6954 = vmatmul.mubr.bf16.gmra.mxu0 %v10075_v0 }
 0x311   :  { %6961 = vmatprep.mubr.bf16.mxu0 %v10083_v26 }
 0x312   :  { %9625 = vmatpush3.bf16.msra.mxu1 %v10133_v43 }
 0x315   :  { %6826 = vmatmul.mubr.bf16.gmra.mxu1 %v10078_v27 }
 0x316   :  { %6833 = vmatprep.mubr.bf16.mxu1 %v10087_v3 }
 0x318   :  { %6962 = vmatmul.mubr.bf16.gmra.mxu0 %v10081_v45 }
 0x319   :  { %6969 = vmatprep.mubr.bf16.mxu0 %v10090_v53 }
 0x31d   :  { %6834 = vmatmul.mubr.bf16.gmra.mxu1 %v10085_v5  ;;  %v8221_v5 = vcombine.low %v5326_v15, %v5326_v15 }
 0x31e   :  { %6841 = vmatprep.mubr.bf16.mxu1 %v10094_v29 }
 0x320   :  { %6970 = vmatmul.mubr.bf16.gmra.mxu0 %v10088_v60 }
 0x321   :  { %6977 = vmatprep.mubr.bf16.mxu0 %v10097_v62  ;;  %v8223_v62 = vcombine.low %v5327_v49, %v5327_v49 }
 0x325   :  { %6842 = vmatmul.mubr.bf16.gmra.mxu1 %v10092_v42 }
 0x326   :  { %6849 = vmatprep.mubr.bf16.mxu1 %v10100_v36 }
 0x328   :  { %6978 = vmatmul.mubr.bf16.gmra.mxu0 %v10095_v20 }
 0x329   :  { %6985 = vmatprep.mubr.bf16.mxu0 %v10103_v2 }
 0x32d   :  { %6850 = vmatmul.mubr.bf16.gmra.mxu1 %v10098_v24 }
 0x32e   :  { %6857 = vmatprep.mubr.bf16.mxu1 %v10107_v50 }
 0x330   :  { %6986 = vmatmul.mubr.bf16.gmra.mxu0 %v10101_v23 }
 0x331   :  { %6993 = vmatprep.mubr.bf16.mxu0 %v10110_v63 }
 0x335   :  { %6858 = vmatmul.mubr.bf16.gmra.mxu1 %v10105_v18 }
 0x336   :  { %6865 = vmatprep.mubr.bf16.mxu1 %v10113_v4 }
 0x338   :  { %6994 = vmatmul.mubr.bf16.gmra.mxu0 %v10108_v33 }
 0x339   :  { %7001 = vmatprep.mubr.bf16.mxu0 %v10116_v37 }
 0x33d   :  { %6866 = vmatmul.mubr.bf16.gmra.mxu1 %v10111_v58 }
 0x33e   :  { %6873 = vmatprep.mubr.bf16.mxu1 %v10120_v30 }
 0x340   :  { %7002 = vmatmul.mubr.bf16.gmra.mxu0 %v10114_v22  ;;  %v10136_v22 = vld [vmem:[#allocation3 + $0x20] ss:$36 sps:$4 sm:$0xff]  }
 0x341   :  { %7009 = vmatprep.mubr.bf16.mxu0 %v10123_v1 }
 0x343   :  { %v9161_v0 = vpop.f32.mrf.mxu1 }
 0x345   :  { %6874 = vmatmul.mubr.bf16.gmra.mxu1 %v10118_v52  ;;  %v9162_v43 = vpop.f32.mrf.mxu1 }
 0x346   :  { %6881 = vmatprep.mubr.bf16.mxu1 %v10127_v47  ;;  %v9255_v26 = vpop.f32.mrf.mxu0  ;;  %v9163_v27 = vadd.f32 %v9162_v43, %v9161_v0 }
 0x347   :  { %v9164_v45 = vpop.f32.mrf.mxu1 }
 0x348   :  { %7010 = vmatmul.mubr.bf16.gmra.mxu0 %v10121_v10  ;;  %v9256_v3 = vpop.f32.mrf.mxu0 }
 0x349   :  { %7017 = vmatprep.mubr.bf16.mxu0 %v10130_v54  ;;  %v9257_v53 = vadd.f32 %v9256_v3, %v9255_v26  ;;  %v9165_v60 = vpop.f32.mrf.mxu1 }
 0x34a   :  { %v9258_v29 = vpop.f32.mrf.mxu0  ;;  %v9166_v36 = vadd.f32 %v9165_v60, %v9164_v45 }
 0x34b   :  { %v10986_v42 = vadd.f32 %v9257_v53, %v9163_v27  ;;  %v10137_v27 = vld [vmem:[#allocation3 + $0x68] ss:$36 sps:$4 sm:$0xff]  }
 0x34c   :  { %v9259_v20 = vpop.f32.mrf.mxu0 }
 0x34d   :  { %6882 = vmatmul.mubr.bf16.gmra.mxu1 %v10125_v41  ;;  %v9260_v24 = vadd.f32 %v9259_v20, %v9258_v29 }
 0x34e   :  { %6889 = vmatprep.mubr.bf16.mxu1 %v8222_v34  ;;  %v9167_v2 = vpop.f32.mrf.mxu1 }
 0x34f   :  { %v10990_v63 = vadd.f32 %v9260_v24, %v9166_v36 }
 0x350   :  { %7018 = vmatmul.mubr.bf16.gmra.mxu0 %v10128_v35  ;;  %v9168_v23 = vpop.f32.mrf.mxu1 }
 0x351   :  { %7025 = vmatprep.mubr.bf16.mxu0 %v8224_v17  ;;  %v9261_v50 = vpop.f32.mrf.mxu0  ;;  %v9169_v18 = vadd.f32 %v9168_v23, %v9167_v2 }
 0x352   :  { %v9170_v33 = vpop.f32.mrf.mxu1 }
 0x353   :  { %v9262_v4 = vpop.f32.mrf.mxu0 }
 0x354   :  { %v9263_v37 = vadd.f32 %v9262_v4, %v9261_v50  ;;  %v9171_v30 = vpop.f32.mrf.mxu1  ;;  %v10138_v4 = vld [vmem:[#allocation3 + $0xb0] ss:$36 sps:$4 sm:$0xff]  }
 0x355   :  { %6890 = vmatmul.mubr.bf16.gmra.mxu1 %v8221_v5  ;;  %v9264_v58 = vpop.f32.mrf.mxu0  ;;  %v9172_v52 = vadd.f32 %v9171_v30, %v9170_v33 }
 0x356   :  { %9626 = vmatprep.mubr.msk.bf16.mxu1 %vm10230_vm0, %v10979_v16  ;;  %v10992_v1 = vadd.f32 %v9263_v37, %v9169_v18  ;;  %v9173_v10 = vpop.f32.mrf.mxu1 }
 0x357   :  { %v9265_v47 = vpop.f32.mrf.mxu0 }
 0x358   :  { %7026 = vmatmul.mubr.bf16.gmra.mxu0 %v8223_v62  ;;  %v9266_v54 = vadd.f32 %v9265_v47, %v9264_v58  ;;  %v9174_v49 = vpop.f32.mrf.mxu1 }
 0x359   :  { %v9267_v15 = vpop.f32.mrf.mxu0  ;;  %v9175_v34 = vadd.f32 %v9174_v49, %v9173_v10 }
 0x35a   :  { %v10996_v41 = vadd.f32 %v9266_v54, %v9172_v52  ;;  %v9176_v35 = vpop.f32.mrf.mxu1 }
 0x35b   :  { %v9268_v17 = vpop.f32.mrf.mxu0 }
 0x35c   :  { %v9269_v0 = vadd.f32 %v9268_v17, %v9267_v15  ;;  %v9177_v43 = vpop.f32.mrf.mxu1 }
 0x35d   :  { %9627 = vmatmul.mubr.bf16.vlgmr.msra.gmra.mxu1 %v10136_v22  ;;  %v9270_v26 = vpop.f32.mrf.mxu0  ;;  %v9178_v45 = vadd.f32 %v9177_v43, %v9176_v35 }
 0x35e   :  { %9630 = vmatprep.mubr.msk.bf16.mxu1 %vm10230_vm0, %v10979_v16  ;;  %v10998_v3 = vadd.f32 %v9269_v0, %v9175_v34  ;;  %v10139_v0 = vld [vmem:[#allocation3 + $0xf8] ss:$36 sps:$4 sm:$0xff]  }
 0x35f   :  { %v9271_v53 = vpop.f32.mrf.mxu0 }
 0x360   :  { %v9272_v29 = vadd.f32 %v9271_v53, %v9270_v26 }
 0x362   :  { %v11002_v36 = vadd.f32 %v9272_v29, %v9178_v45 }
 0x365   :  { %v9179_v5 = vpop.f32.mrf.mxu1  ;;  %9631 = vmatmul.mubr.bf16.gmra.mxu1 %v10137_v27 }
 0x366   :  { %9634 = vmatprep.mubr.msk.bf16.mxu1 %vm10230_vm0, %v10979_v16 }
 0x367   :  { %v9180_v62 = vpop.f32.mrf.mxu1 }
 0x368   :  { %v9273_v60 = vpop.f32.mrf.mxu0  ;;  %v9181_v20 = vadd.f32 %v9180_v62, %v9179_v5 }
 0x369   :  { %v9182_v24 = vpop.f32.mrf.mxu1 }
 0x36a   :  { %v9274_v2 = vpop.f32.mrf.mxu0 }
 0x36b   :  { %v9275_v50 = vadd.f32 %v9274_v2, %v9273_v60  ;;  %v9183_v18 = vpop.f32.mrf.mxu1 }
 0x36c   :  { %v9276_v23 = vpop.f32.mrf.mxu0  ;;  %v9184_v37 = vadd.f32 %v9183_v18, %v9182_v24  ;;  %v10140_v18 = vld [vmem:[#allocation3 + $0x140] ss:$36 sps:$4 sm:$0xff]  }
 0x36d   :  { %v11004_v33 = vadd.f32 %v9275_v50, %v9181_v20  ;;  %v9185_v30 = vpop.f32.mrf.mxu1  ;;  %9635 = vmatmul.mubr.bf16.gmra.mxu1 %v10138_v4 }
 0x36e   :  { %v9277_v58 = vpop.f32.mrf.mxu0  ;;  %9638 = vmatprep.mubr.msk.bf16.mxu1 %vm10230_vm0, %v10979_v16 }
 0x36f   :  { %v9278_v22 = vadd.f32 %v9277_v58, %v9276_v23  ;;  %v9186_v47 = vpop.f32.mrf.mxu1 }
 0x370   :  { %v9279_v52 = vpop.f32.mrf.mxu0  ;;  %v9187_v54 = vadd.f32 %v9186_v47, %v9185_v30 }
 0x371   :  { %v11008_v10 = vadd.f32 %v9278_v22, %v9184_v37  ;;  %v9188_v49 = vpop.f32.mrf.mxu1 }
 0x372   :  { %v9280_v15 = vpop.f32.mrf.mxu0 }
 0x373   :  { %v9281_v34 = vadd.f32 %v9280_v15, %v9279_v52  ;;  %v9189_v35 = vpop.f32.mrf.mxu1 }
 0x374   :  { %v9282_v17 = vpop.f32.mrf.mxu0  ;;  %v9190_v43 = vadd.f32 %v9189_v35, %v9188_v49 }
 0x375   :  { %v11010_v26 = vadd.f32 %v9281_v34, %v9187_v54  ;;  %v9191_v45 = vpop.f32.mrf.mxu1  ;;  %9639 = vmatmul.mubr.bf16.gmra.mxu1 %v10139_v0 }
 0x376   :  { %v9283_v27 = vpop.f32.mrf.mxu0  ;;  %9642 = vmatprep.mubr.msk.bf16.mxu1 %vm10230_vm0, %v10979_v16 }
 0x377   :  { %v9284_v53 = vadd.f32 %v9283_v27, %v9282_v17  ;;  %v9192_v29 = vpop.f32.mrf.mxu1 }
 0x378   :  { %v9285_v5 = vpop.f32.mrf.mxu0  ;;  %v9193_v62 = vadd.f32 %v9192_v29, %v9191_v45 }
 0x379   :  { %v11014_v60 = vadd.f32 %v9284_v53, %v9190_v43  ;;  %v9194_v2 = vpop.f32.mrf.mxu1  ;;  %v10141_v43 = vld [vmem:[#allocation3 + $0x188] ss:$36 sps:$4 sm:$0xff]  }
 0x37a   :  { %v9286_v20 = vpop.f32.mrf.mxu0 }
 0x37b   :  { %v9287_v24 = vadd.f32 %v9286_v20, %v9285_v5  ;;  %v9195_v23 = vpop.f32.mrf.mxu1 }
 0x37c   :  { %v9288_v50 = vpop.f32.mrf.mxu0  ;;  %v9196_v37 = vadd.f32 %v9195_v23, %v9194_v2 }
 0x37d   :  { %v11016_v4 = vadd.f32 %v9287_v24, %v9193_v62  ;;  %v9197_v30 = vpop.f32.mrf.mxu1  ;;  %9643 = vmatmul.mubr.bf16.gmra.mxu1 %v10140_v18 }
 0x37e   :  { %v9289_v58 = vpop.f32.mrf.mxu0  ;;  %9646 = vmatprep.mubr.msk.bf16.mxu1 %vm10230_vm0, %v10979_v16 }
 0x37f   :  { %v9290_v22 = vadd.f32 %v9289_v58, %v9288_v50  ;;  %v9198_v47 = vpop.f32.mrf.mxu1 }
 0x380   :  { %v9291_v52 = vpop.f32.mrf.mxu0  ;;  %v9199_v15 = vadd.f32 %v9198_v47, %v9197_v30  ;;  %v10142_v30 = vld [vmem:[#allocation3 + $0x1d0] ss:$36 sps:$4 sm:$0xff]  }
 0x381   :  { %v11020_v54 = vadd.f32 %v9290_v22, %v9196_v37  ;;  %v9200_v34 = vpop.f32.mrf.mxu1 }
 0x382   :  { %v9292_v49 = vpop.f32.mrf.mxu0 }
 0x383   :  { %v9293_v17 = vadd.f32 %v9292_v49, %v9291_v52  ;;  %v9201_v0 = vpop.f32.mrf.mxu1 }
 0x384   :  { %v9294_v35 = vpop.f32.mrf.mxu0  ;;  %v9202_v45 = vadd.f32 %v9201_v0, %v9200_v34 }
 0x385   :  { %v11022_v27 = vadd.f32 %v9293_v17, %v9199_v15  ;;  %v9203_v5 = vpop.f32.mrf.mxu1  ;;  %9647 = vmatmul.mubr.bf16.gmra.mxu1 %v10141_v43 }
 0x386   :  { %v9295_v53 = vpop.f32.mrf.mxu0  ;;  %9650 = vmatprep.mubr.msk.bf16.mxu1 %vm10230_vm0, %v10979_v16 }
 0x387   :  { %v9296_v29 = vadd.f32 %v9295_v53, %v9294_v35  ;;  %v9204_v20 = vpop.f32.mrf.mxu1 }
 0x388   :  { %v9297_v62 = vpop.f32.mrf.mxu0  ;;  %v9205_v24 = vadd.f32 %v9204_v20, %v9203_v5 }
 0x389   :  { %v11026_v2 = vadd.f32 %v9296_v29, %v9202_v45  ;;  %v9206_v23 = vpop.f32.mrf.mxu1 }
 0x38a   :  { %v9298_v50 = vpop.f32.mrf.mxu0 }
 0x38b   :  { %v9299_v18 = vadd.f32 %v9298_v50, %v9297_v62  ;;  %v9207_v58 = vpop.f32.mrf.mxu1  ;;  %v10143_v62 = vld [vmem:[#allocation3 + $0x218] ss:$36 sps:$4 sm:$0xff]  }
 0x38c   :  { %v9300_v37 = vpop.f32.mrf.mxu0  ;;  %v9208_v52 = vadd.f32 %v9207_v58, %v9206_v23 }
 0x38d   :  { %v11028_v22 = vadd.f32 %v9299_v18, %v9205_v24  ;;  %v9209_v15 = vpop.f32.mrf.mxu1  ;;  %9651 = vmatmul.mubr.bf16.gmra.mxu1 %v10142_v30 }
 0x38e   :  { %v9301_v47 = vpop.f32.mrf.mxu0  ;;  %9654 = vmatprep.mubr.msk.bf16.mxu1 %vm10230_vm0, %v10979_v16 }
 0x38f   :  { %v9302_v49 = vadd.f32 %v9301_v47, %v9300_v37  ;;  %v9210_v17 = vpop.f32.mrf.mxu1 }
 0x390   :  { %v9303_v34 = vpop.f32.mrf.mxu0  ;;  %v9211_v0 = vadd.f32 %v9210_v17, %v9209_v15 }
 0x391   :  { %v11032_v35 = vadd.f32 %v9302_v49, %v9208_v52  ;;  %v9212_v45 = vpop.f32.mrf.mxu1 }
 0x392   :  { %v9304_v43 = vpop.f32.mrf.mxu0 }
 0x393   :  { %v9305_v53 = vadd.f32 %v9304_v43, %v9303_v34  ;;  %v9213_v29 = vpop.f32.mrf.mxu1 }
 0x394   :  { %v9306_v5 = vpop.f32.mrf.mxu0  ;;  %v9214_v24 = vadd.f32 %v9213_v29, %v9212_v45 }
 0x395   :  { %v11034_v20 = vadd.f32 %v9305_v53, %v9211_v0  ;;  %v9215_v23 = vpop.f32.mrf.mxu1  ;;  %9655 = vmatmul.mubr.bf16.gmra.mxu1 %v10143_v62  ;;  %v10144_v0 = vld [vmem:[#allocation3 + $0x260] ss:$36 sps:$4 sm:$0xff]  }
 0x396   :  { %v9307_v50 = vpop.f32.mrf.mxu0  ;;  %9658 = vmatprep.mubr.msk.bf16.mxu1 %vm10230_vm0, %v10979_v16 }
 0x397   :  { %v9308_v18 = vadd.f32 %v9307_v50, %v9306_v5  ;;  %v9216_v58 = vpop.f32.mrf.mxu1 }
 0x398   :  { %v9309_v37 = vpop.f32.mrf.mxu0  ;;  %v9217_v52 = vadd.f32 %v9216_v58, %v9215_v23 }
 0x399   :  { %v11038_v30 = vadd.f32 %v9308_v18, %v9214_v24  ;;  %v9218_v15 = vpop.f32.mrf.mxu1 }
 0x39a   :  { %v9310_v47 = vpop.f32.mrf.mxu0 }
 0x39b   :  { %v9311_v49 = vadd.f32 %v9310_v47, %v9309_v37  ;;  %v9219_v17 = vpop.f32.mrf.mxu1 }
 0x39c   :  { %v9312_v34 = vpop.f32.mrf.mxu0  ;;  %v9220_v45 = vadd.f32 %v9219_v17, %v9218_v15 }
 0x39d   :  { %v11040_v43 = vadd.f32 %v9311_v49, %v9217_v52  ;;  %v9221_v29 = vpop.f32.mrf.mxu1  ;;  %9659 = vmatmul.mubr.bf16.gmra.mxu1 %v10144_v0  ;;  %v10145_v52 = vld [vmem:[#allocation3 + $0x2a8] ss:$36 sps:$4 sm:$0xff]  }
 0x39e   :  { %v9313_v53 = vpop.f32.mrf.mxu0  ;;  %9662 = vmatprep.mubr.msk.bf16.mxu1 %vm10230_vm0, %v10979_v16 }
 0x39f   :  { %v9314_v5 = vadd.f32 %v9313_v53, %v9312_v34  ;;  %v9222_v24 = vpop.f32.mrf.mxu1 }
 0x3a0   :  { %v9315_v62 = vpop.f32.mrf.mxu0  ;;  %v9223_v23 = vadd.f32 %v9222_v24, %v9221_v29 }
 0x3a1   :  { %v11044_v50 = vadd.f32 %v9314_v5, %v9220_v45  ;;  %v9224_v37 = vpop.f32.mrf.mxu1 }
 0x3a2   :  { %v9316_v18 = vpop.f32.mrf.mxu0 }
 0x3a3   :  { %v9317_v58 = vadd.f32 %v9316_v18, %v9315_v62  ;;  %v9225_v31 = vpop.f32.mrf.mxu1 }
 0x3a4   :  { %v9318_v47 = vpop.f32.mrf.mxu0  ;;  %v9226_v15 = vadd.f32 %v9225_v31, %v9224_v37 }
 0x3a5   :  { %v11046_v49 = vadd.f32 %v9317_v58, %v9223_v23  ;;  %v9227_v0 = vpop.f32.mrf.mxu1  ;;  %9663 = vmatmul.mubr.bf16.gmra.mxu1 %v10145_v52  ;;  %v10146_v23 = vld [vmem:[#allocation3 + $0x2f0] ss:$36 sps:$4 sm:$0xff]  }
 0x3a6   :  { %v9319_v17 = vpop.f32.mrf.mxu0  ;;  %9666 = vmatprep.mubr.msk.bf16.mxu1 %vm10230_vm0, %v10979_v16 }
 0x3a7   :  { %v9320_v34 = vadd.f32 %v9319_v17, %v9318_v47  ;;  %v9228_v45 = vpop.f32.mrf.mxu1 }
 0x3a8   :  { %v9321_v53 = vpop.f32.mrf.mxu0  ;;  %v9229_v29 = vadd.f32 %v9228_v45, %v9227_v0 }
 0x3a9   :  { %v11050_v5 = vadd.f32 %v9320_v34, %v9226_v15  ;;  %v9230_v62 = vpop.f32.mrf.mxu1 }
 0x3aa   :  { %v9322_v24 = vpop.f32.mrf.mxu0 }
 0x3ab   :  { %v9323_v18 = vadd.f32 %v9322_v24, %v9321_v53  ;;  %v9231_v59 = vpop.f32.mrf.mxu1 }
 0x3ac   :  { %v9324_v32 = vpop.f32.mrf.mxu0  ;;  %v9232_v31 = vadd.f32 %v9231_v59, %v9230_v62 }
 0x3ad   :  { %v11052_v58 = vadd.f32 %v9323_v18, %v9229_v29  ;;  %v9233_v52 = vpop.f32.mrf.mxu1  ;;  %9667 = vmatmul.mubr.bf16.gmra.mxu1 %v10146_v23  ;;  %v10147_v29 = vld [vmem:[#allocation3 + $0x338] ss:$36 sps:$4 sm:$0xff]  }
 0x3ae   :  { %v9325_v37 = vpop.f32.mrf.mxu0  ;;  %9670 = vmatprep.mubr.msk.bf16.mxu1 %vm10230_vm0, %v10979_v16 }
 0x3af   :  { %v9326_v47 = vadd.f32 %v9325_v37, %v9324_v32  ;;  %v9234_v15 = vpop.f32.mrf.mxu1 }
 0x3b0   :  { %v9327_v17 = vpop.f32.mrf.mxu0  ;;  %v9235_v0 = vadd.f32 %v9234_v15, %v9233_v52  ;;  %v10148_v52 = vld [vmem:[#allocation3 + $0x380] ss:$0 sps:$4 sm:$0xff]  }
 0x3b1   :  { %v11056_v34 = vadd.f32 %v9326_v47, %v9232_v31  ;;  %v9236_v53 = vpop.f32.mrf.mxu1 }
 0x3b2   :  { %v9328_v45 = vpop.f32.mrf.mxu0 }
 0x3b3   :  { %v9329_v24 = vadd.f32 %v9328_v45, %v9327_v17  ;;  %v9237_v21 = vpop.f32.mrf.mxu1 }
 0x3b4   :  { %v9330_v8 = vpop.f32.mrf.mxu0 }
 0x3b5   :  { %v11058_v18 = vadd.f32 %v9329_v24, %v9235_v0  ;;  %v9349_v62 = vpop.f32.mrf.mxu1  ;;  %9671 = vmatmul.mubr.bf16.gmra.mxu1 %v10147_v29 }
 0x3b6   :  { %v9331_v59 = vpop.f32.mrf.mxu0  ;;  %9674 = vmatprep.mubr.msk.bf16.mxu1 %vm10230_vm0, %v10979_v16 }
 0x3b7   :  { %v9350_v23 = vpop.f32.mrf.mxu1 }
 0x3b8   :  { %v9443_v32 = vpop.f32.mrf.mxu0  ;;  %v9351_v37 = vadd.f32 %v9350_v23, %v9349_v62 }
 0x3b9   :  { %v9352_v47 = vpop.f32.mrf.mxu1 }
 0x3ba   :  { %v9444_v31 = vpop.f32.mrf.mxu0  ;;  %v6796_v15 = vadd.f32 %v9351_v37, %v10986_v42 }
 0x3bb   :  { %v9445_v17 = vadd.f32 %v9444_v31, %v9443_v32  ;;  %v9353_v21 = vpop.f32.mrf.mxu1 }
 0x3bc   :  { %v9446_v8 = vpop.f32.mrf.mxu0  ;;  %v9354_v45 = vadd.f32 %v9353_v21, %v9352_v47 }
 0x3bd   :  { %v11063_v0 = vadd.f32 %v9445_v17, %v6796_v15  ;;  %v9355_v24 = vpop.f32.mrf.mxu1  ;;  %9675 = vmatmul.mubr.bf16.gmra.mxu1 %v10148_v52 }
 0x3be   :  { %v9447_v53 = vpop.f32.mrf.mxu0  ;;  %v6799_v29 = vadd.f32 %v9354_v45, %v10990_v63 }
 0x3bf   :  { %v9448_v16 = vadd.f32 %v9447_v53, %v9446_v8  ;;  %v9356_v13 = vpop.f32.mrf.mxu1 }
 0x3c0   :  { %v9449_v59 = vpop.f32.mrf.mxu0  ;;  %v9357_v62 = vadd.f32 %v9356_v13, %v9355_v24 }
 0x3c1   :  { %v11066_v23 = vadd.f32 %v9448_v16, %v6799_v29  ;;  %v9358_v9 = vpop.f32.mrf.mxu1 }
 0x3c2   :  { %v9450_v51 = vpop.f32.mrf.mxu0  ;;  %v6804_v42 = vadd.f32 %v9357_v62, %v10992_v1 }
 0x3c3   :  { %v9451_v32 = vadd.f32 %v9450_v51, %v9449_v59  ;;  %v9359_v31 = vpop.f32.mrf.mxu1 }
 0x3c4   :  { %v9452_v37 = vpop.f32.mrf.mxu0  ;;  %v9360_v47 = vadd.f32 %v9359_v31, %v9358_v9 }
 0x3c5   :  { %v11069_v15 = vadd.f32 %v9451_v32, %v6804_v42  ;;  %v9361_v52 = vpop.f32.mrf.mxu1 }
 0x3c6   :  { %v9453_v17 = vpop.f32.mrf.mxu0  ;;  %v6807_v63 = vadd.f32 %v9360_v47, %v10996_v41 }
 0x3c7   :  { %v9454_v8 = vadd.f32 %v9453_v17, %v9452_v37  ;;  %v9362_v45 = vpop.f32.mrf.mxu1 }
 0x3c8   :  { %v9455_v21 = vpop.f32.mrf.mxu0  ;;  %v9363_v13 = vadd.f32 %v9362_v45, %v9361_v52 }
 0x3c9   :  { %v11072_v53 = vadd.f32 %v9454_v8, %v6807_v63  ;;  %v9364_v29 = vpop.f32.mrf.mxu1 }
 0x3ca   :  { %v9456_v24 = vpop.f32.mrf.mxu0  ;;  %v6812_v1 = vadd.f32 %v9363_v13, %v10998_v3 }
 0x3cb   :  { %v9457_v51 = vadd.f32 %v9456_v24, %v9455_v21  ;;  %v9365_v59 = vpop.f32.mrf.mxu1 }
 0x3cc   :  { %v9458_v16 = vpop.f32.mrf.mxu0  ;;  %v9366_v9 = vadd.f32 %v9365_v59, %v9364_v29 }
 0x3cd   :  { %v11075_v62 = vadd.f32 %v9457_v51, %v6812_v1  ;;  %v9367_v32 = vpop.f32.mrf.mxu1 }
 0x3ce   :  { %v9459_v42 = vpop.f32.mrf.mxu0  ;;  %v6815_v41 = vadd.f32 %v9366_v9, %v11002_v36 }
 0x3cf   :  { %v9460_v37 = vadd.f32 %v9459_v42, %v9458_v16  ;;  %v9368_v47 = vpop.f32.mrf.mxu1 }
 0x3d0   :  { %v9461_v31 = vpop.f32.mrf.mxu0  ;;  %v9369_v17 = vadd.f32 %v9368_v47, %v9367_v32 }
 0x3d1   :  { %v11078_v52 = vadd.f32 %v9460_v37, %v6815_v41  ;;  %v9370_v8 = vpop.f32.mrf.mxu1 }
 0x3d2   :  { %v9462_v63 = vpop.f32.mrf.mxu0  ;;  %v6820_v3 = vadd.f32 %v9369_v17, %v11004_v33 }
 0x3d3   :  { %v9463_v21 = vadd.f32 %v9462_v63, %v9461_v31  ;;  %v9371_v13 = vpop.f32.mrf.mxu1 }
 0x3d4   :  { %v9464_v45 = vpop.f32.mrf.mxu0  ;;  %v9372_v24 = vadd.f32 %v9371_v13, %v9370_v8 }
 0x3d5   :  { %v11081_v29 = vadd.f32 %v9463_v21, %v6820_v3  ;;  %v9373_v51 = vpop.f32.mrf.mxu1 }
 0x3d6   :  { %v9465_v1 = vpop.f32.mrf.mxu0  ;;  %v6823_v36 = vadd.f32 %v9372_v24, %v11008_v10 }
 0x3d7   :  { %v9466_v16 = vadd.f32 %v9465_v1, %v9464_v45  ;;  %v9374_v9 = vpop.f32.mrf.mxu1 }
 0x3d8   :  { %v9467_v59 = vpop.f32.mrf.mxu0  ;;  %v9375_v42 = vadd.f32 %v9374_v9, %v9373_v51 }
 0x3d9   :  { %v11084_v32 = vadd.f32 %v9466_v16, %v6823_v36  ;;  %v9376_v37 = vpop.f32.mrf.mxu1 }
 0x3da   :  { %v9468_v41 = vpop.f32.mrf.mxu0  ;;  %v6828_v33 = vadd.f32 %v9375_v42, %v11010_v26 }
 0x3db   :  { %v9469_v31 = vadd.f32 %v9468_v41, %v9467_v59  ;;  %v9377_v17 = vpop.f32.mrf.mxu1 }
 0x3dc   :  { %v9470_v47 = vpop.f32.mrf.mxu0  ;;  %v9378_v63 = vadd.f32 %v9377_v17, %v9376_v37 }
 0x3dd   :  { %v11087_v8 = vadd.f32 %v9469_v31, %v6828_v33  ;;  %v9379_v21 = vpop.f32.mrf.mxu1 }
 0x3de   :  { %v9471_v3 = vpop.f32.mrf.mxu0  ;;  %v6831_v10 = vadd.f32 %v9378_v63, %v11014_v60 }
 0x3df   :  { %v9472_v45 = vadd.f32 %v9471_v3, %v9470_v47  ;;  %v9380_v24 = vpop.f32.mrf.mxu1 }
 0x3e0   :  { %v9473_v13 = vpop.f32.mrf.mxu0  ;;  %v9381_v1 = vadd.f32 %v9380_v24, %v9379_v21 }
 0x3e1   :  { %v11090_v51 = vadd.f32 %v9472_v45, %v6831_v10  ;;  %v9382_v16 = vpop.f32.mrf.mxu1 }
 0x3e2   :  { %v9474_v36 = vpop.f32.mrf.mxu0  ;;  %v6836_v26 = vadd.f32 %v9381_v1, %v11016_v4 }
 0x3e3   :  { %v9475_v59 = vadd.f32 %v9474_v36, %v9473_v13  ;;  %v9383_v42 = vpop.f32.mrf.mxu1 }
 0x3e4   :  { %v9476_v9 = vpop.f32.mrf.mxu0  ;;  %v9384_v41 = vadd.f32 %v9383_v42, %v9382_v16 }
 0x3e5   :  { %v11093_v37 = vadd.f32 %v9475_v59, %v6836_v26  ;;  %v9385_v31 = vpop.f32.mrf.mxu1 }
 0x3e6   :  { %v9477_v33 = vpop.f32.mrf.mxu0  ;;  %v6839_v60 = vadd.f32 %v9384_v41, %v11020_v54 }
 0x3e7   :  { %v9478_v47 = vadd.f32 %v9477_v33, %v9476_v9  ;;  %v9386_v63 = vpop.f32.mrf.mxu1 }
 0x3e8   :  { %v9479_v17 = vpop.f32.mrf.mxu0  ;;  %v9387_v3 = vadd.f32 %v9386_v63, %v9385_v31 }
 0x3e9   :  { %v11096_v21 = vadd.f32 %v9478_v47, %v6839_v60  ;;  %v9388_v45 = vpop.f32.mrf.mxu1 }
 0x3ea   :  { %v9480_v10 = vpop.f32.mrf.mxu0  ;;  %v6844_v4 = vadd.f32 %v9387_v3, %v11022_v27 }
 0x3eb   :  { %v9481_v13 = vadd.f32 %v9480_v10, %v9479_v17  ;;  %v9389_v1 = vpop.f32.mrf.mxu1 }
 0x3ec   :  { %v9482_v24 = vpop.f32.mrf.mxu0  ;;  %v9390_v36 = vadd.f32 %v9389_v1, %v9388_v45 }
 0x3ed   :  { %v11099_v16 = vadd.f32 %v9481_v13, %v6844_v4  ;;  %v9391_v59 = vpop.f32.mrf.mxu1 }
 0x3ee   :  { %v9483_v26 = vpop.f32.mrf.mxu0  ;;  %v6847_v54 = vadd.f32 %v9390_v36, %v11026_v2 }
 0x3ef   :  { %v9484_v9 = vadd.f32 %v9483_v26, %v9482_v24  ;;  %v9392_v41 = vpop.f32.mrf.mxu1 }
 0x3f0   :  { %v9485_v42 = vpop.f32.mrf.mxu0  ;;  %v9393_v33 = vadd.f32 %v9392_v41, %v9391_v59 }
 0x3f1   :  { %v11102_v31 = vadd.f32 %v9484_v9, %v6847_v54  ;;  %v9394_v47 = vpop.f32.mrf.mxu1 }
 0x3f2   :  { %v9486_v60 = vpop.f32.mrf.mxu0  ;;  %v6852_v27 = vadd.f32 %v9393_v33, %v11028_v22 }
 0x3f3   :  { %v9487_v17 = vadd.f32 %v9486_v60, %v9485_v42  ;;  %v9395_v3 = vpop.f32.mrf.mxu1 }
 0x3f4   :  { %v9488_v63 = vpop.f32.mrf.mxu0  ;;  %v9396_v10 = vadd.f32 %v9395_v3, %v9394_v47 }
 0x3f5   :  { %v11105_v45 = vadd.f32 %v9487_v17, %v6852_v27  ;;  %v9397_v13 = vpop.f32.mrf.mxu1 }
 0x3f6   :  { %v9489_v4 = vpop.f32.mrf.mxu0  ;;  %v6855_v2 = vadd.f32 %v9396_v10, %v11032_v35 }
 0x3f7   :  { %v9490_v24 = vadd.f32 %v9489_v4, %v9488_v63  ;;  %v9398_v36 = vpop.f32.mrf.mxu1 }
 0x3f8   :  { %v9491_v1 = vpop.f32.mrf.mxu0  ;;  %v9399_v26 = vadd.f32 %v9398_v36, %v9397_v13 }
 0x3f9   :  { %v11108_v59 = vadd.f32 %v9490_v24, %v6855_v2  ;;  %v9400_v9 = vpop.f32.mrf.mxu1 }
 0x3fa   :  { %v9492_v54 = vpop.f32.mrf.mxu0  ;;  %v6860_v22 = vadd.f32 %v9399_v26, %v11034_v20 }
 0x3fb   :  { %v9493_v42 = vadd.f32 %v9492_v54, %v9491_v1  ;;  %v9401_v33 = vpop.f32.mrf.mxu1 }
 0x3fc   :  { %v9494_v41 = vpop.f32.mrf.mxu0  ;;  %v9402_v60 = vadd.f32 %v9401_v33, %v9400_v9 }
 0x3fd   :  { %v11111_v47 = vadd.f32 %v9493_v42, %v6860_v22  ;;  %v9403_v17 = vpop.f32.mrf.mxu1 }
 0x3fe   :  { %v9495_v27 = vpop.f32.mrf.mxu0  ;;  %v6863_v35 = vadd.f32 %v9402_v60, %v11038_v30 }
 0x3ff   :  { %v9496_v63 = vadd.f32 %v9495_v27, %v9494_v41  ;;  %v9404_v10 = vpop.f32.mrf.mxu1 }
 0x400   :  { %v9497_v3 = vpop.f32.mrf.mxu0  ;;  %v9405_v4 = vadd.f32 %v9404_v10, %v9403_v17 }
 0x401   :  { %v11114_v13 = vadd.f32 %v9496_v63, %v6863_v35  ;;  %v9406_v24 = vpop.f32.mrf.mxu1 }
 0x402   :  { %v9498_v2 = vpop.f32.mrf.mxu0  ;;  %v6868_v20 = vadd.f32 %v9405_v4, %v11040_v43 }
 0x403   :  { %v9499_v1 = vadd.f32 %v9498_v2, %v9497_v3  ;;  %v9407_v26 = vpop.f32.mrf.mxu1 }
 0x404   :  { %v9500_v36 = vpop.f32.mrf.mxu0  ;;  %v9408_v54 = vadd.f32 %v9407_v26, %v9406_v24 }
 0x405   :  { %v11117_v9 = vadd.f32 %v9499_v1, %v6868_v20  ;;  %v9409_v42 = vpop.f32.mrf.mxu1 }
 0x406   :  { %v9501_v22 = vpop.f32.mrf.mxu0  ;;  %v6871_v30 = vadd.f32 %v9408_v54, %v11044_v50 }
 0x407   :  { %v9502_v41 = vadd.f32 %v9501_v22, %v9500_v36  ;;  %v9410_v60 = vpop.f32.mrf.mxu1 }
 0x408   :  { %v9503_v33 = vpop.f32.mrf.mxu0  ;;  %v9411_v27 = vadd.f32 %v9410_v60, %v9409_v42 }
 0x409   :  { %v11120_v17 = vadd.f32 %v9502_v41, %v6871_v30  ;;  %v9412_v63 = vpop.f32.mrf.mxu1 }
 0x40a   :  { %v9504_v35 = vpop.f32.mrf.mxu0  ;;  %v6876_v43 = vadd.f32 %v9411_v27, %v11046_v49 }
 0x40b   :  { %v9505_v3 = vadd.f32 %v9504_v35, %v9503_v33  ;;  %v9413_v4 = vpop.f32.mrf.mxu1 }
 0x40c   :  { %v9506_v10 = vpop.f32.mrf.mxu0  ;;  %v9414_v2 = vadd.f32 %v9413_v4, %v9412_v63 }
 0x40d   :  { %v11123_v24 = vadd.f32 %v9505_v3, %v6876_v43  ;;  %v9415_v1 = vpop.f32.mrf.mxu1 }
 0x40e   :  { %v9507_v20 = vpop.f32.mrf.mxu0  ;;  %v6879_v50 = vadd.f32 %v9414_v2, %v11050_v5 }
 0x40f   :  { %v9508_v36 = vadd.f32 %v9507_v20, %v9506_v10  ;;  %v9416_v54 = vpop.f32.mrf.mxu1 }
 0x410   :  { %v9509_v26 = vpop.f32.mrf.mxu0  ;;  %v9417_v22 = vadd.f32 %v9416_v54, %v9415_v1 }
 0x411   :  { %v11126_v42 = vadd.f32 %v9508_v36, %v6879_v50  ;;  %v9418_v41 = vpop.f32.mrf.mxu1 }
 0x412   :  { %v9510_v30 = vpop.f32.mrf.mxu0  ;;  %v6884_v49 = vadd.f32 %v9417_v22, %v11052_v58 }
 0x413   :  { %v9511_v33 = vadd.f32 %v9510_v30, %v9509_v26  ;;  %v9419_v27 = vpop.f32.mrf.mxu1 }
 0x414   :  { %v9512_v60 = vpop.f32.mrf.mxu0  ;;  %v9420_v35 = vadd.f32 %v9419_v27, %v9418_v41 }
 0x415   :  { %v11129_v63 = vadd.f32 %v9511_v33, %v6884_v49  ;;  %v9421_v3 = vpop.f32.mrf.mxu1 }
 0x416   :  { %v9513_v43 = vpop.f32.mrf.mxu0  ;;  %v6887_v5 = vadd.f32 %v9420_v35, %v11056_v34 }
 0x417   :  { %v9514_v10 = vadd.f32 %v9513_v43, %v9512_v60  ;;  %v9422_v4 = vpop.f32.mrf.mxu1 }
 0x418   :  { %v9515_v2 = vpop.f32.mrf.mxu0  ;;  %v9423_v20 = vadd.f32 %v9422_v4, %v9421_v3 }
 0x419   :  { %v11132_v1 = vadd.f32 %v9514_v10, %v6887_v5  ;;  %v9424_v50 = vpop.f32.mrf.mxu1 }
 0x41a   :  { %v9516_v36 = vpop.f32.mrf.mxu0  ;;  %v6892_v58 = vadd.f32 %v9423_v20, %v11058_v18 }
 0x41b   :  { %11423 = vst [vmem:[#allocation13_spill] sm:$0xff] %v11132_v1  ;;  %v9517_v26 = vadd.f32 %v9516_v36, %v9515_v2  ;;  %v9425_v54 = vpop.f32.mrf.mxu1 }
 0x41c   :  { %v9518_v22 = vpop.f32.mrf.mxu0 }
 0x41d   :  { %v11135_v30 = vadd.f32 %v9517_v26, %v6892_v58  ;;  %v7067_v41 = vpop.f32.mrf.mxu1 }
 0x41e   :  { %v9519_v49 = vpop.f32.mrf.mxu0 }
 0x41f   :  { %v9628_v33 = vpop.f32.mrf.mxu1  ;;  %v11141_v49 = vadd.f32 %v7067_v41, %v11063_v0 }
 0x421   :  { %v7070_v27 = vpop.f32.mrf.mxu1 }
 0x422   :  { %v11138_v54 = vadd.f32 %v7070_v27, %v11066_v23 }
 0x423   :  { %v9629_v34 = vpop.f32.mrf.mxu1 }
 0x425   :  { %v7075_v60 = vpop.f32.mrf.mxu1 }
 0x426   :  { %v11144_v33 = vadd.f32 %v7075_v60, %v11069_v15 }
 0x427   :  { %v9632_v35 = vpop.f32.mrf.mxu1 }
 0x428   :  { %v7170_v35 = vmul.f32 %v11138_v54, %v10652_v6  ;;  %v7171_v23 = vmul.f32 %v11144_v33, %v10648_v57 }
 0x429   :  { %v7078_v43 = vpop.f32.mrf.mxu1 }
 0x42a   :  { %v7226_v15 = vmul.f32 %v7170_v35, %v7170_v35 }
 0x42b   :  { %v9633_v3 = vpop.f32.mrf.mxu1 }
 0x42c   :  { %v11149_v3 = vadd.f32 %v7078_v43, %v11072_v53  ;;  %v7227_v43 = vmul.f32 %v7171_v23, %v7171_v23 }
 0x42d   :  { %v7083_v5 = vpop.f32.mrf.mxu1 }
 0x42e   :  { %v11156_v0 = vadd.f32 %v7083_v5, %v11075_v62  ;;  %v7172_v27 = vmul.f32 %v11149_v3, %v10656_v12 }
 0x42f   :  { %v9636_v10 = vpop.f32.mrf.mxu1 }
 0x431   :  { %v7086_v4 = vpop.f32.mrf.mxu1 }
 0x432   :  { %v11161_v6 = vadd.f32 %v7086_v4, %v11078_v52 }
 0x433   :  { %v9637_v50 = vpop.f32.mrf.mxu1 }
 0x434   :  { %v7169_v50 = vmul.f32 %v11141_v49, %v10644_v25  ;;  %v7173_v25 = vmul.f32 %v11156_v0, %v10658_v7 }
 0x435   :  { %v7091_v1 = vpop.f32.mrf.mxu1 }
 0x436   :  { %v7225_v60 = vmul.f32 %v7169_v50, %v7169_v50  ;;  %v7194_v62 = vadd.f32 %v7170_v35, %v7169_v50 }
 0x437   :  { %v9640_v18 = vpop.f32.mrf.mxu1 }
 0x438   :  { %v11166_v18 = vadd.f32 %v7091_v1, %v11081_v29  ;;  %v7250_v5 = vadd.f32 %v7226_v15, %v7225_v60  ;;  %v7195_v4 = vadd.f32 %v7194_v62, %v7171_v23 }
 0x439   :  { %v7094_v2 = vpop.f32.mrf.mxu1 }
 0x43a   :  { %v11171_v12 = vadd.f32 %v7094_v2, %v11084_v32  ;;  %v7175_v7 = vmul.f32 %v11166_v18, %v10662_v46  ;;  %v7196_v35 = vadd.f32 %v7195_v4, %v7172_v27 }
 0x43b   :  { %v9641_v20 = vpop.f32.mrf.mxu1 }
 0x43c   :  { %v7228_v20 = vmul.f32 %v7172_v27, %v7172_v27  ;;  %v7197_v23 = vadd.f32 %v7196_v35, %v7173_v25  ;;  %v7231_v60 = vmul.f32 %v7175_v7, %v7175_v7 }
 0x43d   :  { %v7099_v36 = vpop.f32.mrf.mxu1 }
 0x43e   :  { %v11176_v29 = vadd.f32 %v7099_v36, %v11087_v8 }
 0x43f   :  { %v9644_v58 = vpop.f32.mrf.mxu1 }
 0x440   :  { %v7174_v58 = vmul.f32 %v11161_v6, %v10660_v44  ;;  %v7176_v44 = vmul.f32 %v11171_v12, %v10676_v61  ;;  %v7177_v46 = vmul.f32 %v11176_v29, %v11413_v48 }
 0x441   :  { %v7102_v26 = vpop.f32.mrf.mxu1 }
 0x442   :  { %v7230_v15 = vmul.f32 %v7174_v58, %v7174_v58  ;;  %v11181_v32 = vadd.f32 %v7102_v26, %v11090_v51  ;;  %v7198_v27 = vadd.f32 %v7197_v23, %v7174_v58  ;;  %v7232_v62 = vmul.f32 %v7176_v44, %v7176_v44 }
 0x443   :  { %v9645_v22 = vpop.f32.mrf.mxu1 }
 0x444   :  { %v7251_v22 = vadd.f32 %v7250_v5, %v7227_v43  ;;  %v7178_v61 = vmul.f32 %v11181_v32, %v10700_v28 }
 0x445   :  { %v7107_v34 = vpop.f32.mrf.mxu1 }
 0x446   :  { %v7252_v50 = vadd.f32 %v7251_v22, %v7228_v20  ;;  %v11186_v8 = vadd.f32 %v7107_v34, %v11093_v37  ;;  %v7233_v20 = vmul.f32 %v7177_v46, %v7177_v46  ;;  %v7234_v4 = vmul.f32 %v7178_v61, %v7178_v61 }
 0x447   :  { %v9648_v10 = vpop.f32.mrf.mxu1 }
 0x448   :  { %v7229_v10 = vmul.f32 %v7173_v25, %v7173_v25  ;;  %v7199_v25 = vadd.f32 %v7198_v27, %v7175_v7  ;;  %v7179_v48 = vmul.f32 %v11186_v8, %v10704_v14 }
 0x449   :  { %v7110_v41 = vpop.f32.mrf.mxu1 }
 0x44a   :  { %v11191_v51 = vadd.f32 %v7110_v41, %v11096_v21  ;;  %v7200_v58 = vadd.f32 %v7199_v25, %v7176_v44  ;;  %v7235_v7 = vmul.f32 %v7179_v48, %v7179_v48 }
 0x44b   :  { %v9649_v53 = vpop.f32.mrf.mxu1 }
 0x44c   :  { %v7253_v53 = vadd.f32 %v7252_v50, %v7229_v10  ;;  %v7180_v28 = vmul.f32 %v11191_v51, %v10718_v39  ;;  %v7201_v22 = vadd.f32 %v7200_v58, %v7177_v46 }
 0x44d   :  { %v7115_v57 = vpop.f32.mrf.mxu1 }
 0x44e   :  { %v7254_v43 = vadd.f32 %v7253_v53, %v7230_v15  ;;  %v11196_v37 = vadd.f32 %v7115_v57, %v11099_v16  ;;  %v7202_v35 = vadd.f32 %v7201_v22, %v7178_v61  ;;  %v7236_v15 = vmul.f32 %v7180_v28, %v7180_v28 }
 0x44f   :  { %v9652_v52 = vpop.f32.mrf.mxu1 }
 0x450   :  { %v7255_v5 = vadd.f32 %v7254_v43, %v7231_v60  ;;  %v7181_v14 = vmul.f32 %v11196_v37, %v10724_v40 }
 0x451   :  { %v7118_v1 = vpop.f32.mrf.mxu1 }
 0x452   :  { %v7256_v52 = vadd.f32 %v7255_v5, %v7232_v62  ;;  %v11201_v21 = vadd.f32 %v7118_v1, %v11102_v31  ;;  %v7203_v31 = vadd.f32 %v7202_v35, %v7179_v48  ;;  %v7237_v23 = vmul.f32 %v7181_v14, %v7181_v14 }
 0x453   :  { %v9653_v2 = vpop.f32.mrf.mxu1 }
 0x454   :  { %v7257_v10 = vadd.f32 %v7256_v52, %v7233_v20  ;;  %v7182_v39 = vmul.f32 %v11201_v21, %v10736_v56 }
 0x455   :  { %v7123_v36 = vpop.f32.mrf.mxu1 }
 0x456   :  { %v11206_v16 = vadd.f32 %v7123_v36, %v11105_v45  ;;  %v7258_v50 = vadd.f32 %v7257_v10, %v7234_v4  ;;  %v7204_v45 = vadd.f32 %v7203_v31, %v7180_v28  ;;  %v7238_v36 = vmul.f32 %v7182_v39, %v7182_v39  ;;  %v11424_v28 = vld [vmem:[#allocation16_spill] sm:$0xff] }
 0x457   :  { %v9656_v26 = vpop.f32.mrf.mxu1 }
 0x458   :  { %v7259_v2 = vadd.f32 %v7258_v50, %v7235_v7  ;;  %v7183_v40 = vmul.f32 %v11206_v16, %v11414_v19  ;;  %v7205_v43 = vadd.f32 %v7204_v45, %v7181_v14  ;;  %v11425_v14 = vld [vmem:[#allocation17_spill] sm:$0xff] }
 0x459   :  { %v7126_v34 = vpop.f32.mrf.mxu1 }
 0x45a   :  { %v11211_v1 = vadd.f32 %v7126_v34, %v11108_v59  ;;  %v7260_v46 = vadd.f32 %v7259_v2, %v7236_v15  ;;  %v7239_v61 = vmul.f32 %v7183_v40, %v7183_v40  ;;  %v7206_v25 = vadd.f32 %v7205_v43, %v7182_v39 }
 0x45b   :  { %v9657_v41 = vpop.f32.mrf.mxu1 }
 0x45c   :  { %v7184_v56 = vmul.f32 %v11211_v1, %v10755_v38  ;;  %v7261_v62 = vadd.f32 %v7260_v46, %v7237_v23  ;;  %v7207_v48 = vadd.f32 %v7206_v25, %v7183_v40 }
 0x45d   :  { %v7131_v57 = vpop.f32.mrf.mxu1 }
 0x45e   :  { %v11216_v60 = vadd.f32 %v7131_v57, %v11111_v47  ;;  %v7262_v5 = vadd.f32 %v7261_v62, %v7238_v36  ;;  %v7240_v34 = vmul.f32 %v7184_v56, %v7184_v56  ;;  %v7208_v52 = vadd.f32 %v7207_v48, %v7184_v56 }
 0x45f   :  { %v9660_v44 = vpop.f32.mrf.mxu1 }
 0x460   :  { %v7185_v19 = vmul.f32 %v11216_v60, %v11415_v11  ;;  %v7263_v58 = vadd.f32 %v7262_v5, %v7239_v61  ;;  %v11427_v61 = vld [vmem:[#allocation19_spill] sm:$0xff] }
 0x461   :  { %v7134_v53 = vpop.f32.mrf.mxu1 }
 0x462   :  { %v11221_v59 = vadd.f32 %v7134_v53, %v11114_v13  ;;  %v7241_v4 = vmul.f32 %v7185_v19, %v7185_v19  ;;  %v7209_v10 = vadd.f32 %v7208_v52, %v7185_v19 }
 0x463   :  { %v9661_v27 = vpop.f32.mrf.mxu1 }
 0x464   :  { %v7186_v38 = vmul.f32 %v11221_v59, %v10774_v55 }
 0x465   :  { %v7139_v26 = vpop.f32.mrf.mxu1 }
 0x466   :  { %v11226_v47 = vadd.f32 %v7139_v26, %v11117_v9  ;;  %v7264_v9 = vadd.f32 %v7263_v58, %v7240_v34  ;;  %v7242_v7 = vmul.f32 %v7186_v38, %v7186_v38  ;;  %v7210_v55 = vadd.f32 %v7209_v10, %v7186_v38  ;;  %v11428_v38 = vld [vmem:[#allocation21_spill] sm:$0xff] }
 0x467   :  { %v9664_v20 = vpop.f32.mrf.mxu1 }
 0x468   :  { %v7187_v41 = vmul.f32 %v11226_v47, %v11424_v28  ;;  %v7265_v50 = vadd.f32 %v7264_v9, %v7241_v4  ;;  %v11429_v4 = vld [vmem:[#allocation13_spill] sm:$0xff]  ;;  %v11430_v9 = vld [vmem:[#allocation23_spill] sm:$0xff] }
 0x469   :  { %v7142_v13 = vpop.f32.mrf.mxu1 }
 0x46a   :  { %v11233_v22 = vadd.f32 %v7142_v13, %v11120_v17  ;;  %v7243_v15 = vmul.f32 %v7187_v41, %v7187_v41  ;;  %v7266_v31 = vadd.f32 %v7265_v50, %v7242_v7  ;;  %v7211_v2 = vadd.f32 %v7210_v55, %v7187_v41  ;;  %v11426_v17 = vld [vmem:[#allocation18_spill] sm:$0xff]  ;;  %v11431_v55 = vld [vmem:[#allocation24_spill] sm:$0xff] }
 0x46b   :  { %v9665_v11 = vpop.f32.mrf.mxu1 }
 0x46c   :  { %v7188_v57 = vmul.f32 %v11233_v22, %v11425_v14  ;;  %v7267_v45 = vadd.f32 %v7266_v31, %v7243_v15 }
 0x46d   :  { %v7147_v35 = vpop.f32.mrf.mxu1 }
 0x46e   :  { %v11238_v39 = vadd.f32 %v7147_v35, %v11123_v24  ;;  %v7244_v23 = vmul.f32 %v7188_v57, %v7188_v57  ;;  %v7212_v46 = vadd.f32 %v7211_v2, %v7188_v57 }
 0x46f   :  { %v9668_v44 = vpop.f32.mrf.mxu1 }
 0x470   :  { %v7189_v40 = vmul.f32 %v11238_v39, %v11426_v17  ;;  %v7268_v56 = vadd.f32 %v7267_v45, %v7244_v23 }
 0x471   :  { %v7150_v53 = vpop.f32.mrf.mxu1 }
 0x472   :  { %v7245_v36 = vmul.f32 %v7189_v40, %v7189_v40  ;;  %v11243_v27 = vadd.f32 %v7150_v53, %v11126_v42  ;;  %v7213_v62 = vadd.f32 %v7212_v46, %v7189_v40 }
 0x473   :  { %v9669_v43 = vpop.f32.mrf.mxu1 }
 0x474   :  { %v7190_v24 = vmul.f32 %v11243_v27, %v11427_v61  ;;  %v7269_v25 = vadd.f32 %v7268_v56, %v7245_v36 }
 0x475   :  { %v7155_v26 = vpop.f32.mrf.mxu1 }
 0x476   :  { %v7214_v19 = vadd.f32 %v7213_v62, %v7190_v24  ;;  %v7246_v5 = vmul.f32 %v7190_v24, %v7190_v24  ;;  %v11248_v20 = vadd.f32 %v7155_v26, %v11129_v63 }
 0x477   :  { %v9672_v48 = vpop.f32.mrf.mxu1 }
 0x478   :  { %v7270_v34 = vadd.f32 %v7269_v25, %v7246_v5  ;;  %v7191_v58 = vmul.f32 %v11248_v20, %v11428_v38  ;;  %v7283_v38 = vld [vmem:[%s11375_s6] sm:$0x1] }
 0x479   :  { %v7158_v42 = vpop.f32.mrf.mxu1 }
 0x47a   :  { %v7215_v13 = vadd.f32 %v7214_v19, %v7191_v58  ;;  %v7247_v52 = vmul.f32 %v7191_v58, %v7191_v58  ;;  %v11253_v28 = vadd.f32 %v7158_v42, %v11429_v4  ;;  %v11432_v4 = vld [vmem:[#allocation25_spill] sm:$0xff] }
 0x47b   :  { %v9673_v41 = vpop.f32.mrf.mxu1 }
 0x47c   :  { %v7271_v11 = vadd.f32 %v7270_v34, %v7247_v52  ;;  %v7192_v10 = vmul.f32 %v11253_v28, %v11430_v9 }
 0x47d   :  { %v7163_v7 = vpop.f32.mrf.mxu1 }
 0x47e   :  { %v7216_v14 = vadd.f32 %v7215_v13, %v7192_v10  ;;  %v7248_v63 = vmul.f32 %v7192_v10, %v7192_v10  ;;  %v7164_v57 = vadd.f32 %v7163_v7, %v11135_v30  ;;  %v7287_v13 = vld [vmem:[%s11376_s7] sm:$0x1] }
 0x47f   :  { %v9676_v35 = vpop.f32.mrf.mxu1 }
 0x480   :  { %v7272_v50 = vadd.f32 %v7271_v11, %v7248_v63  ;;  %v7193_v15 = vmul.f32 %v7164_v57, %v11431_v55 }
 0x481   :  { %v7166_v44 = vpop.f32.mrf.mxu1 }
 0x482   :  { %v7217_v31 = vadd.f32 %v7216_v14, %v7193_v15  ;;  %v7249_v2 = vmul.f32 %v7193_v15, %v7193_v15 }
 0x483   :  { %v9677_v23 = vpop.f32.mrf.mxu1 }
 0x484   :  { %v7218_v17 = vrot.slane %v7217_v31, 4  ;;  %v7273_v40 = vadd.f32 %v7272_v50, %v7249_v2 }
 0x486   :  { %v7219_v53 = vadd.f32 %v7218_v17, %v7217_v31  ;;  %v7274_v45 = vrot.slane %v7273_v40, 4 }
 0x488   :  { %v7220_v46 = vrot.slane %v7219_v53, 2  ;;  %v7275_v36 = vadd.f32 %v7274_v45, %v7273_v40 }
 0x48a   :  { %v7221_v43 = vadd.f32 %v7220_v46, %v7219_v53  ;;  %v7276_v56 = vrot.slane %v7275_v36, 2 }
 0x48c   :  { %v7222_v62 = vrot.slane %v7221_v43, 1  ;;  %v7277_v61 = vadd.f32 %v7276_v56, %v7275_v36 }
 0x48e   :  { %v7223_v24 = vadd.f32 %v7222_v62, %v7221_v43  ;;  %v7278_v30 = vrot.slane %v7277_v61, 1 }
 0x490   :  { %v7224_v26 = vmul.f32 0.0078125, %v7223_v24  ;;  %v7279_v25 = vadd.f32 %v7278_v30, %v7277_v61  ;;  %v7356_v24 = vld [vmem:[%s11369_s0 + $0x20] sm:$0xff]  ;;  %v7357_v30 = vld [vmem:[%s11369_s0 + $0x28] sm:$0xff] }
 0x492   :  { %v7280_v19 = vmul.f32 0.0078125, %v7279_v25  ;;  %v7281_v5 = vmul.f32 %v7224_v26, %v7224_v26 }
 0x494   :  { %v7282_v48 = vsub.f32 %v7280_v19, %v7281_v5 }
 0x496   :  { %v7284_v34 = vadd.f32 1e-05, %v7282_v48 }
 0x498   :  { %10151 = vrsqrt.f32 %v7284_v34  ;;  %v7359_v34 = vld [vmem:[%s11369_s0 + $0x38] sm:$0xff] }
 0x4a5   :  { %v10152_v58 = vpop.eup %10151 }
 0x4a6   :  { %v7286_v42 = vmul.f32 %v10152_v58, %v7283_v38  ;;  %v7360_v38 = vld [vmem:[%s11369_s0 + $0x40] sm:$0xff]  ;;  %v7361_v58 = vld [vmem:[%s11369_s0 + $0x48] sm:$0xff] }
 0x4a8   :  { %v7288_v52 = vmul.f32 %v7286_v42, %v7224_v26  ;;  %v7294_v41 = vrot.slane %v7286_v42, %v11432_v4  ;;  %v7358_v26 = vld [vmem:[%s11369_s0 + $0x30] sm:$0xff] }
 0x4aa   :  { %v7289_v11 = vsub.f32 %v7287_v13, %v7288_v52  ;;  %v7320_v9 = vmul.f32 %v7294_v41, %v7164_v57  ;;  %v7296_v10 = vmul.f32 %v7294_v41, %v11141_v49  ;;  %v7297_v7 = vmul.f32 %v7294_v41, %v11138_v54  ;;  %v7376_v54 = vld [vmem:[%s11369_s0 + $0xc0] sm:$0xff] }
 0x4ab   :  { %v7298_v14 = vmul.f32 %v7294_v41, %v11144_v33  ;;  %v7299_v63 = vmul.f32 %v7294_v41, %v11149_v3  ;;  %v7300_v35 = vmul.f32 %v7294_v41, %v11156_v0  ;;  %v7301_v50 = vmul.f32 %v7294_v41, %v11161_v6 }
 0x4ac   :  { %v7325_v55 = vrot.slane %v7289_v11, %v11432_v4  ;;  %v7302_v15 = vmul.f32 %v7294_v41, %v11166_v18  ;;  %v7303_v44 = vmul.f32 %v7294_v41, %v11171_v12  ;;  %v7304_v57 = vmul.f32 %v7294_v41, %v11176_v29  ;;  %v7363_v11 = vld [vmem:[%s11369_s0 + $0x58] sm:$0xff] }
 0x4ad   :  { %v7305_v49 = vmul.f32 %v7294_v41, %v11181_v32  ;;  %v7306_v33 = vmul.f32 %v7294_v41, %v11186_v8  ;;  %v7307_v3 = vmul.f32 %v7294_v41, %v11191_v51  ;;  %v7308_v0 = vmul.f32 %v7294_v41, %v11196_v37 }
 0x4ae   :  { %v7351_v6 = vadd.f32 %v7325_v55, %v7320_v9  ;;  %v7309_v31 = vmul.f32 %v7294_v41, %v11201_v21  ;;  %v7310_v18 = vmul.f32 %v7294_v41, %v11206_v16  ;;  %v7311_v12 = vmul.f32 %v7294_v41, %v11211_v1  ;;  %v7364_v9 = vld [vmem:[%s11369_s0 + $0x60] sm:$0xff] }
 0x4af   :  { %v7312_v29 = vmul.f32 %v7294_v41, %v11216_v60  ;;  %v7313_v2 = vmul.f32 %v7294_v41, %v11221_v59  ;;  %v7314_v23 = vmul.f32 %v7294_v41, %v11226_v47  ;;  %v7315_v32 = vmul.f32 %v7294_v41, %v11233_v22  ;;  %v7352_v47 = vld [vmem:[%s11369_s0] sm:$0xff] }
 0x4b0   :  { %v7401_v8 = vadd.f32 %v7376_v54, %v7351_v6  ;;  %v7316_v51 = vmul.f32 %v7294_v41, %v11238_v39  ;;  %v7317_v37 = vmul.f32 %v7294_v41, %v11243_v27  ;;  %v7318_v17 = vmul.f32 %v7294_v41, %v11248_v20  ;;  %v7353_v27 = vld [vmem:[%s11369_s0 + $0x8] sm:$0xff]  ;;  %v7354_v20 = vld [vmem:[%s11369_s0 + $0x10] sm:$0xff]  ;;  %v7372_v6 = vld [vmem:[%s11369_s0 + $0xa0] sm:$0xff] }
 0x4b1   :  { %v7319_v21 = vmul.f32 %v7294_v41, %v11253_v28  ;;  %v7327_v16 = vadd.f32 %v7325_v55, %v7296_v10  ;;  %v7328_v40 = vadd.f32 %v7325_v55, %v7297_v7  ;;  %v7329_v1 = vadd.f32 %v7325_v55, %v7298_v14  ;;  %v7355_v28 = vld [vmem:[%s11369_s0 + $0x18] sm:$0xff]  ;;  %v7362_v41 = vld [vmem:[%s11369_s0 + $0x50] sm:$0xff]  ;;  %v7365_v14 = vld [vmem:[%s11369_s0 + $0x68] sm:$0xff] }
 0x4b2   :  { %v7426_v53 = vmax.f32 %v7401_v8, 0.0  ;;  %v7330_v60 = vadd.f32 %v7325_v55, %v7299_v63  ;;  %v7331_v45 = vadd.f32 %v7325_v55, %v7300_v35  ;;  %v7332_v59 = vadd.f32 %v7325_v55, %v7301_v50  ;;  %v7366_v63 = vld [vmem:[%s11369_s0 + $0x70] sm:$0xff]  ;;  %v7367_v35 = vld [vmem:[%s11369_s0 + $0x78] sm:$0xff] }
 0x4b3   :  { %v7333_v22 = vadd.f32 %v7325_v55, %v7302_v15  ;;  %v7334_v46 = vadd.f32 %v7325_v55, %v7303_v44  ;;  %v7335_v39 = vadd.f32 %v7325_v55, %v7304_v57  ;;  %v7336_v36 = vadd.f32 %v7325_v55, %v7305_v49  ;;  %v7368_v44 = vld [vmem:[%s11369_s0 + $0x80] sm:$0xff]  ;;  %v7370_v57 = vld [vmem:[%s11369_s0 + $0x90] sm:$0xff] }
 0x4b4   :  { %7451 = vst [vmem:[#allocation9 + $0xc0] sm:$0xff] %v7426_v53  ;;  %v7337_v43 = vadd.f32 %v7325_v55, %v7306_v33  ;;  %v7338_v56 = vadd.f32 %v7325_v55, %v7307_v3  ;;  %v7339_v62 = vadd.f32 %v7325_v55, %v7308_v0  ;;  %v7340_v61 = vadd.f32 %v7325_v55, %v7309_v31  ;;  %v7371_v0 = vld [vmem:[%s11369_s0 + $0x98] sm:$0xff]  ;;  %v7373_v31 = vld [vmem:[%s11369_s0 + $0xa8] sm:$0xff] }
 0x4b5   :  { %v7341_v25 = vadd.f32 %v7325_v55, %v7310_v18  ;;  %v7342_v19 = vadd.f32 %v7325_v55, %v7311_v12  ;;  %v7343_v5 = vadd.f32 %v7325_v55, %v7312_v29  ;;  %v7344_v48 = vadd.f32 %v7325_v55, %v7313_v2 }
 0x4b6   :  { %v7345_v42 = vadd.f32 %v7325_v55, %v7314_v23  ;;  %v7346_v13 = vadd.f32 %v7325_v55, %v7315_v32  ;;  %v7347_v52 = vadd.f32 %v7325_v55, %v7316_v51  ;;  %v7348_v4 = vadd.f32 %v7325_v55, %v7317_v37  ;;  %v7374_v23 = vld [vmem:[%s11369_s0 + $0xb0] sm:$0xff]  ;;  %v7375_v32 = vld [vmem:[%s11369_s0 + $0xb8] sm:$0xff] }
 0x4b7   :  { %v7349_v10 = vadd.f32 %v7325_v55, %v7318_v17  ;;  %v7350_v7 = vadd.f32 %v7325_v55, %v7319_v21  ;;  %v7377_v50 = vadd.f32 %v7352_v47, %v7327_v16  ;;  %v7378_v15 = vadd.f32 %v7353_v27, %v7328_v40  ;;  %v7369_v55 = vld [vmem:[%s11369_s0 + $0x88] sm:$0xff]  ;;  %s10231_s0 = smov [#allocation9]  }
 0x4b8   :  { %v7379_v54 = vadd.f32 %v7354_v20, %v7329_v1  ;;  %v7380_v49 = vadd.f32 %v7355_v28, %v7330_v60  ;;  %v7381_v33 = vadd.f32 %v7356_v24, %v7331_v45  ;;  %v7382_v3 = vadd.f32 %v7357_v30, %v7332_v59  ;;  %s7457_s1 = sshll.u32 %s10231_s0, 4  ;;  %s7458_s1 = int_to_ptr.vmem [resolvable:$true] %s7457_s1 }
 0x4b9   :  { %v7383_v18 = vadd.f32 %v7358_v26, %v7333_v22  ;;  %v7384_v12 = vadd.f32 %v7359_v34, %v7334_v46  ;;  %v7385_v29 = vadd.f32 %v7360_v38, %v7335_v39  ;;  %v7386_v2 = vadd.f32 %v7361_v58, %v7336_v36  ;;  %s10197_s19 = scalar_lea.vmem %s7458_s1, 3200  ;;  %p10202_p11 = scmp.lt.s32.totalorder %s7458_s1, %s7458_s1 }
 0x4ba   :  { %v7387_v8 = vadd.f32 %v7362_v41, %v7337_v43  ;;  %v7388_v51 = vadd.f32 %v7363_v11, %v7338_v56  ;;  %v7389_v37 = vadd.f32 %v7364_v9, %v7339_v62  ;;  %v7390_v17 = vadd.f32 %v7365_v14, %v7340_v61  ;;  %p10198_p10 = scmp.ne.s32.totalorder %s7458_s1, %s10197_s19  ;;  %p10203_p12 = scmp.lt.s32.totalorder %s10197_s19, %s10197_s19 }
 0x4bb   :  { %v7391_v21 = vadd.f32 %v7366_v63, %v7341_v25  ;;  %v7392_v16 = vadd.f32 %v7367_v35, %v7342_v19  ;;  %v7393_v40 = vadd.f32 %v7368_v44, %v7343_v5  ;;  %v7394_v1 = vadd.f32 %v7369_v55, %v7344_v48 }
 0x4bc   :  { %v7395_v53 = vadd.f32 %v7370_v57, %v7345_v42  ;;  %v7396_v60 = vadd.f32 %v7371_v0, %v7346_v13  ;;  %v7397_v45 = vadd.f32 %v7372_v6, %v7347_v52  ;;  %v7398_v59 = vadd.f32 %v7373_v31, %v7348_v4  ;;  %p10204_p13 = por %p10203_p12, %p10202_p11 }
 0x4bd   :  { %v7399_v47 = vadd.f32 %v7374_v23, %v7349_v10  ;;  %v7400_v22 = vadd.f32 %v7375_v32, %v7350_v7  ;;  %v7402_v46 = vmax.f32 %v7377_v50, 0.0  ;;  %v7403_v39 = vmax.f32 %v7378_v15, 0.0 }
 0x4be   :  { %v7404_v36 = vmax.f32 %v7379_v54, 0.0  ;;  %v7405_v27 = vmax.f32 %v7380_v49, 0.0  ;;  %v7406_v20 = vmax.f32 %v7381_v33, 0.0  ;;  %v7407_v28 = vmax.f32 %v7382_v3, 0.0  ;;  %p10205_p0 = pnand %p10204_p13, %p10198_p10 }
 0x4bf   :  { %v7408_v43 = vmax.f32 %v7383_v18, 0.0  ;;  %v7409_v56 = vmax.f32 %v7384_v12, 0.0  ;;  %v7410_v62 = vmax.f32 %v7385_v29, 0.0  ;;  %v7411_v61 = vmax.f32 %v7386_v2, 0.0  ;;  %7427 = vst [vmem:[#allocation9] sm:$0xff] %v7402_v46  ;;  %7428 = vst [vmem:[#allocation9 + $0x8] sm:$0xff] %v7403_v39 }
 0x4c0   :  { %v7412_v24 = vmax.f32 %v7387_v8, 0.0  ;;  %v7413_v30 = vmax.f32 %v7388_v51, 0.0  ;;  %v7414_v26 = vmax.f32 %v7389_v37, 0.0  ;;  %v7415_v25 = vmax.f32 %v7390_v17, 0.0  ;;  %7429 = vst [vmem:[#allocation9 + $0x10] sm:$0xff] %v7404_v36  ;;  %7430 = vst [vmem:[#allocation9 + $0x18] sm:$0xff] %v7405_v27 }
 0x4c1   :  { %7431 = vst [vmem:[#allocation9 + $0x20] sm:$0xff] %v7406_v20  ;;  %7432 = vst [vmem:[#allocation9 + $0x28] sm:$0xff] %v7407_v28  ;;  %v7416_v19 = vmax.f32 %v7391_v21, 0.0  ;;  %v7417_v5 = vmax.f32 %v7392_v16, 0.0  ;;  %v7418_v48 = vmax.f32 %v7393_v40, 0.0  ;;  %v7419_v34 = vmax.f32 %v7394_v1, 0.0 }
 0x4c2   :  { %7433 = vst [vmem:[#allocation9 + $0x30] sm:$0xff] %v7408_v43  ;;  %7434 = vst [vmem:[#allocation9 + $0x38] sm:$0xff] %v7409_v56  ;;  %v7420_v38 = vmax.f32 %v7395_v53, 0.0  ;;  %v7421_v58 = vmax.f32 %v7396_v60, 0.0  ;;  %v7422_v42 = vmax.f32 %v7397_v45, 0.0  ;;  %v7423_v13 = vmax.f32 %v7398_v59, 0.0 }
 0x4c3   :  { %7435 = vst [vmem:[#allocation9 + $0x40] sm:$0xff] %v7410_v62  ;;  %7436 = vst [vmem:[#allocation9 + $0x48] sm:$0xff] %v7411_v61  ;;  %v7424_v52 = vmax.f32 %v7399_v47, 0.0  ;;  %v7425_v4 = vmax.f32 %v7400_v22, 0.0 }
 0x4c4   :  { %7437 = vst [vmem:[#allocation9 + $0x50] sm:$0xff] %v7412_v24  ;;  %7438 = vst [vmem:[#allocation9 + $0x58] sm:$0xff] %v7413_v30 }
 0x4c5   :  { %7439 = vst [vmem:[#allocation9 + $0x60] sm:$0xff] %v7414_v26  ;;  %7440 = vst [vmem:[#allocation9 + $0x68] sm:$0xff] %v7415_v25 }
 0x4c6   :  { %7441 = vst [vmem:[#allocation9 + $0x70] sm:$0xff] %v7416_v19  ;;  %7442 = vst [vmem:[#allocation9 + $0x78] sm:$0xff] %v7417_v5 }
 0x4c7   :  { %7443 = vst [vmem:[#allocation9 + $0x80] sm:$0xff] %v7418_v48  ;;  %7444 = vst [vmem:[#allocation9 + $0x88] sm:$0xff] %v7419_v34 }
 0x4c8   :  { %7445 = vst [vmem:[#allocation9 + $0x90] sm:$0xff] %v7420_v38  ;;  %7446 = vst [vmem:[#allocation9 + $0x98] sm:$0xff] %v7421_v58 }
 0x4c9   :  { %7447 = vst [vmem:[#allocation9 + $0xa0] sm:$0xff] %v7422_v42  ;;  %7448 = vst [vmem:[#allocation9 + $0xa8] sm:$0xff] %v7423_v13 }
 0x4ca   :  { %7449 = vst [vmem:[#allocation9 + $0xb0] sm:$0xff] %v7424_v52  ;;  %7450 = vst [vmem:[#allocation9 + $0xb8] sm:$0xff] %v7425_v4 }
 0x4cb   :  { %10208 = shalt.err (!%p10205_p0)
}
 0x4cc   :  { %s10232_s20 = smov 128   ;;  %s10233_s21 = smov 8  }
 0x4cd   :  { %7463 = dma.vmem_to_hbm [thread:$0]  %s7458_s1, 3200, %s11377_s8, [#allocation6], %s10232_s20, %s10232_s20, %s10233_s21  }
 0x4ce   :  { %10221 = dma.done.wait [#allocation6], 3200  }
 0x4cf   :  { %10222 = vsyncadd [#allocation6], 4294964096 }
 0x4d0   :  { %7467 = vsyncpa [#allocation5], 1 }
 0x4d1   :  { %7468 = vsyncpa [#allocation8], 1 }
 0x4d2   :  { %7469 = vsyncpa [#allocation6], 1 }

</bundles_post_ra>
